<compile_context>
chip_gen: v6e
topology: v6e:2x2x1
jax: 0.10.0
libtpu: 0.0.40
codegen_flags: <defaults>
</compile_context>

<pallas_src>
import functools

import jax
import jax.numpy as jnp
from jax import lax
from jax.experimental import pallas as pl
from jax.experimental.pallas import tpu as pltpu


def _gru_cell(gi_t, h, w, b_hn):
    """One GRU cell update.

    gi_t : (3, B, H) f32  precomputed  x@W_ih + b_ih (+ b_hh folded for r, z)
    h    : (B, H)    f32  previous hidden state
    w    : (3, H, H) bf16 gate-major recurrent weights (r, z, n)
    b_hn : (1, H)    f32  hidden bias of the n gate (must stay inside r*(...))
    """
    hb = h.astype(w.dtype)
    gh_r = jnp.dot(hb, w[0], preferred_element_type=jnp.float32)
    gh_z = jnp.dot(hb, w[1], preferred_element_type=jnp.float32)
    gh_n = jnp.dot(hb, w[2], preferred_element_type=jnp.float32)
    r = jax.nn.sigmoid(gi_t[0] + gh_r)
    z = jax.nn.sigmoid(gi_t[1] + gh_z)
    n = jnp.tanh(gi_t[2] + r * (gh_n + b_hn))
    return (1.0 - z) * n + z * h


def _bigru_layer_kernel(gi_f_ref, gi_b_ref, whh_f_ref, whh_b_ref,
                        bhn_f_ref, bhn_b_ref, out_f_ref, out_b_ref):
    """Fused forward+backward GRU recurrence over a whole (VMEM-resident) sequence."""
    T, B, H = out_f_ref.shape

    # Loop-invariant loads hoisted out of the recurrence.
    w_f = whh_f_ref[...]       # (3, H, H) bf16
    w_b = whh_b_ref[...]
    b_f = bhn_f_ref[...]       # (1, H) f32
    b_b = bhn_b_ref[...]

    def step(t, carry):
        h_f, h_b = carry
        tb = T - 1 - t
        # Two independent chains per step -> MXU/EUP/VPU latency of one hides
        # behind the other.
        h_f = _gru_cell(gi_f_ref[t], h_f, w_f, b_f)
        h_b = _gru_cell(gi_b_ref[tb], h_b, w_b, b_b)
        out_f_ref[t] = h_f
        out_b_ref[tb] = h_b
        return (h_f, h_b)

    h0 = jnp.zeros((B, H), jnp.float32)
    lax.fori_loop(0, T, step, (h0, h0), unroll=True)


def _bigru_layer(gi_f, gi_b, whh_f, whh_b, bhn_f, bhn_b):
    """One bidirectional GRU layer. Returns (out_fwd, out_bwd), each (T, B, H)."""
    T, _, B, H = gi_f.shape

    def full(shape):
        return pl.BlockSpec(shape, lambda i, _s=shape: (0,) * len(_s))

    out_shape = (jax.ShapeDtypeStruct((T, B, H), jnp.float32),
                 jax.ShapeDtypeStruct((T, B, H), jnp.float32))

    return pl.pallas_call(
        _bigru_layer_kernel,
        out_shape=out_shape,
        grid_spec=pltpu.PrefetchScalarGridSpec(
            num_scalar_prefetch=0,
            grid=(1,),
            in_specs=[
                full((T, 3, B, H)),   # gi forward  (gate-major)
                full((T, 3, B, H)),   # gi backward (gate-major)
                full((3, H, H)),      # W_hh forward  (bf16)
                full((3, H, H)),      # W_hh backward (bf16)
                full((1, H)),         # b_hn forward
                full((1, H)),         # b_hn backward
            ],
            out_specs=(full((T, B, H)), full((T, B, H))),
        ),
        compiler_params=pltpu.CompilerParams(
            dimension_semantics=("arbitrary",)),
    )(gi_f, gi_b, whh_f, whh_b, bhn_f, bhn_b)


def _precompute_gi(x_seq, w_ih, b_ih, b_hh, H):
    """Hoisted input projection for a whole sequence, gate-major layout.

    Returns (T, 3, B, H) f32 with b_ih folded for all gates and b_hh folded
    for the r and z gates (the n gate's b_hn must stay inside the recurrence).
    """
    T, B, _ = x_seq.shape
    gi = jnp.einsum('tbd,dg->tbg', x_seq, w_ih) + b_ih[0]
    gi = gi.at[:, :, :2 * H].add(b_hh[0, :2 * H])
    return gi.reshape(T, B, 3, H).transpose(0, 2, 1, 3)


def _gate_major(w_hh, H):
    """(H, 3H) -> (3, H, H) with PyTorch gate order (r, z, n)."""
    return w_hh.reshape(H, 3, H).transpose(1, 0, 2)


def init_encoder_params(key, input_size, hidden_size, layers):
    """Deterministic parameter init matching the PyTorch module's shapes.

    Weights are stored transposed relative to PyTorch: (in_dim, 3H) / (H, 3H).
    """
    params = {}
    k = 1.0 / jnp.sqrt(hidden_size)
    keys = jax.random.split(key, 1 + layers * 2 * 4)
    it = iter(range(len(keys)))

    params["embedding"] = jax.random.normal(
        keys[next(it)], (input_size, hidden_size), dtype=jnp.float32)

    for layer in range(layers):
        in_dim = hidden_size if layer == 0 else 2 * hidden_size
        for suffix in ("", "_reverse"):
            name = f"l{layer}{suffix}"
            params[f"w_ih_{name}"] = jax.random.uniform(
                keys[next(it)], (in_dim, 3 * hidden_size), jnp.float32, -k, k)
            params[f"w_hh_{name}"] = jax.random.uniform(
                keys[next(it)], (hidden_size, 3 * hidden_size), jnp.float32, -k, k)
            params[f"b_ih_{name}"] = jax.random.uniform(
                keys[next(it)], (1, 3 * hidden_size), jnp.float32, -k, k)
            params[f"b_hh_{name}"] = jax.random.uniform(
                keys[next(it)], (1, 3 * hidden_size), jnp.float32, -k, k)
    return params


@functools.partial(jax.jit, static_argnames=("hidden_size", "layers"))
def encoder_rnn_forward(params, input_ids, input_lengths, hidden_size, layers):
    """Mirrors EncoderRNN.forward (inference, hidden=None).

    input_ids      : (batch, seq) int32 token ids
    input_lengths  : (batch,) int32   (unused by the PyTorch forward)
    returns:
      outputs : (batch, seq, hidden_size)          fwd + bwd sum
      hidden  : (batch, 2*layers, hidden_size)     final hidden states
    """
    del input_lengths  # only printed in the reference module
    H = hidden_size

    # input.transpose(0, 1) -> (seq, batch); embedding -> (seq, batch, H)
    ids_tm = input_ids.T
    layer_input = jnp.take(params["embedding"], ids_tm, axis=0).astype(jnp.float32)

    final_hiddens = []
    out_f = out_b = None
    for layer in range(layers):
        gi_f = _precompute_gi(layer_input,
                              params[f"w_ih_l{layer}"],
                              params[f"b_ih_l{layer}"],
                              params[f"b_hh_l{layer}"], H)
        gi_b = _precompute_gi(layer_input,
                              params[f"w_ih_l{layer}_reverse"],
                              params[f"b_ih_l{layer}_reverse"],
                              params[f"b_hh_l{layer}_reverse"], H)
        whh_f = _gate_major(params[f"w_hh_l{layer}"], H).astype(jnp.bfloat16)
        whh_b = _gate_major(params[f"w_hh_l{layer}_reverse"], H).astype(jnp.bfloat16)
        bhn_f = params[f"b_hh_l{layer}"][:, 2 * H:]
        bhn_b = params[f"b_hh_l{layer}_reverse"][:, 2 * H:]

        out_f, out_b = _bigru_layer(gi_f, gi_b, whh_f, whh_b, bhn_f, bhn_b)

        final_hiddens.append(out_f[-1])   # forward final state  (B, H)
        final_hiddens.append(out_b[0])    # backward final state (B, H)

        if layer < layers - 1:
            # next layer sees concat of both directions (T, B, 2H)
            layer_input = jnp.concatenate([out_f, out_b], axis=-1)

    # outputs[:, :, :H] + outputs[:, :, H:]  ==  fwd + bwd sum
    outputs = out_f + out_b                       # (T, B, H)
    hidden = jnp.stack(final_hiddens, axis=0)     # (2*layers, B, H)

    # transpose back to batch-major
    return outputs.transpose(1, 0, 2), hidden.transpose(1, 0, 2)


if __name__ == "__main__":
    INPUT_SIZE = 20     # vocab size
    HIDDEN = 32
    LAYERS = 3
    BATCH = 2
    SEQ = 8

    key = jax.random.PRNGKey(0)
    pkey, dkey = jax.random.split(key)

    params = init_encoder_params(pkey, INPUT_SIZE, HIDDEN, LAYERS)
    input_ids = jax.random.randint(dkey, (BATCH, SEQ), 0, INPUT_SIZE, dtype=jnp.int32)
    input_lengths = jnp.array([SEQ, SEQ - 2], dtype=jnp.int32)

    outputs, hidden = encoder_rnn_forward(
        params, input_ids, input_lengths, hidden_size=HIDDEN, layers=LAYERS)
    outputs = jax.block_until_ready(outputs)
    hidden = jax.block_until_ready(hidden)

    assert outputs.shape == (BATCH, SEQ, HIDDEN), outputs.shape
    assert hidden.shape == (BATCH, 2 * LAYERS, HIDDEN), hidden.shape
    assert bool(jnp.all(jnp.isfinite(outputs))) and bool(jnp.all(jnp.isfinite(hidden)))

    print("KERNEL_OK")
</pallas_src>

<mosaic_0001>
module attributes {stable_mosaic.version = 11 : i64} {
  func.func @_bigru_layer_kernel(%arg0: i32, %arg1: memref<8x3x2x32xf32, #tpu.memory_space<vmem>>, %arg2: memref<8x3x2x32xf32, #tpu.memory_space<vmem>>, %arg3: memref<3x32x32xbf16, #tpu.memory_space<vmem>>, %arg4: memref<3x32x32xbf16, #tpu.memory_space<vmem>>, %arg5: memref<1x32xf32, #tpu.memory_space<vmem>>, %arg6: memref<1x32xf32, #tpu.memory_space<vmem>>, %arg7: memref<8x2x32xf32, #tpu.memory_space<vmem>>, %arg8: memref<8x2x32xf32, #tpu.memory_space<vmem>>) attributes {dimension_semantics = [#tpu.dimension_semantics<arbitrary>], iteration_bounds = array<i64: 1>, scalar_prefetch = 0 : i64, scratch_operands = 0 : i64, tpu.core_type = #tpu.core_type<tc>, window_params = [{pipeline_mode = #tpu.pipeline_mode<synchronous>, transform_indices = @transform_0, window_bounds = array<i64: 8, 3, 2, 32>}, {pipeline_mode = #tpu.pipeline_mode<synchronous>, transform_indices = @transform_1, window_bounds = array<i64: 8, 3, 2, 32>}, {pipeline_mode = #tpu.pipeline_mode<synchronous>, transform_indices = @transform_2, window_bounds = array<i64: 3, 32, 32>}, {pipeline_mode = #tpu.pipeline_mode<synchronous>, transform_indices = @transform_3, window_bounds = array<i64: 3, 32, 32>}, {pipeline_mode = #tpu.pipeline_mode<synchronous>, transform_indices = @transform_4, window_bounds = array<i64: 1, 32>}, {pipeline_mode = #tpu.pipeline_mode<synchronous>, transform_indices = @transform_5, window_bounds = array<i64: 1, 32>}, {pipeline_mode = #tpu.pipeline_mode<synchronous>, transform_indices = @transform_6, window_bounds = array<i64: 8, 2, 32>}, {pipeline_mode = #tpu.pipeline_mode<synchronous>, transform_indices = @transform_7, window_bounds = array<i64: 8, 2, 32>}]} {
    %c0 = arith.constant 0 : index
    %c0_0 = arith.constant 0 : index
    %c0_1 = arith.constant 0 : index
    %0 = vector.load %arg3[%c0, %c0_0, %c0_1] : memref<3x32x32xbf16, #tpu.memory_space<vmem>>, vector<3x32x32xbf16>
    %c0_2 = arith.constant 0 : index
    %c0_3 = arith.constant 0 : index
    %c0_4 = arith.constant 0 : index
    %1 = vector.load %arg4[%c0_2, %c0_3, %c0_4] : memref<3x32x32xbf16, #tpu.memory_space<vmem>>, vector<3x32x32xbf16>
    %c0_5 = arith.constant 0 : index
    %c0_6 = arith.constant 0 : index
    %2 = vector.load %arg5[%c0_5, %c0_6] : memref<1x32xf32, #tpu.memory_space<vmem>>, vector<1x32xf32>
    %c0_7 = arith.constant 0 : index
    %c0_8 = arith.constant 0 : index
    %3 = vector.load %arg6[%c0_7, %c0_8] : memref<1x32xf32, #tpu.memory_space<vmem>>, vector<1x32xf32>
    %cst = arith.constant 0.000000e+00 : f32
    %4 = vector.broadcast %cst : f32 to vector<2x32xf32>
    %c0_i32 = arith.constant 0 : i32
    %c7_i32 = arith.constant 7 : i32
    %5 = arith.subi %c7_i32, %c0_i32 : i32
    %6 = arith.index_cast %c0_i32 : i32 to index
    %c0_9 = arith.constant 0 : index
    %c0_10 = arith.constant 0 : index
    %c0_11 = arith.constant 0 : index
    %7 = vector.load %arg1[%6, %c0_9, %c0_10, %c0_11] : memref<8x3x2x32xf32, #tpu.memory_space<vmem>>, vector<1x3x2x32xf32>
    %8 = vector.shape_cast %7 : vector<1x3x2x32xf32> to vector<3x2x32xf32>
    %9 = arith.truncf %4 : vector<2x32xf32> to vector<2x32xbf16>
    %10 = vector.extract_strided_slice %0 {offsets = [0, 0, 0], sizes = [1, 32, 32], strides = [1, 1, 1]} : vector<3x32x32xbf16> to vector<1x32x32xbf16>
    %11 = vector.shape_cast %10 : vector<1x32x32xbf16> to vector<32x32xbf16>
    %cst_12 = arith.constant dense<0.000000e+00> : vector<2x32xf32>
    %12 = tpu.matmul %9, %11, %cst_12 {dimension_numbers = #tpu.dot_dimension_numbers<[1], [0], [0], [1], [0, 0, 1, 1], [], []>} : vector<2x32xbf16>, vector<32x32xbf16>, vector<2x32xf32> -> vector<2x32xf32>
    %13 = vector.extract_strided_slice %0 {offsets = [1, 0, 0], sizes = [1, 32, 32], strides = [1, 1, 1]} : vector<3x32x32xbf16> to vector<1x32x32xbf16>
    %14 = vector.shape_cast %13 : vector<1x32x32xbf16> to vector<32x32xbf16>
    %cst_13 = arith.constant dense<0.000000e+00> : vector<2x32xf32>
    %15 = tpu.matmul %9, %14, %cst_13 {dimension_numbers = #tpu.dot_dimension_numbers<[1], [0], [0], [1], [0, 0, 1, 1], [], []>} : vector<2x32xbf16>, vector<32x32xbf16>, vector<2x32xf32> -> vector<2x32xf32>
    %16 = vector.extract_strided_slice %0 {offsets = [2, 0, 0], sizes = [1, 32, 32], strides = [1, 1, 1]} : vector<3x32x32xbf16> to vector<1x32x32xbf16>
    %17 = vector.shape_cast %16 : vector<1x32x32xbf16> to vector<32x32xbf16>
    %cst_14 = arith.constant dense<0.000000e+00> : vector<2x32xf32>
    %18 = tpu.matmul %9, %17, %cst_14 {dimension_numbers = #tpu.dot_dimension_numbers<[1], [0], [0], [1], [0, 0, 1, 1], [], []>} : vector<2x32xbf16>, vector<32x32xbf16>, vector<2x32xf32> -> vector<2x32xf32>
    %19 = vector.extract_strided_slice %8 {offsets = [0, 0, 0], sizes = [1, 2, 32], strides = [1, 1, 1]} : vector<3x2x32xf32> to vector<1x2x32xf32>
    %20 = vector.shape_cast %19 : vector<1x2x32xf32> to vector<2x32xf32>
    %21 = arith.addf %20, %12 : vector<2x32xf32>
    %22 = arith.negf %21 : vector<2x32xf32>
    %23 = math.exp %22 : vector<2x32xf32>
    %cst_15 = arith.constant 1.000000e+00 : f32
    %24 = vector.broadcast %cst_15 : f32 to vector<2x32xf32>
    %25 = arith.addf %24, %23 : vector<2x32xf32>
    %26 = arith.divf %24, %25 : vector<2x32xf32>
    %27 = vector.extract_strided_slice %8 {offsets = [1, 0, 0], sizes = [1, 2, 32], strides = [1, 1, 1]} : vector<3x2x32xf32> to vector<1x2x32xf32>
    %28 = vector.shape_cast %27 : vector<1x2x32xf32> to vector<2x32xf32>
    %29 = arith.addf %28, %15 : vector<2x32xf32>
    %30 = arith.negf %29 : vector<2x32xf32>
    %31 = math.exp %30 : vector<2x32xf32>
    %cst_16 = arith.constant 1.000000e+00 : f32
    %32 = vector.broadcast %cst_16 : f32 to vector<2x32xf32>
    %33 = arith.addf %32, %31 : vector<2x32xf32>
    %34 = arith.divf %32, %33 : vector<2x32xf32>
    %35 = vector.extract_strided_slice %8 {offsets = [2, 0, 0], sizes = [1, 2, 32], strides = [1, 1, 1]} : vector<3x2x32xf32> to vector<1x2x32xf32>
    %36 = vector.shape_cast %35 : vector<1x2x32xf32> to vector<2x32xf32>
    %37 = vector.broadcast %2 : vector<1x32xf32> to vector<2x32xf32>
    %38 = arith.addf %18, %37 : vector<2x32xf32>
    %39 = arith.mulf %26, %38 : vector<2x32xf32>
    %40 = arith.addf %36, %39 : vector<2x32xf32>
    %41 = math.tanh %40 : vector<2x32xf32>
    %cst_17 = arith.constant 1.000000e+00 : f32
    %42 = vector.broadcast %cst_17 : f32 to vector<2x32xf32>
    %43 = arith.subf %42, %34 : vector<2x32xf32>
    %44 = arith.mulf %43, %41 : vector<2x32xf32>
    %45 = arith.mulf %34, %4 : vector<2x32xf32>
    %46 = arith.addf %44, %45 : vector<2x32xf32>
    %47 = arith.index_cast %5 : i32 to index
    %c0_18 = arith.constant 0 : index
    %c0_19 = arith.constant 0 : index
    %c0_20 = arith.constant 0 : index
    %48 = vector.load %arg2[%47, %c0_18, %c0_19, %c0_20] : memref<8x3x2x32xf32, #tpu.memory_space<vmem>>, vector<1x3x2x32xf32>
    %49 = vector.shape_cast %48 : vector<1x3x2x32xf32> to vector<3x2x32xf32>
    %50 = arith.truncf %4 : vector<2x32xf32> to vector<2x32xbf16>
    %51 = vector.extract_strided_slice %1 {offsets = [0, 0, 0], sizes = [1, 32, 32], strides = [1, 1, 1]} : vector<3x32x32xbf16> to vector<1x32x32xbf16>
    %52 = vector.shape_cast %51 : vector<1x32x32xbf16> to vector<32x32xbf16>
    %cst_21 = arith.constant dense<0.000000e+00> : vector<2x32xf32>
    %53 = tpu.matmul %50, %52, %cst_21 {dimension_numbers = #tpu.dot_dimension_numbers<[1], [0], [0], [1], [0, 0, 1, 1], [], []>} : vector<2x32xbf16>, vector<32x32xbf16>, vector<2x32xf32> -> vector<2x32xf32>
    %54 = vector.extract_strided_slice %1 {offsets = [1, 0, 0], sizes = [1, 32, 32], strides = [1, 1, 1]} : vector<3x32x32xbf16> to vector<1x32x32xbf16>
    %55 = vector.shape_cast %54 : vector<1x32x32xbf16> to vector<32x32xbf16>
    %cst_22 = arith.constant dense<0.000000e+00> : vector<2x32xf32>
    %56 = tpu.matmul %50, %55, %cst_22 {dimension_numbers = #tpu.dot_dimension_numbers<[1], [0], [0], [1], [0, 0, 1, 1], [], []>} : vector<2x32xbf16>, vector<32x32xbf16>, vector<2x32xf32> -> vector<2x32xf32>
    %57 = vector.extract_strided_slice %1 {offsets = [2, 0, 0], sizes = [1, 32, 32], strides = [1, 1, 1]} : vector<3x32x32xbf16> to vector<1x32x32xbf16>
    %58 = vector.shape_cast %57 : vector<1x32x32xbf16> to vector<32x32xbf16>
    %cst_23 = arith.constant dense<0.000000e+00> : vector<2x32xf32>
    %59 = tpu.matmul %50, %58, %cst_23 {dimension_numbers = #tpu.dot_dimension_numbers<[1], [0], [0], [1], [0, 0, 1, 1], [], []>} : vector<2x32xbf16>, vector<32x32xbf16>, vector<2x32xf32> -> vector<2x32xf32>
    %60 = vector.extract_strided_slice %49 {offsets = [0, 0, 0], sizes = [1, 2, 32], strides = [1, 1, 1]} : vector<3x2x32xf32> to vector<1x2x32xf32>
    %61 = vector.shape_cast %60 : vector<1x2x32xf32> to vector<2x32xf32>
    %62 = arith.addf %61, %53 : vector<2x32xf32>
    %63 = arith.negf %62 : vector<2x32xf32>
    %64 = math.exp %63 : vector<2x32xf32>
    %cst_24 = arith.constant 1.000000e+00 : f32
    %65 = vector.broadcast %cst_24 : f32 to vector<2x32xf32>
    %66 = arith.addf %65, %64 : vector<2x32xf32>
    %67 = arith.divf %65, %66 : vector<2x32xf32>
    %68 = vector.extract_strided_slice %49 {offsets = [1, 0, 0], sizes = [1, 2, 32], strides = [1, 1, 1]} : vector<3x2x32xf32> to vector<1x2x32xf32>
    %69 = vector.shape_cast %68 : vector<1x2x32xf32> to vector<2x32xf32>
    %70 = arith.addf %69, %56 : vector<2x32xf32>
    %71 = arith.negf %70 : vector<2x32xf32>
    %72 = math.exp %71 : vector<2x32xf32>
    %cst_25 = arith.constant 1.000000e+00 : f32
    %73 = vector.broadcast %cst_25 : f32 to vector<2x32xf32>
    %74 = arith.addf %73, %72 : vector<2x32xf32>
    %75 = arith.divf %73, %74 : vector<2x32xf32>
    %76 = vector.extract_strided_slice %49 {offsets = [2, 0, 0], sizes = [1, 2, 32], strides = [1, 1, 1]} : vector<3x2x32xf32> to vector<1x2x32xf32>
    %77 = vector.shape_cast %76 : vector<1x2x32xf32> to vector<2x32xf32>
    %78 = vector.broadcast %3 : vector<1x32xf32> to vector<2x32xf32>
    %79 = arith.addf %59, %78 : vector<2x32xf32>
    %80 = arith.mulf %67, %79 : vector<2x32xf32>
    %81 = arith.addf %77, %80 : vector<2x32xf32>
    %82 = math.tanh %81 : vector<2x32xf32>
    %cst_26 = arith.constant 1.000000e+00 : f32
    %83 = vector.broadcast %cst_26 : f32 to vector<2x32xf32>
    %84 = arith.subf %83, %75 : vector<2x32xf32>
    %85 = arith.mulf %84, %82 : vector<2x32xf32>
    %86 = arith.mulf %75, %4 : vector<2x32xf32>
    %87 = arith.addf %85, %86 : vector<2x32xf32>
    %88 = arith.index_cast %c0_i32 : i32 to index
    %c0_27 = arith.constant 0 : index
    %c0_28 = arith.constant 0 : index
    %89 = vector.load %arg7[%88, %c0_27, %c0_28] : memref<8x2x32xf32, #tpu.memory_space<vmem>>, vector<1x2x32xf32>
    %90 = vector.shape_cast %89 : vector<1x2x32xf32> to vector<2x32xf32>
    %91 = vector.shape_cast %46 : vector<2x32xf32> to vector<1x2x32xf32>
    tpu.vector_store %arg7[%88, %c0_27, %c0_28], %91 {strides = array<i32>} : memref<8x2x32xf32, #tpu.memory_space<vmem>>, vector<1x2x32xf32>,
    %92 = arith.index_cast %5 : i32 to index
    %c0_29 = arith.constant 0 : index
    %c0_30 = arith.constant 0 : index
    %93 = vector.load %arg8[%92, %c0_29, %c0_30] : memref<8x2x32xf32, #tpu.memory_space<vmem>>, vector<1x2x32xf32>
    %94 = vector.shape_cast %93 : vector<1x2x32xf32> to vector<2x32xf32>
    %95 = vector.shape_cast %87 : vector<2x32xf32> to vector<1x2x32xf32>
    tpu.vector_store %arg8[%92, %c0_29, %c0_30], %95 {strides = array<i32>} : memref<8x2x32xf32, #tpu.memory_space<vmem>>, vector<1x2x32xf32>,
    %c1_i32 = arith.constant 1 : i32
    %c7_i32_31 = arith.constant 7 : i32
    %96 = arith.subi %c7_i32_31, %c1_i32 : i32
    %97 = arith.index_cast %c1_i32 : i32 to index
    %c0_32 = arith.constant 0 : index
    %c0_33 = arith.constant 0 : index
    %c0_34 = arith.constant 0 : index
    %98 = vector.load %arg1[%97, %c0_32, %c0_33, %c0_34] : memref<8x3x2x32xf32, #tpu.memory_space<vmem>>, vector<1x3x2x32xf32>
    %99 = vector.shape_cast %98 : vector<1x3x2x32xf32> to vector<3x2x32xf32>
    %100 = arith.truncf %46 : vector<2x32xf32> to vector<2x32xbf16>
    %101 = vector.extract_strided_slice %0 {offsets = [0, 0, 0], sizes = [1, 32, 32], strides = [1, 1, 1]} : vector<3x32x32xbf16> to vector<1x32x32xbf16>
    %102 = vector.shape_cast %101 : vector<1x32x32xbf16> to vector<32x32xbf16>
    %cst_35 = arith.constant dense<0.000000e+00> : vector<2x32xf32>
    %103 = tpu.matmul %100, %102, %cst_35 {dimension_numbers = #tpu.dot_dimension_numbers<[1], [0], [0], [1], [0, 0, 1, 1], [], []>} : vector<2x32xbf16>, vector<32x32xbf16>, vector<2x32xf32> -> vector<2x32xf32>
    %104 = vector.extract_strided_slice %0 {offsets = [1, 0, 0], sizes = [1, 32, 32], strides = [1, 1, 1]} : vector<3x32x32xbf16> to vector<1x32x32xbf16>
    %105 = vector.shape_cast %104 : vector<1x32x32xbf16> to vector<32x32xbf16>
    %cst_36 = arith.constant dense<0.000000e+00> : vector<2x32xf32>
    %106 = tpu.matmul %100, %105, %cst_36 {dimension_numbers = #tpu.dot_dimension_numbers<[1], [0], [0], [1], [0, 0, 1, 1], [], []>} : vector<2x32xbf16>, vector<32x32xbf16>, vector<2x32xf32> -> vector<2x32xf32>
    %107 = vector.extract_strided_slice %0 {offsets = [2, 0, 0], sizes = [1, 32, 32], strides = [1, 1, 1]} : vector<3x32x32xbf16> to vector<1x32x32xbf16>
    %108 = vector.shape_cast %107 : vector<1x32x32xbf16> to vector<32x32xbf16>
    %cst_37 = arith.constant dense<0.000000e+00> : vector<2x32xf32>
    %109 = tpu.matmul %100, %108, %cst_37 {dimension_numbers = #tpu.dot_dimension_numbers<[1], [0], [0], [1], [0, 0, 1, 1], [], []>} : vector<2x32xbf16>, vector<32x32xbf16>, vector<2x32xf32> -> vector<2x32xf32>
    %110 = vector.extract_strided_slice %99 {offsets = [0, 0, 0], sizes = [1, 2, 32], strides = [1, 1, 1]} : vector<3x2x32xf32> to vector<1x2x32xf32>
    %111 = vector.shape_cast %110 : vector<1x2x32xf32> to vector<2x32xf32>
    %112 = arith.addf %111, %103 : vector<2x32xf32>
    %113 = arith.negf %112 : vector<2x32xf32>
    %114 = math.exp %113 : vector<2x32xf32>
    %cst_38 = arith.constant 1.000000e+00 : f32
    %115 = vector.broadcast %cst_38 : f32 to vector<2x32xf32>
    %116 = arith.addf %115, %114 : vector<2x32xf32>
    %117 = arith.divf %115, %116 : vector<2x32xf32>
    %118 = vector.extract_strided_slice %99 {offsets = [1, 0, 0], sizes = [1, 2, 32], strides = [1, 1, 1]} : vector<3x2x32xf32> to vector<1x2x32xf32>
    %119 = vector.shape_cast %118 : vector<1x2x32xf32> to vector<2x32xf32>
    %120 = arith.addf %119, %106 : vector<2x32xf32>
    %121 = arith.negf %120 : vector<2x32xf32>
    %122 = math.exp %121 : vector<2x32xf32>
    %cst_39 = arith.constant 1.000000e+00 : f32
    %123 = vector.broadcast %cst_39 : f32 to vector<2x32xf32>
    %124 = arith.addf %123, %122 : vector<2x32xf32>
    %125 = arith.divf %123, %124 : vector<2x32xf32>
    %126 = vector.extract_strided_slice %99 {offsets = [2, 0, 0], sizes = [1, 2, 32], strides = [1, 1, 1]} : vector<3x2x32xf32> to vector<1x2x32xf32>
    %127 = vector.shape_cast %126 : vector<1x2x32xf32> to vector<2x32xf32>
    %128 = vector.broadcast %2 : vector<1x32xf32> to vector<2x32xf32>
    %129 = arith.addf %109, %128 : vector<2x32xf32>
    %130 = arith.mulf %117, %129 : vector<2x32xf32>
    %131 = arith.addf %127, %130 : vector<2x32xf32>
    %132 = math.tanh %131 : vector<2x32xf32>
    %cst_40 = arith.constant 1.000000e+00 : f32
    %133 = vector.broadcast %cst_40 : f32 to vector<2x32xf32>
    %134 = arith.subf %133, %125 : vector<2x32xf32>
    %135 = arith.mulf %134, %132 : vector<2x32xf32>
    %136 = arith.mulf %125, %46 : vector<2x32xf32>
    %137 = arith.addf %135, %136 : vector<2x32xf32>
    %138 = arith.index_cast %96 : i32 to index
    %c0_41 = arith.constant 0 : index
    %c0_42 = arith.constant 0 : index
    %c0_43 = arith.constant 0 : index
    %139 = vector.load %arg2[%138, %c0_41, %c0_42, %c0_43] : memref<8x3x2x32xf32, #tpu.memory_space<vmem>>, vector<1x3x2x32xf32>
    %140 = vector.shape_cast %139 : vector<1x3x2x32xf32> to vector<3x2x32xf32>
    %141 = arith.truncf %87 : vector<2x32xf32> to vector<2x32xbf16>
    %142 = vector.extract_strided_slice %1 {offsets = [0, 0, 0], sizes = [1, 32, 32], strides = [1, 1, 1]} : vector<3x32x32xbf16> to vector<1x32x32xbf16>
    %143 = vector.shape_cast %142 : vector<1x32x32xbf16> to vector<32x32xbf16>
    %cst_44 = arith.constant dense<0.000000e+00> : vector<2x32xf32>
    %144 = tpu.matmul %141, %143, %cst_44 {dimension_numbers = #tpu.dot_dimension_numbers<[1], [0], [0], [1], [0, 0, 1, 1], [], []>} : vector<2x32xbf16>, vector<32x32xbf16>, vector<2x32xf32> -> vector<2x32xf32>
    %145 = vector.extract_strided_slice %1 {offsets = [1, 0, 0], sizes = [1, 32, 32], strides = [1, 1, 1]} : vector<3x32x32xbf16> to vector<1x32x32xbf16>
    %146 = vector.shape_cast %145 : vector<1x32x32xbf16> to vector<32x32xbf16>
    %cst_45 = arith.constant dense<0.000000e+00> : vector<2x32xf32>
    %147 = tpu.matmul %141, %146, %cst_45 {dimension_numbers = #tpu.dot_dimension_numbers<[1], [0], [0], [1], [0, 0, 1, 1], [], []>} : vector<2x32xbf16>, vector<32x32xbf16>, vector<2x32xf32> -> vector<2x32xf32>
    %148 = vector.extract_strided_slice %1 {offsets = [2, 0, 0], sizes = [1, 32, 32], strides = [1, 1, 1]} : vector<3x32x32xbf16> to vector<1x32x32xbf16>
    %149 = vector.shape_cast %148 : vector<1x32x32xbf16> to vector<32x32xbf16>
    %cst_46 = arith.constant dense<0.000000e+00> : vector<2x32xf32>
    %150 = tpu.matmul %141, %149, %cst_46 {dimension_numbers = #tpu.dot_dimension_numbers<[1], [0], [0], [1], [0, 0, 1, 1], [], []>} : vector<2x32xbf16>, vector<32x32xbf16>, vector<2x32xf32> -> vector<2x32xf32>
    %151 = vector.extract_strided_slice %140 {offsets = [0, 0, 0], sizes = [1, 2, 32], strides = [1, 1, 1]} : vector<3x2x32xf32> to vector<1x2x32xf32>
    %152 = vector.shape_cast %151 : vector<1x2x32xf32> to vector<2x32xf32>
    %153 = arith.addf %152, %144 : vector<2x32xf32>
    %154 = arith.negf %153 : vector<2x32xf32>
    %155 = math.exp %154 : vector<2x32xf32>
    %cst_47 = arith.constant 1.000000e+00 : f32
    %156 = vector.broadcast %cst_47 : f32 to vector<2x32xf32>
    %157 = arith.addf %156, %155 : vector<2x32xf32>
    %158 = arith.divf %156, %157 : vector<2x32xf32>
    %159 = vector.extract_strided_slice %140 {offsets = [1, 0, 0], sizes = [1, 2, 32], strides = [1, 1, 1]} : vector<3x2x32xf32> to vector<1x2x32xf32>
    %160 = vector.shape_cast %159 : vector<1x2x32xf32> to vector<2x32xf32>
    %161 = arith.addf %160, %147 : vector<2x32xf32>
    %162 = arith.negf %161 : vector<2x32xf32>
    %163 = math.exp %162 : vector<2x32xf32>
    %cst_48 = arith.constant 1.000000e+00 : f32
    %164 = vector.broadcast %cst_48 : f32 to vector<2x32xf32>
    %165 = arith.addf %164, %163 : vector<2x32xf32>
    %166 = arith.divf %164, %165 : vector<2x32xf32>
    %167 = vector.extract_strided_slice %140 {offsets = [2, 0, 0], sizes = [1, 2, 32], strides = [1, 1, 1]} : vector<3x2x32xf32> to vector<1x2x32xf32>
    %168 = vector.shape_cast %167 : vector<1x2x32xf32> to vector<2x32xf32>
    %169 = vector.broadcast %3 : vector<1x32xf32> to vector<2x32xf32>
    %170 = arith.addf %150, %169 : vector<2x32xf32>
    %171 = arith.mulf %158, %170 : vector<2x32xf32>
    %172 = arith.addf %168, %171 : vector<2x32xf32>
    %173 = math.tanh %172 : vector<2x32xf32>
    %cst_49 = arith.constant 1.000000e+00 : f32
    %174 = vector.broadcast %cst_49 : f32 to vector<2x32xf32>
    %175 = arith.subf %174, %166 : vector<2x32xf32>
    %176 = arith.mulf %175, %173 : vector<2x32xf32>
    %177 = arith.mulf %166, %87 : vector<2x32xf32>
    %178 = arith.addf %176, %177 : vector<2x32xf32>
    %179 = arith.index_cast %c1_i32 : i32 to index
    %c0_50 = arith.constant 0 : index
    %c0_51 = arith.constant 0 : index
    %180 = vector.load %arg7[%179, %c0_50, %c0_51] : memref<8x2x32xf32, #tpu.memory_space<vmem>>, vector<1x2x32xf32>
    %181 = vector.shape_cast %180 : vector<1x2x32xf32> to vector<2x32xf32>
    %182 = vector.shape_cast %137 : vector<2x32xf32> to vector<1x2x32xf32>
    tpu.vector_store %arg7[%179, %c0_50, %c0_51], %182 {strides = array<i32>} : memref<8x2x32xf32, #tpu.memory_space<vmem>>, vector<1x2x32xf32>,
    %183 = arith.index_cast %96 : i32 to index
    %c0_52 = arith.constant 0 : index
    %c0_53 = arith.constant 0 : index
    %184 = vector.load %arg8[%183, %c0_52, %c0_53] : memref<8x2x32xf32, #tpu.memory_space<vmem>>, vector<1x2x32xf32>
    %185 = vector.shape_cast %184 : vector<1x2x32xf32> to vector<2x32xf32>
    %186 = vector.shape_cast %178 : vector<2x32xf32> to vector<1x2x32xf32>
    tpu.vector_store %arg8[%183, %c0_52, %c0_53], %186 {strides = array<i32>} : memref<8x2x32xf32, #tpu.memory_space<vmem>>, vector<1x2x32xf32>,
    %c2_i32 = arith.constant 2 : i32
    %c7_i32_54 = arith.constant 7 : i32
    %187 = arith.subi %c7_i32_54, %c2_i32 : i32
    %188 = arith.index_cast %c2_i32 : i32 to index
    %c0_55 = arith.constant 0 : index
    %c0_56 = arith.constant 0 : index
    %c0_57 = arith.constant 0 : index
    %189 = vector.load %arg1[%188, %c0_55, %c0_56, %c0_57] : memref<8x3x2x32xf32, #tpu.memory_space<vmem>>, vector<1x3x2x32xf32>
    %190 = vector.shape_cast %189 : vector<1x3x2x32xf32> to vector<3x2x32xf32>
    %191 = arith.truncf %137 : vector<2x32xf32> to vector<2x32xbf16>
    %192 = vector.extract_strided_slice %0 {offsets = [0, 0, 0], sizes = [1, 32, 32], strides = [1, 1, 1]} : vector<3x32x32xbf16> to vector<1x32x32xbf16>
    %193 = vector.shape_cast %192 : vector<1x32x32xbf16> to vector<32x32xbf16>
    %cst_58 = arith.constant dense<0.000000e+00> : vector<2x32xf32>
    %194 = tpu.matmul %191, %193, %cst_58 {dimension_numbers = #tpu.dot_dimension_numbers<[1], [0], [0], [1], [0, 0, 1, 1], [], []>} : vector<2x32xbf16>, vector<32x32xbf16>, vector<2x32xf32> -> vector<2x32xf32>
    %195 = vector.extract_strided_slice %0 {offsets = [1, 0, 0], sizes = [1, 32, 32], strides = [1, 1, 1]} : vector<3x32x32xbf16> to vector<1x32x32xbf16>
    %196 = vector.shape_cast %195 : vector<1x32x32xbf16> to vector<32x32xbf16>
    %cst_59 = arith.constant dense<0.000000e+00> : vector<2x32xf32>
    %197 = tpu.matmul %191, %196, %cst_59 {dimension_numbers = #tpu.dot_dimension_numbers<[1], [0], [0], [1], [0, 0, 1, 1], [], []>} : vector<2x32xbf16>, vector<32x32xbf16>, vector<2x32xf32> -> vector<2x32xf32>
    %198 = vector.extract_strided_slice %0 {offsets = [2, 0, 0], sizes = [1, 32, 32], strides = [1, 1, 1]} : vector<3x32x32xbf16> to vector<1x32x32xbf16>
    %199 = vector.shape_cast %198 : vector<1x32x32xbf16> to vector<32x32xbf16>
    %cst_60 = arith.constant dense<0.000000e+00> : vector<2x32xf32>
    %200 = tpu.matmul %191, %199, %cst_60 {dimension_numbers = #tpu.dot_dimension_numbers<[1], [0], [0], [1], [0, 0, 1, 1], [], []>} : vector<2x32xbf16>, vector<32x32xbf16>, vector<2x32xf32> -> vector<2x32xf32>
    %201 = vector.extract_strided_slice %190 {offsets = [0, 0, 0], sizes = [1, 2, 32], strides = [1, 1, 1]} : vector<3x2x32xf32> to vector<1x2x32xf32>
    %202 = vector.shape_cast %201 : vector<1x2x32xf32> to vector<2x32xf32>
    %203 = arith.addf %202, %194 : vector<2x32xf32>
    %204 = arith.negf %203 : vector<2x32xf32>
    %205 = math.exp %204 : vector<2x32xf32>
    %cst_61 = arith.constant 1.000000e+00 : f32
    %206 = vector.broadcast %cst_61 : f32 to vector<2x32xf32>
    %207 = arith.addf %206, %205 : vector<2x32xf32>
    %208 = arith.divf %206, %207 : vector<2x32xf32>
    %209 = vector.extract_strided_slice %190 {offsets = [1, 0, 0], sizes = [1, 2, 32], strides = [1, 1, 1]} : vector<3x2x32xf32> to vector<1x2x32xf32>
    %210 = vector.shape_cast %209 : vector<1x2x32xf32> to vector<2x32xf32>
    %211 = arith.addf %210, %197 : vector<2x32xf32>
    %212 = arith.negf %211 : vector<2x32xf32>
    %213 = math.exp %212 : vector<2x32xf32>
    %cst_62 = arith.constant 1.000000e+00 : f32
    %214 = vector.broadcast %cst_62 : f32 to vector<2x32xf32>
    %215 = arith.addf %214, %213 : vector<2x32xf32>
    %216 = arith.divf %214, %215 : vector<2x32xf32>
    %217 = vector.extract_strided_slice %190 {offsets = [2, 0, 0], sizes = [1, 2, 32], strides = [1, 1, 1]} : vector<3x2x32xf32> to vector<1x2x32xf32>
    %218 = vector.shape_cast %217 : vector<1x2x32xf32> to vector<2x32xf32>
    %219 = vector.broadcast %2 : vector<1x32xf32> to vector<2x32xf32>
    %220 = arith.addf %200, %219 : vector<2x32xf32>
    %221 = arith.mulf %208, %220 : vector<2x32xf32>
    %222 = arith.addf %218, %221 : vector<2x32xf32>
    %223 = math.tanh %222 : vector<2x32xf32>
    %cst_63 = arith.constant 1.000000e+00 : f32
    %224 = vector.broadcast %cst_63 : f32 to vector<2x32xf32>
    %225 = arith.subf %224, %216 : vector<2x32xf32>
    %226 = arith.mulf %225, %223 : vector<2x32xf32>
    %227 = arith.mulf %216, %137 : vector<2x32xf32>
    %228 = arith.addf %226, %227 : vector<2x32xf32>
    %229 = arith.index_cast %187 : i32 to index
    %c0_64 = arith.constant 0 : index
    %c0_65 = arith.constant 0 : index
    %c0_66 = arith.constant 0 : index
    %230 = vector.load %arg2[%229, %c0_64, %c0_65, %c0_66] : memref<8x3x2x32xf32, #tpu.memory_space<vmem>>, vector<1x3x2x32xf32>
    %231 = vector.shape_cast %230 : vector<1x3x2x32xf32> to vector<3x2x32xf32>
    %232 = arith.truncf %178 : vector<2x32xf32> to vector<2x32xbf16>
    %233 = vector.extract_strided_slice %1 {offsets = [0, 0, 0], sizes = [1, 32, 32], strides = [1, 1, 1]} : vector<3x32x32xbf16> to vector<1x32x32xbf16>
    %234 = vector.shape_cast %233 : vector<1x32x32xbf16> to vector<32x32xbf16>
    %cst_67 = arith.constant dense<0.000000e+00> : vector<2x32xf32>
    %235 = tpu.matmul %232, %234, %cst_67 {dimension_numbers = #tpu.dot_dimension_numbers<[1], [0], [0], [1], [0, 0, 1, 1], [], []>} : vector<2x32xbf16>, vector<32x32xbf16>, vector<2x32xf32> -> vector<2x32xf32>
    %236 = vector.extract_strided_slice %1 {offsets = [1, 0, 0], sizes = [1, 32, 32], strides = [1, 1, 1]} : vector<3x32x32xbf16> to vector<1x32x32xbf16>
    %237 = vector.shape_cast %236 : vector<1x32x32xbf16> to vector<32x32xbf16>
    %cst_68 = arith.constant dense<0.000000e+00> : vector<2x32xf32>
    %238 = tpu.matmul %232, %237, %cst_68 {dimension_numbers = #tpu.dot_dimension_numbers<[1], [0], [0], [1], [0, 0, 1, 1], [], []>} : vector<2x32xbf16>, vector<32x32xbf16>, vector<2x32xf32> -> vector<2x32xf32>
    %239 = vector.extract_strided_slice %1 {offsets = [2, 0, 0], sizes = [1, 32, 32], strides = [1, 1, 1]} : vector<3x32x32xbf16> to vector<1x32x32xbf16>
    %240 = vector.shape_cast %239 : vector<1x32x32xbf16> to vector<32x32xbf16>
    %cst_69 = arith.constant dense<0.000000e+00> : vector<2x32xf32>
    %241 = tpu.matmul %232, %240, %cst_69 {dimension_numbers = #tpu.dot_dimension_numbers<[1], [0], [0], [1], [0, 0, 1, 1], [], []>} : vector<2x32xbf16>, vector<32x32xbf16>, vector<2x32xf32> -> vector<2x32xf32>
    %242 = vector.extract_strided_slice %231 {offsets = [0, 0, 0], sizes = [1, 2, 32], strides = [1, 1, 1]} : vector<3x2x32xf32> to vector<1x2x32xf32>
    %243 = vector.shape_cast %242 : vector<1x2x32xf32> to vector<2x32xf32>
    %244 = arith.addf %243, %235 : vector<2x32xf32>
    %245 = arith.negf %244 : vector<2x32xf32>
    %246 = math.exp %245 : vector<2x32xf32>
    %cst_70 = arith.constant 1.000000e+00 : f32
    %247 = vector.broadcast %cst_70 : f32 to vector<2x32xf32>
    %248 = arith.addf %247, %246 : vector<2x32xf32>
    %249 = arith.divf %247, %248 : vector<2x32xf32>
    %250 = vector.extract_strided_slice %231 {offsets = [1, 0, 0], sizes = [1, 2, 32], strides = [1, 1, 1]} : vector<3x2x32xf32> to vector<1x2x32xf32>
    %251 = vector.shape_cast %250 : vector<1x2x32xf32> to vector<2x32xf32>
    %252 = arith.addf %251, %238 : vector<2x32xf32>
    %253 = arith.negf %252 : vector<2x32xf32>
    %254 = math.exp %253 : vector<2x32xf32>
    %cst_71 = arith.constant 1.000000e+00 : f32
    %255 = vector.broadcast %cst_71 : f32 to vector<2x32xf32>
    %256 = arith.addf %255, %254 : vector<2x32xf32>
    %257 = arith.divf %255, %256 : vector<2x32xf32>
    %258 = vector.extract_strided_slice %231 {offsets = [2, 0, 0], sizes = [1, 2, 32], strides = [1, 1, 1]} : vector<3x2x32xf32> to vector<1x2x32xf32>
    %259 = vector.shape_cast %258 : vector<1x2x32xf32> to vector<2x32xf32>
    %260 = vector.broadcast %3 : vector<1x32xf32> to vector<2x32xf32>
    %261 = arith.addf %241, %260 : vector<2x32xf32>
    %262 = arith.mulf %249, %261 : vector<2x32xf32>
    %263 = arith.addf %259, %262 : vector<2x32xf32>
    %264 = math.tanh %263 : vector<2x32xf32>
    %cst_72 = arith.constant 1.000000e+00 : f32
    %265 = vector.broadcast %cst_72 : f32 to vector<2x32xf32>
    %266 = arith.subf %265, %257 : vector<2x32xf32>
    %267 = arith.mulf %266, %264 : vector<2x32xf32>
    %268 = arith.mulf %257, %178 : vector<2x32xf32>
    %269 = arith.addf %267, %268 : vector<2x32xf32>
    %270 = arith.index_cast %c2_i32 : i32 to index
    %c0_73 = arith.constant 0 : index
    %c0_74 = arith.constant 0 : index
    %271 = vector.load %arg7[%270, %c0_73, %c0_74] : memref<8x2x32xf32, #tpu.memory_space<vmem>>, vector<1x2x32xf32>
    %272 = vector.shape_cast %271 : vector<1x2x32xf32> to vector<2x32xf32>
    %273 = vector.shape_cast %228 : vector<2x32xf32> to vector<1x2x32xf32>
    tpu.vector_store %arg7[%270, %c0_73, %c0_74], %273 {strides = array<i32>} : memref<8x2x32xf32, #tpu.memory_space<vmem>>, vector<1x2x32xf32>,
    %274 = arith.index_cast %187 : i32 to index
    %c0_75 = arith.constant 0 : index
    %c0_76 = arith.constant 0 : index
    %275 = vector.load %arg8[%274, %c0_75, %c0_76] : memref<8x2x32xf32, #tpu.memory_space<vmem>>, vector<1x2x32xf32>
    %276 = vector.shape_cast %275 : vector<1x2x32xf32> to vector<2x32xf32>
    %277 = vector.shape_cast %269 : vector<2x32xf32> to vector<1x2x32xf32>
    tpu.vector_store %arg8[%274, %c0_75, %c0_76], %277 {strides = array<i32>} : memref<8x2x32xf32, #tpu.memory_space<vmem>>, vector<1x2x32xf32>,
    %c3_i32 = arith.constant 3 : i32
    %c7_i32_77 = arith.constant 7 : i32
    %278 = arith.subi %c7_i32_77, %c3_i32 : i32
    %279 = arith.index_cast %c3_i32 : i32 to index
    %c0_78 = arith.constant 0 : index
    %c0_79 = arith.constant 0 : index
    %c0_80 = arith.constant 0 : index
    %280 = vector.load %arg1[%279, %c0_78, %c0_79, %c0_80] : memref<8x3x2x32xf32, #tpu.memory_space<vmem>>, vector<1x3x2x32xf32>
    %281 = vector.shape_cast %280 : vector<1x3x2x32xf32> to vector<3x2x32xf32>
    %282 = arith.truncf %228 : vector<2x32xf32> to vector<2x32xbf16>
    %283 = vector.extract_strided_slice %0 {offsets = [0, 0, 0], sizes = [1, 32, 32], strides = [1, 1, 1]} : vector<3x32x32xbf16> to vector<1x32x32xbf16>
    %284 = vector.shape_cast %283 : vector<1x32x32xbf16> to vector<32x32xbf16>
    %cst_81 = arith.constant dense<0.000000e+00> : vector<2x32xf32>
    %285 = tpu.matmul %282, %284, %cst_81 {dimension_numbers = #tpu.dot_dimension_numbers<[1], [0], [0], [1], [0, 0, 1, 1], [], []>} : vector<2x32xbf16>, vector<32x32xbf16>, vector<2x32xf32> -> vector<2x32xf32>
    %286 = vector.extract_strided_slice %0 {offsets = [1, 0, 0], sizes = [1, 32, 32], strides = [1, 1, 1]} : vector<3x32x32xbf16> to vector<1x32x32xbf16>
    %287 = vector.shape_cast %286 : vector<1x32x32xbf16> to vector<32x32xbf16>
    %cst_82 = arith.constant dense<0.000000e+00> : vector<2x32xf32>
    %288 = tpu.matmul %282, %287, %cst_82 {dimension_numbers = #tpu.dot_dimension_numbers<[1], [0], [0], [1], [0, 0, 1, 1], [], []>} : vector<2x32xbf16>, vector<32x32xbf16>, vector<2x32xf32> -> vector<2x32xf32>
    %289 = vector.extract_strided_slice %0 {offsets = [2, 0, 0], sizes = [1, 32, 32], strides = [1, 1, 1]} : vector<3x32x32xbf16> to vector<1x32x32xbf16>
    %290 = vector.shape_cast %289 : vector<1x32x32xbf16> to vector<32x32xbf16>
    %cst_83 = arith.constant dense<0.000000e+00> : vector<2x32xf32>
    %291 = tpu.matmul %282, %290, %cst_83 {dimension_numbers = #tpu.dot_dimension_numbers<[1], [0], [0], [1], [0, 0, 1, 1], [], []>} : vector<2x32xbf16>, vector<32x32xbf16>, vector<2x32xf32> -> vector<2x32xf32>
    %292 = vector.extract_strided_slice %281 {offsets = [0, 0, 0], sizes = [1, 2, 32], strides = [1, 1, 1]} : vector<3x2x32xf32> to vector<1x2x32xf32>
    %293 = vector.shape_cast %292 : vector<1x2x32xf32> to vector<2x32xf32>
    %294 = arith.addf %293, %285 : vector<2x32xf32>
    %295 = arith.negf %294 : vector<2x32xf32>
    %296 = math.exp %295 : vector<2x32xf32>
    %cst_84 = arith.constant 1.000000e+00 : f32
    %297 = vector.broadcast %cst_84 : f32 to vector<2x32xf32>
    %298 = arith.addf %297, %296 : vector<2x32xf32>
    %299 = arith.divf %297, %298 : vector<2x32xf32>
    %300 = vector.extract_strided_slice %281 {offsets = [1, 0, 0], sizes = [1, 2, 32], strides = [1, 1, 1]} : vector<3x2x32xf32> to vector<1x2x32xf32>
    %301 = vector.shape_cast %300 : vector<1x2x32xf32> to vector<2x32xf32>
    %302 = arith.addf %301, %288 : vector<2x32xf32>
    %303 = arith.negf %302 : vector<2x32xf32>
    %304 = math.exp %303 : vector<2x32xf32>
    %cst_85 = arith.constant 1.000000e+00 : f32
    %305 = vector.broadcast %cst_85 : f32 to vector<2x32xf32>
    %306 = arith.addf %305, %304 : vector<2x32xf32>
    %307 = arith.divf %305, %306 : vector<2x32xf32>
    %308 = vector.extract_strided_slice %281 {offsets = [2, 0, 0], sizes = [1, 2, 32], strides = [1, 1, 1]} : vector<3x2x32xf32> to vector<1x2x32xf32>
    %309 = vector.shape_cast %308 : vector<1x2x32xf32> to vector<2x32xf32>
    %310 = vector.broadcast %2 : vector<1x32xf32> to vector<2x32xf32>
    %311 = arith.addf %291, %310 : vector<2x32xf32>
    %312 = arith.mulf %299, %311 : vector<2x32xf32>
    %313 = arith.addf %309, %312 : vector<2x32xf32>
    %314 = math.tanh %313 : vector<2x32xf32>
    %cst_86 = arith.constant 1.000000e+00 : f32
    %315 = vector.broadcast %cst_86 : f32 to vector<2x32xf32>
    %316 = arith.subf %315, %307 : vector<2x32xf32>
    %317 = arith.mulf %316, %314 : vector<2x32xf32>
    %318 = arith.mulf %307, %228 : vector<2x32xf32>
    %319 = arith.addf %317, %318 : vector<2x32xf32>
    %320 = arith.index_cast %278 : i32 to index
    %c0_87 = arith.constant 0 : index
    %c0_88 = arith.constant 0 : index
    %c0_89 = arith.constant 0 : index
    %321 = vector.load %arg2[%320, %c0_87, %c0_88, %c0_89] : memref<8x3x2x32xf32, #tpu.memory_space<vmem>>, vector<1x3x2x32xf32>
    %322 = vector.shape_cast %321 : vector<1x3x2x32xf32> to vector<3x2x32xf32>
    %323 = arith.truncf %269 : vector<2x32xf32> to vector<2x32xbf16>
    %324 = vector.extract_strided_slice %1 {offsets = [0, 0, 0], sizes = [1, 32, 32], strides = [1, 1, 1]} : vector<3x32x32xbf16> to vector<1x32x32xbf16>
    %325 = vector.shape_cast %324 : vector<1x32x32xbf16> to vector<32x32xbf16>
    %cst_90 = arith.constant dense<0.000000e+00> : vector<2x32xf32>
    %326 = tpu.matmul %323, %325, %cst_90 {dimension_numbers = #tpu.dot_dimension_numbers<[1], [0], [0], [1], [0, 0, 1, 1], [], []>} : vector<2x32xbf16>, vector<32x32xbf16>, vector<2x32xf32> -> vector<2x32xf32>
    %327 = vector.extract_strided_slice %1 {offsets = [1, 0, 0], sizes = [1, 32, 32], strides = [1, 1, 1]} : vector<3x32x32xbf16> to vector<1x32x32xbf16>
    %328 = vector.shape_cast %327 : vector<1x32x32xbf16> to vector<32x32xbf16>
    %cst_91 = arith.constant dense<0.000000e+00> : vector<2x32xf32>
    %329 = tpu.matmul %323, %328, %cst_91 {dimension_numbers = #tpu.dot_dimension_numbers<[1], [0], [0], [1], [0, 0, 1, 1], [], []>} : vector<2x32xbf16>, vector<32x32xbf16>, vector<2x32xf32> -> vector<2x32xf32>
    %330 = vector.extract_strided_slice %1 {offsets = [2, 0, 0], sizes = [1, 32, 32], strides = [1, 1, 1]} : vector<3x32x32xbf16> to vector<1x32x32xbf16>
    %331 = vector.shape_cast %330 : vector<1x32x32xbf16> to vector<32x32xbf16>
    %cst_92 = arith.constant dense<0.000000e+00> : vector<2x32xf32>
    %332 = tpu.matmul %323, %331, %cst_92 {dimension_numbers = #tpu.dot_dimension_numbers<[1], [0], [0], [1], [0, 0, 1, 1], [], []>} : vector<2x32xbf16>, vector<32x32xbf16>, vector<2x32xf32> -> vector<2x32xf32>
    %333 = vector.extract_strided_slice %322 {offsets = [0, 0, 0], sizes = [1, 2, 32], strides = [1, 1, 1]} : vector<3x2x32xf32> to vector<1x2x32xf32>
    %334 = vector.shape_cast %333 : vector<1x2x32xf32> to vector<2x32xf32>
    %335 = arith.addf %334, %326 : vector<2x32xf32>
    %336 = arith.negf %335 : vector<2x32xf32>
    %337 = math.exp %336 : vector<2x32xf32>
    %cst_93 = arith.constant 1.000000e+00 : f32
    %338 = vector.broadcast %cst_93 : f32 to vector<2x32xf32>
    %339 = arith.addf %338, %337 : vector<2x32xf32>
    %340 = arith.divf %338, %339 : vector<2x32xf32>
    %341 = vector.extract_strided_slice %322 {offsets = [1, 0, 0], sizes = [1, 2, 32], strides = [1, 1, 1]} : vector<3x2x32xf32> to vector<1x2x32xf32>
    %342 = vector.shape_cast %341 : vector<1x2x32xf32> to vector<2x32xf32>
    %343 = arith.addf %342, %329 : vector<2x32xf32>
    %344 = arith.negf %343 : vector<2x32xf32>
    %345 = math.exp %344 : vector<2x32xf32>
    %cst_94 = arith.constant 1.000000e+00 : f32
    %346 = vector.broadcast %cst_94 : f32 to vector<2x32xf32>
    %347 = arith.addf %346, %345 : vector<2x32xf32>
    %348 = arith.divf %346, %347 : vector<2x32xf32>
    %349 = vector.extract_strided_slice %322 {offsets = [2, 0, 0], sizes = [1, 2, 32], strides = [1, 1, 1]} : vector<3x2x32xf32> to vector<1x2x32xf32>
    %350 = vector.shape_cast %349 : vector<1x2x32xf32> to vector<2x32xf32>
    %351 = vector.broadcast %3 : vector<1x32xf32> to vector<2x32xf32>
    %352 = arith.addf %332, %351 : vector<2x32xf32>
    %353 = arith.mulf %340, %352 : vector<2x32xf32>
    %354 = arith.addf %350, %353 : vector<2x32xf32>
    %355 = math.tanh %354 : vector<2x32xf32>
    %cst_95 = arith.constant 1.000000e+00 : f32
    %356 = vector.broadcast %cst_95 : f32 to vector<2x32xf32>
    %357 = arith.subf %356, %348 : vector<2x32xf32>
    %358 = arith.mulf %357, %355 : vector<2x32xf32>
    %359 = arith.mulf %348, %269 : vector<2x32xf32>
    %360 = arith.addf %358, %359 : vector<2x32xf32>
    %361 = arith.index_cast %c3_i32 : i32 to index
    %c0_96 = arith.constant 0 : index
    %c0_97 = arith.constant 0 : index
    %362 = vector.load %arg7[%361, %c0_96, %c0_97] : memref<8x2x32xf32, #tpu.memory_space<vmem>>, vector<1x2x32xf32>
    %363 = vector.shape_cast %362 : vector<1x2x32xf32> to vector<2x32xf32>
    %364 = vector.shape_cast %319 : vector<2x32xf32> to vector<1x2x32xf32>
    tpu.vector_store %arg7[%361, %c0_96, %c0_97], %364 {strides = array<i32>} : memref<8x2x32xf32, #tpu.memory_space<vmem>>, vector<1x2x32xf32>,
    %365 = arith.index_cast %278 : i32 to index
    %c0_98 = arith.constant 0 : index
    %c0_99 = arith.constant 0 : index
    %366 = vector.load %arg8[%365, %c0_98, %c0_99] : memref<8x2x32xf32, #tpu.memory_space<vmem>>, vector<1x2x32xf32>
    %367 = vector.shape_cast %366 : vector<1x2x32xf32> to vector<2x32xf32>
    %368 = vector.shape_cast %360 : vector<2x32xf32> to vector<1x2x32xf32>
    tpu.vector_store %arg8[%365, %c0_98, %c0_99], %368 {strides = array<i32>} : memref<8x2x32xf32, #tpu.memory_space<vmem>>, vector<1x2x32xf32>,
    %c4_i32 = arith.constant 4 : i32
    %c7_i32_100 = arith.constant 7 : i32
    %369 = arith.subi %c7_i32_100, %c4_i32 : i32
    %370 = arith.index_cast %c4_i32 : i32 to index
    %c0_101 = arith.constant 0 : index
    %c0_102 = arith.constant 0 : index
    %c0_103 = arith.constant 0 : index
    %371 = vector.load %arg1[%370, %c0_101, %c0_102, %c0_103] : memref<8x3x2x32xf32, #tpu.memory_space<vmem>>, vector<1x3x2x32xf32>
    %372 = vector.shape_cast %371 : vector<1x3x2x32xf32> to vector<3x2x32xf32>
    %373 = arith.truncf %319 : vector<2x32xf32> to vector<2x32xbf16>
    %374 = vector.extract_strided_slice %0 {offsets = [0, 0, 0], sizes = [1, 32, 32], strides = [1, 1, 1]} : vector<3x32x32xbf16> to vector<1x32x32xbf16>
    %375 = vector.shape_cast %374 : vector<1x32x32xbf16> to vector<32x32xbf16>
    %cst_104 = arith.constant dense<0.000000e+00> : vector<2x32xf32>
    %376 = tpu.matmul %373, %375, %cst_104 {dimension_numbers = #tpu.dot_dimension_numbers<[1], [0], [0], [1], [0, 0, 1, 1], [], []>} : vector<2x32xbf16>, vector<32x32xbf16>, vector<2x32xf32> -> vector<2x32xf32>
    %377 = vector.extract_strided_slice %0 {offsets = [1, 0, 0], sizes = [1, 32, 32], strides = [1, 1, 1]} : vector<3x32x32xbf16> to vector<1x32x32xbf16>
    %378 = vector.shape_cast %377 : vector<1x32x32xbf16> to vector<32x32xbf16>
    %cst_105 = arith.constant dense<0.000000e+00> : vector<2x32xf32>
    %379 = tpu.matmul %373, %378, %cst_105 {dimension_numbers = #tpu.dot_dimension_numbers<[1], [0], [0], [1], [0, 0, 1, 1], [], []>} : vector<2x32xbf16>, vector<32x32xbf16>, vector<2x32xf32> -> vector<2x32xf32>
    %380 = vector.extract_strided_slice %0 {offsets = [2, 0, 0], sizes = [1, 32, 32], strides = [1, 1, 1]} : vector<3x32x32xbf16> to vector<1x32x32xbf16>
    %381 = vector.shape_cast %380 : vector<1x32x32xbf16> to vector<32x32xbf16>
    %cst_106 = arith.constant dense<0.000000e+00> : vector<2x32xf32>
    %382 = tpu.matmul %373, %381, %cst_106 {dimension_numbers = #tpu.dot_dimension_numbers<[1], [0], [0], [1], [0, 0, 1, 1], [], []>} : vector<2x32xbf16>, vector<32x32xbf16>, vector<2x32xf32> -> vector<2x32xf32>
    %383 = vector.extract_strided_slice %372 {offsets = [0, 0, 0], sizes = [1, 2, 32], strides = [1, 1, 1]} : vector<3x2x32xf32> to vector<1x2x32xf32>
    %384 = vector.shape_cast %383 : vector<1x2x32xf32> to vector<2x32xf32>
    %385 = arith.addf %384, %376 : vector<2x32xf32>
    %386 = arith.negf %385 : vector<2x32xf32>
    %387 = math.exp %386 : vector<2x32xf32>
    %cst_107 = arith.constant 1.000000e+00 : f32
    %388 = vector.broadcast %cst_107 : f32 to vector<2x32xf32>
    %389 = arith.addf %388, %387 : vector<2x32xf32>
    %390 = arith.divf %388, %389 : vector<2x32xf32>
    %391 = vector.extract_strided_slice %372 {offsets = [1, 0, 0], sizes = [1, 2, 32], strides = [1, 1, 1]} : vector<3x2x32xf32> to vector<1x2x32xf32>
    %392 = vector.shape_cast %391 : vector<1x2x32xf32> to vector<2x32xf32>
    %393 = arith.addf %392, %379 : vector<2x32xf32>
    %394 = arith.negf %393 : vector<2x32xf32>
    %395 = math.exp %394 : vector<2x32xf32>
    %cst_108 = arith.constant 1.000000e+00 : f32
    %396 = vector.broadcast %cst_108 : f32 to vector<2x32xf32>
    %397 = arith.addf %396, %395 : vector<2x32xf32>
    %398 = arith.divf %396, %397 : vector<2x32xf32>
    %399 = vector.extract_strided_slice %372 {offsets = [2, 0, 0], sizes = [1, 2, 32], strides = [1, 1, 1]} : vector<3x2x32xf32> to vector<1x2x32xf32>
    %400 = vector.shape_cast %399 : vector<1x2x32xf32> to vector<2x32xf32>
    %401 = vector.broadcast %2 : vector<1x32xf32> to vector<2x32xf32>
    %402 = arith.addf %382, %401 : vector<2x32xf32>
    %403 = arith.mulf %390, %402 : vector<2x32xf32>
    %404 = arith.addf %400, %403 : vector<2x32xf32>
    %405 = math.tanh %404 : vector<2x32xf32>
    %cst_109 = arith.constant 1.000000e+00 : f32
    %406 = vector.broadcast %cst_109 : f32 to vector<2x32xf32>
    %407 = arith.subf %406, %398 : vector<2x32xf32>
    %408 = arith.mulf %407, %405 : vector<2x32xf32>
    %409 = arith.mulf %398, %319 : vector<2x32xf32>
    %410 = arith.addf %408, %409 : vector<2x32xf32>
    %411 = arith.index_cast %369 : i32 to index
    %c0_110 = arith.constant 0 : index
    %c0_111 = arith.constant 0 : index
    %c0_112 = arith.constant 0 : index
    %412 = vector.load %arg2[%411, %c0_110, %c0_111, %c0_112] : memref<8x3x2x32xf32, #tpu.memory_space<vmem>>, vector<1x3x2x32xf32>
    %413 = vector.shape_cast %412 : vector<1x3x2x32xf32> to vector<3x2x32xf32>
    %414 = arith.truncf %360 : vector<2x32xf32> to vector<2x32xbf16>
    %415 = vector.extract_strided_slice %1 {offsets = [0, 0, 0], sizes = [1, 32, 32], strides = [1, 1, 1]} : vector<3x32x32xbf16> to vector<1x32x32xbf16>
    %416 = vector.shape_cast %415 : vector<1x32x32xbf16> to vector<32x32xbf16>
    %cst_113 = arith.constant dense<0.000000e+00> : vector<2x32xf32>
    %417 = tpu.matmul %414, %416, %cst_113 {dimension_numbers = #tpu.dot_dimension_numbers<[1], [0], [0], [1], [0, 0, 1, 1], [], []>} : vector<2x32xbf16>, vector<32x32xbf16>, vector<2x32xf32> -> vector<2x32xf32>
    %418 = vector.extract_strided_slice %1 {offsets = [1, 0, 0], sizes = [1, 32, 32], strides = [1, 1, 1]} : vector<3x32x32xbf16> to vector<1x32x32xbf16>
    %419 = vector.shape_cast %418 : vector<1x32x32xbf16> to vector<32x32xbf16>
    %cst_114 = arith.constant dense<0.000000e+00> : vector<2x32xf32>
    %420 = tpu.matmul %414, %419, %cst_114 {dimension_numbers = #tpu.dot_dimension_numbers<[1], [0], [0], [1], [0, 0, 1, 1], [], []>} : vector<2x32xbf16>, vector<32x32xbf16>, vector<2x32xf32> -> vector<2x32xf32>
    %421 = vector.extract_strided_slice %1 {offsets = [2, 0, 0], sizes = [1, 32, 32], strides = [1, 1, 1]} : vector<3x32x32xbf16> to vector<1x32x32xbf16>
    %422 = vector.shape_cast %421 : vector<1x32x32xbf16> to vector<32x32xbf16>
    %cst_115 = arith.constant dense<0.000000e+00> : vector<2x32xf32>
    %423 = tpu.matmul %414, %422, %cst_115 {dimension_numbers = #tpu.dot_dimension_numbers<[1], [0], [0], [1], [0, 0, 1, 1], [], []>} : vector<2x32xbf16>, vector<32x32xbf16>, vector<2x32xf32> -> vector<2x32xf32>
    %424 = vector.extract_strided_slice %413 {offsets = [0, 0, 0], sizes = [1, 2, 32], strides = [1, 1, 1]} : vector<3x2x32xf32> to vector<1x2x32xf32>
    %425 = vector.shape_cast %424 : vector<1x2x32xf32> to vector<2x32xf32>
    %426 = arith.addf %425, %417 : vector<2x32xf32>
    %427 = arith.negf %426 : vector<2x32xf32>
    %428 = math.exp %427 : vector<2x32xf32>
    %cst_116 = arith.constant 1.000000e+00 : f32
    %429 = vector.broadcast %cst_116 : f32 to vector<2x32xf32>
    %430 = arith.addf %429, %428 : vector<2x32xf32>
    %431 = arith.divf %429, %430 : vector<2x32xf32>
    %432 = vector.extract_strided_slice %413 {offsets = [1, 0, 0], sizes = [1, 2, 32], strides = [1, 1, 1]} : vector<3x2x32xf32> to vector<1x2x32xf32>
    %433 = vector.shape_cast %432 : vector<1x2x32xf32> to vector<2x32xf32>
    %434 = arith.addf %433, %420 : vector<2x32xf32>
    %435 = arith.negf %434 : vector<2x32xf32>
    %436 = math.exp %435 : vector<2x32xf32>
    %cst_117 = arith.constant 1.000000e+00 : f32
    %437 = vector.broadcast %cst_117 : f32 to vector<2x32xf32>
    %438 = arith.addf %437, %436 : vector<2x32xf32>
    %439 = arith.divf %437, %438 : vector<2x32xf32>
    %440 = vector.extract_strided_slice %413 {offsets = [2, 0, 0], sizes = [1, 2, 32], strides = [1, 1, 1]} : vector<3x2x32xf32> to vector<1x2x32xf32>
    %441 = vector.shape_cast %440 : vector<1x2x32xf32> to vector<2x32xf32>
    %442 = vector.broadcast %3 : vector<1x32xf32> to vector<2x32xf32>
    %443 = arith.addf %423, %442 : vector<2x32xf32>
    %444 = arith.mulf %431, %443 : vector<2x32xf32>
    %445 = arith.addf %441, %444 : vector<2x32xf32>
    %446 = math.tanh %445 : vector<2x32xf32>
    %cst_118 = arith.constant 1.000000e+00 : f32
    %447 = vector.broadcast %cst_118 : f32 to vector<2x32xf32>
    %448 = arith.subf %447, %439 : vector<2x32xf32>
    %449 = arith.mulf %448, %446 : vector<2x32xf32>
    %450 = arith.mulf %439, %360 : vector<2x32xf32>
    %451 = arith.addf %449, %450 : vector<2x32xf32>
    %452 = arith.index_cast %c4_i32 : i32 to index
    %c0_119 = arith.constant 0 : index
    %c0_120 = arith.constant 0 : index
    %453 = vector.load %arg7[%452, %c0_119, %c0_120] : memref<8x2x32xf32, #tpu.memory_space<vmem>>, vector<1x2x32xf32>
    %454 = vector.shape_cast %453 : vector<1x2x32xf32> to vector<2x32xf32>
    %455 = vector.shape_cast %410 : vector<2x32xf32> to vector<1x2x32xf32>
    tpu.vector_store %arg7[%452, %c0_119, %c0_120], %455 {strides = array<i32>} : memref<8x2x32xf32, #tpu.memory_space<vmem>>, vector<1x2x32xf32>,
    %456 = arith.index_cast %369 : i32 to index
    %c0_121 = arith.constant 0 : index
    %c0_122 = arith.constant 0 : index
    %457 = vector.load %arg8[%456, %c0_121, %c0_122] : memref<8x2x32xf32, #tpu.memory_space<vmem>>, vector<1x2x32xf32>
    %458 = vector.shape_cast %457 : vector<1x2x32xf32> to vector<2x32xf32>
    %459 = vector.shape_cast %451 : vector<2x32xf32> to vector<1x2x32xf32>
    tpu.vector_store %arg8[%456, %c0_121, %c0_122], %459 {strides = array<i32>} : memref<8x2x32xf32, #tpu.memory_space<vmem>>, vector<1x2x32xf32>,
    %c5_i32 = arith.constant 5 : i32
    %c7_i32_123 = arith.constant 7 : i32
    %460 = arith.subi %c7_i32_123, %c5_i32 : i32
    %461 = arith.index_cast %c5_i32 : i32 to index
    %c0_124 = arith.constant 0 : index
    %c0_125 = arith.constant 0 : index
    %c0_126 = arith.constant 0 : index
    %462 = vector.load %arg1[%461, %c0_124, %c0_125, %c0_126] : memref<8x3x2x32xf32, #tpu.memory_space<vmem>>, vector<1x3x2x32xf32>
    %463 = vector.shape_cast %462 : vector<1x3x2x32xf32> to vector<3x2x32xf32>
    %464 = arith.truncf %410 : vector<2x32xf32> to vector<2x32xbf16>
    %465 = vector.extract_strided_slice %0 {offsets = [0, 0, 0], sizes = [1, 32, 32], strides = [1, 1, 1]} : vector<3x32x32xbf16> to vector<1x32x32xbf16>
    %466 = vector.shape_cast %465 : vector<1x32x32xbf16> to vector<32x32xbf16>
    %cst_127 = arith.constant dense<0.000000e+00> : vector<2x32xf32>
    %467 = tpu.matmul %464, %466, %cst_127 {dimension_numbers = #tpu.dot_dimension_numbers<[1], [0], [0], [1], [0, 0, 1, 1], [], []>} : vector<2x32xbf16>, vector<32x32xbf16>, vector<2x32xf32> -> vector<2x32xf32>
    %468 = vector.extract_strided_slice %0 {offsets = [1, 0, 0], sizes = [1, 32, 32], strides = [1, 1, 1]} : vector<3x32x32xbf16> to vector<1x32x32xbf16>
    %469 = vector.shape_cast %468 : vector<1x32x32xbf16> to vector<32x32xbf16>
    %cst_128 = arith.constant dense<0.000000e+00> : vector<2x32xf32>
    %470 = tpu.matmul %464, %469, %cst_128 {dimension_numbers = #tpu.dot_dimension_numbers<[1], [0], [0], [1], [0, 0, 1, 1], [], []>} : vector<2x32xbf16>, vector<32x32xbf16>, vector<2x32xf32> -> vector<2x32xf32>
    %471 = vector.extract_strided_slice %0 {offsets = [2, 0, 0], sizes = [1, 32, 32], strides = [1, 1, 1]} : vector<3x32x32xbf16> to vector<1x32x32xbf16>
    %472 = vector.shape_cast %471 : vector<1x32x32xbf16> to vector<32x32xbf16>
    %cst_129 = arith.constant dense<0.000000e+00> : vector<2x32xf32>
    %473 = tpu.matmul %464, %472, %cst_129 {dimension_numbers = #tpu.dot_dimension_numbers<[1], [0], [0], [1], [0, 0, 1, 1], [], []>} : vector<2x32xbf16>, vector<32x32xbf16>, vector<2x32xf32> -> vector<2x32xf32>
    %474 = vector.extract_strided_slice %463 {offsets = [0, 0, 0], sizes = [1, 2, 32], strides = [1, 1, 1]} : vector<3x2x32xf32> to vector<1x2x32xf32>
    %475 = vector.shape_cast %474 : vector<1x2x32xf32> to vector<2x32xf32>
    %476 = arith.addf %475, %467 : vector<2x32xf32>
    %477 = arith.negf %476 : vector<2x32xf32>
    %478 = math.exp %477 : vector<2x32xf32>
    %cst_130 = arith.constant 1.000000e+00 : f32
    %479 = vector.broadcast %cst_130 : f32 to vector<2x32xf32>
    %480 = arith.addf %479, %478 : vector<2x32xf32>
    %481 = arith.divf %479, %480 : vector<2x32xf32>
    %482 = vector.extract_strided_slice %463 {offsets = [1, 0, 0], sizes = [1, 2, 32], strides = [1, 1, 1]} : vector<3x2x32xf32> to vector<1x2x32xf32>
    %483 = vector.shape_cast %482 : vector<1x2x32xf32> to vector<2x32xf32>
    %484 = arith.addf %483, %470 : vector<2x32xf32>
    %485 = arith.negf %484 : vector<2x32xf32>
    %486 = math.exp %485 : vector<2x32xf32>
    %cst_131 = arith.constant 1.000000e+00 : f32
    %487 = vector.broadcast %cst_131 : f32 to vector<2x32xf32>
    %488 = arith.addf %487, %486 : vector<2x32xf32>
    %489 = arith.divf %487, %488 : vector<2x32xf32>
    %490 = vector.extract_strided_slice %463 {offsets = [2, 0, 0], sizes = [1, 2, 32], strides = [1, 1, 1]} : vector<3x2x32xf32> to vector<1x2x32xf32>
    %491 = vector.shape_cast %490 : vector<1x2x32xf32> to vector<2x32xf32>
    %492 = vector.broadcast %2 : vector<1x32xf32> to vector<2x32xf32>
    %493 = arith.addf %473, %492 : vector<2x32xf32>
    %494 = arith.mulf %481, %493 : vector<2x32xf32>
    %495 = arith.addf %491, %494 : vector<2x32xf32>
    %496 = math.tanh %495 : vector<2x32xf32>
    %cst_132 = arith.constant 1.000000e+00 : f32
    %497 = vector.broadcast %cst_132 : f32 to vector<2x32xf32>
    %498 = arith.subf %497, %489 : vector<2x32xf32>
    %499 = arith.mulf %498, %496 : vector<2x32xf32>
    %500 = arith.mulf %489, %410 : vector<2x32xf32>
    %501 = arith.addf %499, %500 : vector<2x32xf32>
    %502 = arith.index_cast %460 : i32 to index
    %c0_133 = arith.constant 0 : index
    %c0_134 = arith.constant 0 : index
    %c0_135 = arith.constant 0 : index
    %503 = vector.load %arg2[%502, %c0_133, %c0_134, %c0_135] : memref<8x3x2x32xf32, #tpu.memory_space<vmem>>, vector<1x3x2x32xf32>
    %504 = vector.shape_cast %503 : vector<1x3x2x32xf32> to vector<3x2x32xf32>
    %505 = arith.truncf %451 : vector<2x32xf32> to vector<2x32xbf16>
    %506 = vector.extract_strided_slice %1 {offsets = [0, 0, 0], sizes = [1, 32, 32], strides = [1, 1, 1]} : vector<3x32x32xbf16> to vector<1x32x32xbf16>
    %507 = vector.shape_cast %506 : vector<1x32x32xbf16> to vector<32x32xbf16>
    %cst_136 = arith.constant dense<0.000000e+00> : vector<2x32xf32>
    %508 = tpu.matmul %505, %507, %cst_136 {dimension_numbers = #tpu.dot_dimension_numbers<[1], [0], [0], [1], [0, 0, 1, 1], [], []>} : vector<2x32xbf16>, vector<32x32xbf16>, vector<2x32xf32> -> vector<2x32xf32>
    %509 = vector.extract_strided_slice %1 {offsets = [1, 0, 0], sizes = [1, 32, 32], strides = [1, 1, 1]} : vector<3x32x32xbf16> to vector<1x32x32xbf16>
    %510 = vector.shape_cast %509 : vector<1x32x32xbf16> to vector<32x32xbf16>
    %cst_137 = arith.constant dense<0.000000e+00> : vector<2x32xf32>
    %511 = tpu.matmul %505, %510, %cst_137 {dimension_numbers = #tpu.dot_dimension_numbers<[1], [0], [0], [1], [0, 0, 1, 1], [], []>} : vector<2x32xbf16>, vector<32x32xbf16>, vector<2x32xf32> -> vector<2x32xf32>
    %512 = vector.extract_strided_slice %1 {offsets = [2, 0, 0], sizes = [1, 32, 32], strides = [1, 1, 1]} : vector<3x32x32xbf16> to vector<1x32x32xbf16>
    %513 = vector.shape_cast %512 : vector<1x32x32xbf16> to vector<32x32xbf16>
    %cst_138 = arith.constant dense<0.000000e+00> : vector<2x32xf32>
    %514 = tpu.matmul %505, %513, %cst_138 {dimension_numbers = #tpu.dot_dimension_numbers<[1], [0], [0], [1], [0, 0, 1, 1], [], []>} : vector<2x32xbf16>, vector<32x32xbf16>, vector<2x32xf32> -> vector<2x32xf32>
    %515 = vector.extract_strided_slice %504 {offsets = [0, 0, 0], sizes = [1, 2, 32], strides = [1, 1, 1]} : vector<3x2x32xf32> to vector<1x2x32xf32>
    %516 = vector.shape_cast %515 : vector<1x2x32xf32> to vector<2x32xf32>
    %517 = arith.addf %516, %508 : vector<2x32xf32>
    %518 = arith.negf %517 : vector<2x32xf32>
    %519 = math.exp %518 : vector<2x32xf32>
    %cst_139 = arith.constant 1.000000e+00 : f32
    %520 = vector.broadcast %cst_139 : f32 to vector<2x32xf32>
    %521 = arith.addf %520, %519 : vector<2x32xf32>
    %522 = arith.divf %520, %521 : vector<2x32xf32>
    %523 = vector.extract_strided_slice %504 {offsets = [1, 0, 0], sizes = [1, 2, 32], strides = [1, 1, 1]} : vector<3x2x32xf32> to vector<1x2x32xf32>
    %524 = vector.shape_cast %523 : vector<1x2x32xf32> to vector<2x32xf32>
    %525 = arith.addf %524, %511 : vector<2x32xf32>
    %526 = arith.negf %525 : vector<2x32xf32>
    %527 = math.exp %526 : vector<2x32xf32>
    %cst_140 = arith.constant 1.000000e+00 : f32
    %528 = vector.broadcast %cst_140 : f32 to vector<2x32xf32>
    %529 = arith.addf %528, %527 : vector<2x32xf32>
    %530 = arith.divf %528, %529 : vector<2x32xf32>
    %531 = vector.extract_strided_slice %504 {offsets = [2, 0, 0], sizes = [1, 2, 32], strides = [1, 1, 1]} : vector<3x2x32xf32> to vector<1x2x32xf32>
    %532 = vector.shape_cast %531 : vector<1x2x32xf32> to vector<2x32xf32>
    %533 = vector.broadcast %3 : vector<1x32xf32> to vector<2x32xf32>
    %534 = arith.addf %514, %533 : vector<2x32xf32>
    %535 = arith.mulf %522, %534 : vector<2x32xf32>
    %536 = arith.addf %532, %535 : vector<2x32xf32>
    %537 = math.tanh %536 : vector<2x32xf32>
    %cst_141 = arith.constant 1.000000e+00 : f32
    %538 = vector.broadcast %cst_141 : f32 to vector<2x32xf32>
    %539 = arith.subf %538, %530 : vector<2x32xf32>
    %540 = arith.mulf %539, %537 : vector<2x32xf32>
    %541 = arith.mulf %530, %451 : vector<2x32xf32>
    %542 = arith.addf %540, %541 : vector<2x32xf32>
    %543 = arith.index_cast %c5_i32 : i32 to index
    %c0_142 = arith.constant 0 : index
    %c0_143 = arith.constant 0 : index
    %544 = vector.load %arg7[%543, %c0_142, %c0_143] : memref<8x2x32xf32, #tpu.memory_space<vmem>>, vector<1x2x32xf32>
    %545 = vector.shape_cast %544 : vector<1x2x32xf32> to vector<2x32xf32>
    %546 = vector.shape_cast %501 : vector<2x32xf32> to vector<1x2x32xf32>
    tpu.vector_store %arg7[%543, %c0_142, %c0_143], %546 {strides = array<i32>} : memref<8x2x32xf32, #tpu.memory_space<vmem>>, vector<1x2x32xf32>,
    %547 = arith.index_cast %460 : i32 to index
    %c0_144 = arith.constant 0 : index
    %c0_145 = arith.constant 0 : index
    %548 = vector.load %arg8[%547, %c0_144, %c0_145] : memref<8x2x32xf32, #tpu.memory_space<vmem>>, vector<1x2x32xf32>
    %549 = vector.shape_cast %548 : vector<1x2x32xf32> to vector<2x32xf32>
    %550 = vector.shape_cast %542 : vector<2x32xf32> to vector<1x2x32xf32>
    tpu.vector_store %arg8[%547, %c0_144, %c0_145], %550 {strides = array<i32>} : memref<8x2x32xf32, #tpu.memory_space<vmem>>, vector<1x2x32xf32>,
    %c6_i32 = arith.constant 6 : i32
    %c7_i32_146 = arith.constant 7 : i32
    %551 = arith.subi %c7_i32_146, %c6_i32 : i32
    %552 = arith.index_cast %c6_i32 : i32 to index
    %c0_147 = arith.constant 0 : index
    %c0_148 = arith.constant 0 : index
    %c0_149 = arith.constant 0 : index
    %553 = vector.load %arg1[%552, %c0_147, %c0_148, %c0_149] : memref<8x3x2x32xf32, #tpu.memory_space<vmem>>, vector<1x3x2x32xf32>
    %554 = vector.shape_cast %553 : vector<1x3x2x32xf32> to vector<3x2x32xf32>
    %555 = arith.truncf %501 : vector<2x32xf32> to vector<2x32xbf16>
    %556 = vector.extract_strided_slice %0 {offsets = [0, 0, 0], sizes = [1, 32, 32], strides = [1, 1, 1]} : vector<3x32x32xbf16> to vector<1x32x32xbf16>
    %557 = vector.shape_cast %556 : vector<1x32x32xbf16> to vector<32x32xbf16>
    %cst_150 = arith.constant dense<0.000000e+00> : vector<2x32xf32>
    %558 = tpu.matmul %555, %557, %cst_150 {dimension_numbers = #tpu.dot_dimension_numbers<[1], [0], [0], [1], [0, 0, 1, 1], [], []>} : vector<2x32xbf16>, vector<32x32xbf16>, vector<2x32xf32> -> vector<2x32xf32>
    %559 = vector.extract_strided_slice %0 {offsets = [1, 0, 0], sizes = [1, 32, 32], strides = [1, 1, 1]} : vector<3x32x32xbf16> to vector<1x32x32xbf16>
    %560 = vector.shape_cast %559 : vector<1x32x32xbf16> to vector<32x32xbf16>
    %cst_151 = arith.constant dense<0.000000e+00> : vector<2x32xf32>
    %561 = tpu.matmul %555, %560, %cst_151 {dimension_numbers = #tpu.dot_dimension_numbers<[1], [0], [0], [1], [0, 0, 1, 1], [], []>} : vector<2x32xbf16>, vector<32x32xbf16>, vector<2x32xf32> -> vector<2x32xf32>
    %562 = vector.extract_strided_slice %0 {offsets = [2, 0, 0], sizes = [1, 32, 32], strides = [1, 1, 1]} : vector<3x32x32xbf16> to vector<1x32x32xbf16>
    %563 = vector.shape_cast %562 : vector<1x32x32xbf16> to vector<32x32xbf16>
    %cst_152 = arith.constant dense<0.000000e+00> : vector<2x32xf32>
    %564 = tpu.matmul %555, %563, %cst_152 {dimension_numbers = #tpu.dot_dimension_numbers<[1], [0], [0], [1], [0, 0, 1, 1], [], []>} : vector<2x32xbf16>, vector<32x32xbf16>, vector<2x32xf32> -> vector<2x32xf32>
    %565 = vector.extract_strided_slice %554 {offsets = [0, 0, 0], sizes = [1, 2, 32], strides = [1, 1, 1]} : vector<3x2x32xf32> to vector<1x2x32xf32>
    %566 = vector.shape_cast %565 : vector<1x2x32xf32> to vector<2x32xf32>
    %567 = arith.addf %566, %558 : vector<2x32xf32>
    %568 = arith.negf %567 : vector<2x32xf32>
    %569 = math.exp %568 : vector<2x32xf32>
    %cst_153 = arith.constant 1.000000e+00 : f32
    %570 = vector.broadcast %cst_153 : f32 to vector<2x32xf32>
    %571 = arith.addf %570, %569 : vector<2x32xf32>
    %572 = arith.divf %570, %571 : vector<2x32xf32>
    %573 = vector.extract_strided_slice %554 {offsets = [1, 0, 0], sizes = [1, 2, 32], strides = [1, 1, 1]} : vector<3x2x32xf32> to vector<1x2x32xf32>
    %574 = vector.shape_cast %573 : vector<1x2x32xf32> to vector<2x32xf32>
    %575 = arith.addf %574, %561 : vector<2x32xf32>
    %576 = arith.negf %575 : vector<2x32xf32>
    %577 = math.exp %576 : vector<2x32xf32>
    %cst_154 = arith.constant 1.000000e+00 : f32
    %578 = vector.broadcast %cst_154 : f32 to vector<2x32xf32>
    %579 = arith.addf %578, %577 : vector<2x32xf32>
    %580 = arith.divf %578, %579 : vector<2x32xf32>
    %581 = vector.extract_strided_slice %554 {offsets = [2, 0, 0], sizes = [1, 2, 32], strides = [1, 1, 1]} : vector<3x2x32xf32> to vector<1x2x32xf32>
    %582 = vector.shape_cast %581 : vector<1x2x32xf32> to vector<2x32xf32>
    %583 = vector.broadcast %2 : vector<1x32xf32> to vector<2x32xf32>
    %584 = arith.addf %564, %583 : vector<2x32xf32>
    %585 = arith.mulf %572, %584 : vector<2x32xf32>
    %586 = arith.addf %582, %585 : vector<2x32xf32>
    %587 = math.tanh %586 : vector<2x32xf32>
    %cst_155 = arith.constant 1.000000e+00 : f32
    %588 = vector.broadcast %cst_155 : f32 to vector<2x32xf32>
    %589 = arith.subf %588, %580 : vector<2x32xf32>
    %590 = arith.mulf %589, %587 : vector<2x32xf32>
    %591 = arith.mulf %580, %501 : vector<2x32xf32>
    %592 = arith.addf %590, %591 : vector<2x32xf32>
    %593 = arith.index_cast %551 : i32 to index
    %c0_156 = arith.constant 0 : index
    %c0_157 = arith.constant 0 : index
    %c0_158 = arith.constant 0 : index
    %594 = vector.load %arg2[%593, %c0_156, %c0_157, %c0_158] : memref<8x3x2x32xf32, #tpu.memory_space<vmem>>, vector<1x3x2x32xf32>
    %595 = vector.shape_cast %594 : vector<1x3x2x32xf32> to vector<3x2x32xf32>
    %596 = arith.truncf %542 : vector<2x32xf32> to vector<2x32xbf16>
    %597 = vector.extract_strided_slice %1 {offsets = [0, 0, 0], sizes = [1, 32, 32], strides = [1, 1, 1]} : vector<3x32x32xbf16> to vector<1x32x32xbf16>
    %598 = vector.shape_cast %597 : vector<1x32x32xbf16> to vector<32x32xbf16>
    %cst_159 = arith.constant dense<0.000000e+00> : vector<2x32xf32>
    %599 = tpu.matmul %596, %598, %cst_159 {dimension_numbers = #tpu.dot_dimension_numbers<[1], [0], [0], [1], [0, 0, 1, 1], [], []>} : vector<2x32xbf16>, vector<32x32xbf16>, vector<2x32xf32> -> vector<2x32xf32>
    %600 = vector.extract_strided_slice %1 {offsets = [1, 0, 0], sizes = [1, 32, 32], strides = [1, 1, 1]} : vector<3x32x32xbf16> to vector<1x32x32xbf16>
    %601 = vector.shape_cast %600 : vector<1x32x32xbf16> to vector<32x32xbf16>
    %cst_160 = arith.constant dense<0.000000e+00> : vector<2x32xf32>
    %602 = tpu.matmul %596, %601, %cst_160 {dimension_numbers = #tpu.dot_dimension_numbers<[1], [0], [0], [1], [0, 0, 1, 1], [], []>} : vector<2x32xbf16>, vector<32x32xbf16>, vector<2x32xf32> -> vector<2x32xf32>
    %603 = vector.extract_strided_slice %1 {offsets = [2, 0, 0], sizes = [1, 32, 32], strides = [1, 1, 1]} : vector<3x32x32xbf16> to vector<1x32x32xbf16>
    %604 = vector.shape_cast %603 : vector<1x32x32xbf16> to vector<32x32xbf16>
    %cst_161 = arith.constant dense<0.000000e+00> : vector<2x32xf32>
    %605 = tpu.matmul %596, %604, %cst_161 {dimension_numbers = #tpu.dot_dimension_numbers<[1], [0], [0], [1], [0, 0, 1, 1], [], []>} : vector<2x32xbf16>, vector<32x32xbf16>, vector<2x32xf32> -> vector<2x32xf32>
    %606 = vector.extract_strided_slice %595 {offsets = [0, 0, 0], sizes = [1, 2, 32], strides = [1, 1, 1]} : vector<3x2x32xf32> to vector<1x2x32xf32>
    %607 = vector.shape_cast %606 : vector<1x2x32xf32> to vector<2x32xf32>
    %608 = arith.addf %607, %599 : vector<2x32xf32>
    %609 = arith.negf %608 : vector<2x32xf32>
    %610 = math.exp %609 : vector<2x32xf32>
    %cst_162 = arith.constant 1.000000e+00 : f32
    %611 = vector.broadcast %cst_162 : f32 to vector<2x32xf32>
    %612 = arith.addf %611, %610 : vector<2x32xf32>
    %613 = arith.divf %611, %612 : vector<2x32xf32>
    %614 = vector.extract_strided_slice %595 {offsets = [1, 0, 0], sizes = [1, 2, 32], strides = [1, 1, 1]} : vector<3x2x32xf32> to vector<1x2x32xf32>
    %615 = vector.shape_cast %614 : vector<1x2x32xf32> to vector<2x32xf32>
    %616 = arith.addf %615, %602 : vector<2x32xf32>
    %617 = arith.negf %616 : vector<2x32xf32>
    %618 = math.exp %617 : vector<2x32xf32>
    %cst_163 = arith.constant 1.000000e+00 : f32
    %619 = vector.broadcast %cst_163 : f32 to vector<2x32xf32>
    %620 = arith.addf %619, %618 : vector<2x32xf32>
    %621 = arith.divf %619, %620 : vector<2x32xf32>
    %622 = vector.extract_strided_slice %595 {offsets = [2, 0, 0], sizes = [1, 2, 32], strides = [1, 1, 1]} : vector<3x2x32xf32> to vector<1x2x32xf32>
    %623 = vector.shape_cast %622 : vector<1x2x32xf32> to vector<2x32xf32>
    %624 = vector.broadcast %3 : vector<1x32xf32> to vector<2x32xf32>
    %625 = arith.addf %605, %624 : vector<2x32xf32>
    %626 = arith.mulf %613, %625 : vector<2x32xf32>
    %627 = arith.addf %623, %626 : vector<2x32xf32>
    %628 = math.tanh %627 : vector<2x32xf32>
    %cst_164 = arith.constant 1.000000e+00 : f32
    %629 = vector.broadcast %cst_164 : f32 to vector<2x32xf32>
    %630 = arith.subf %629, %621 : vector<2x32xf32>
    %631 = arith.mulf %630, %628 : vector<2x32xf32>
    %632 = arith.mulf %621, %542 : vector<2x32xf32>
    %633 = arith.addf %631, %632 : vector<2x32xf32>
    %634 = arith.index_cast %c6_i32 : i32 to index
    %c0_165 = arith.constant 0 : index
    %c0_166 = arith.constant 0 : index
    %635 = vector.load %arg7[%634, %c0_165, %c0_166] : memref<8x2x32xf32, #tpu.memory_space<vmem>>, vector<1x2x32xf32>
    %636 = vector.shape_cast %635 : vector<1x2x32xf32> to vector<2x32xf32>
    %637 = vector.shape_cast %592 : vector<2x32xf32> to vector<1x2x32xf32>
    tpu.vector_store %arg7[%634, %c0_165, %c0_166], %637 {strides = array<i32>} : memref<8x2x32xf32, #tpu.memory_space<vmem>>, vector<1x2x32xf32>,
    %638 = arith.index_cast %551 : i32 to index
    %c0_167 = arith.constant 0 : index
    %c0_168 = arith.constant 0 : index
    %639 = vector.load %arg8[%638, %c0_167, %c0_168] : memref<8x2x32xf32, #tpu.memory_space<vmem>>, vector<1x2x32xf32>
    %640 = vector.shape_cast %639 : vector<1x2x32xf32> to vector<2x32xf32>
    %641 = vector.shape_cast %633 : vector<2x32xf32> to vector<1x2x32xf32>
    tpu.vector_store %arg8[%638, %c0_167, %c0_168], %641 {strides = array<i32>} : memref<8x2x32xf32, #tpu.memory_space<vmem>>, vector<1x2x32xf32>,
    %c7_i32_169 = arith.constant 7 : i32
    %c7_i32_170 = arith.constant 7 : i32
    %642 = arith.subi %c7_i32_170, %c7_i32_169 : i32
    %643 = arith.index_cast %c7_i32_169 : i32 to index
    %c0_171 = arith.constant 0 : index
    %c0_172 = arith.constant 0 : index
    %c0_173 = arith.constant 0 : index
    %644 = vector.load %arg1[%643, %c0_171, %c0_172, %c0_173] : memref<8x3x2x32xf32, #tpu.memory_space<vmem>>, vector<1x3x2x32xf32>
    %645 = vector.shape_cast %644 : vector<1x3x2x32xf32> to vector<3x2x32xf32>
    %646 = arith.truncf %592 : vector<2x32xf32> to vector<2x32xbf16>
    %647 = vector.extract_strided_slice %0 {offsets = [0, 0, 0], sizes = [1, 32, 32], strides = [1, 1, 1]} : vector<3x32x32xbf16> to vector<1x32x32xbf16>
    %648 = vector.shape_cast %647 : vector<1x32x32xbf16> to vector<32x32xbf16>
    %cst_174 = arith.constant dense<0.000000e+00> : vector<2x32xf32>
    %649 = tpu.matmul %646, %648, %cst_174 {dimension_numbers = #tpu.dot_dimension_numbers<[1], [0], [0], [1], [0, 0, 1, 1], [], []>} : vector<2x32xbf16>, vector<32x32xbf16>, vector<2x32xf32> -> vector<2x32xf32>
    %650 = vector.extract_strided_slice %0 {offsets = [1, 0, 0], sizes = [1, 32, 32], strides = [1, 1, 1]} : vector<3x32x32xbf16> to vector<1x32x32xbf16>
    %651 = vector.shape_cast %650 : vector<1x32x32xbf16> to vector<32x32xbf16>
    %cst_175 = arith.constant dense<0.000000e+00> : vector<2x32xf32>
    %652 = tpu.matmul %646, %651, %cst_175 {dimension_numbers = #tpu.dot_dimension_numbers<[1], [0], [0], [1], [0, 0, 1, 1], [], []>} : vector<2x32xbf16>, vector<32x32xbf16>, vector<2x32xf32> -> vector<2x32xf32>
    %653 = vector.extract_strided_slice %0 {offsets = [2, 0, 0], sizes = [1, 32, 32], strides = [1, 1, 1]} : vector<3x32x32xbf16> to vector<1x32x32xbf16>
    %654 = vector.shape_cast %653 : vector<1x32x32xbf16> to vector<32x32xbf16>
    %cst_176 = arith.constant dense<0.000000e+00> : vector<2x32xf32>
    %655 = tpu.matmul %646, %654, %cst_176 {dimension_numbers = #tpu.dot_dimension_numbers<[1], [0], [0], [1], [0, 0, 1, 1], [], []>} : vector<2x32xbf16>, vector<32x32xbf16>, vector<2x32xf32> -> vector<2x32xf32>
    %656 = vector.extract_strided_slice %645 {offsets = [0, 0, 0], sizes = [1, 2, 32], strides = [1, 1, 1]} : vector<3x2x32xf32> to vector<1x2x32xf32>
    %657 = vector.shape_cast %656 : vector<1x2x32xf32> to vector<2x32xf32>
    %658 = arith.addf %657, %649 : vector<2x32xf32>
    %659 = arith.negf %658 : vector<2x32xf32>
    %660 = math.exp %659 : vector<2x32xf32>
    %cst_177 = arith.constant 1.000000e+00 : f32
    %661 = vector.broadcast %cst_177 : f32 to vector<2x32xf32>
    %662 = arith.addf %661, %660 : vector<2x32xf32>
    %663 = arith.divf %661, %662 : vector<2x32xf32>
    %664 = vector.extract_strided_slice %645 {offsets = [1, 0, 0], sizes = [1, 2, 32], strides = [1, 1, 1]} : vector<3x2x32xf32> to vector<1x2x32xf32>
    %665 = vector.shape_cast %664 : vector<1x2x32xf32> to vector<2x32xf32>
    %666 = arith.addf %665, %652 : vector<2x32xf32>
    %667 = arith.negf %666 : vector<2x32xf32>
    %668 = math.exp %667 : vector<2x32xf32>
    %cst_178 = arith.constant 1.000000e+00 : f32
    %669 = vector.broadcast %cst_178 : f32 to vector<2x32xf32>
    %670 = arith.addf %669, %668 : vector<2x32xf32>
    %671 = arith.divf %669, %670 : vector<2x32xf32>
    %672 = vector.extract_strided_slice %645 {offsets = [2, 0, 0], sizes = [1, 2, 32], strides = [1, 1, 1]} : vector<3x2x32xf32> to vector<1x2x32xf32>
    %673 = vector.shape_cast %672 : vector<1x2x32xf32> to vector<2x32xf32>
    %674 = vector.broadcast %2 : vector<1x32xf32> to vector<2x32xf32>
    %675 = arith.addf %655, %674 : vector<2x32xf32>
    %676 = arith.mulf %663, %675 : vector<2x32xf32>
    %677 = arith.addf %673, %676 : vector<2x32xf32>
    %678 = math.tanh %677 : vector<2x32xf32>
    %cst_179 = arith.constant 1.000000e+00 : f32
    %679 = vector.broadcast %cst_179 : f32 to vector<2x32xf32>
    %680 = arith.subf %679, %671 : vector<2x32xf32>
    %681 = arith.mulf %680, %678 : vector<2x32xf32>
    %682 = arith.mulf %671, %592 : vector<2x32xf32>
    %683 = arith.addf %681, %682 : vector<2x32xf32>
    %684 = arith.index_cast %642 : i32 to index
    %c0_180 = arith.constant 0 : index
    %c0_181 = arith.constant 0 : index
    %c0_182 = arith.constant 0 : index
    %685 = vector.load %arg2[%684, %c0_180, %c0_181, %c0_182] : memref<8x3x2x32xf32, #tpu.memory_space<vmem>>, vector<1x3x2x32xf32>
    %686 = vector.shape_cast %685 : vector<1x3x2x32xf32> to vector<3x2x32xf32>
    %687 = arith.truncf %633 : vector<2x32xf32> to vector<2x32xbf16>
    %688 = vector.extract_strided_slice %1 {offsets = [0, 0, 0], sizes = [1, 32, 32], strides = [1, 1, 1]} : vector<3x32x32xbf16> to vector<1x32x32xbf16>
    %689 = vector.shape_cast %688 : vector<1x32x32xbf16> to vector<32x32xbf16>
    %cst_183 = arith.constant dense<0.000000e+00> : vector<2x32xf32>
    %690 = tpu.matmul %687, %689, %cst_183 {dimension_numbers = #tpu.dot_dimension_numbers<[1], [0], [0], [1], [0, 0, 1, 1], [], []>} : vector<2x32xbf16>, vector<32x32xbf16>, vector<2x32xf32> -> vector<2x32xf32>
    %691 = vector.extract_strided_slice %1 {offsets = [1, 0, 0], sizes = [1, 32, 32], strides = [1, 1, 1]} : vector<3x32x32xbf16> to vector<1x32x32xbf16>
    %692 = vector.shape_cast %691 : vector<1x32x32xbf16> to vector<32x32xbf16>
    %cst_184 = arith.constant dense<0.000000e+00> : vector<2x32xf32>
    %693 = tpu.matmul %687, %692, %cst_184 {dimension_numbers = #tpu.dot_dimension_numbers<[1], [0], [0], [1], [0, 0, 1, 1], [], []>} : vector<2x32xbf16>, vector<32x32xbf16>, vector<2x32xf32> -> vector<2x32xf32>
    %694 = vector.extract_strided_slice %1 {offsets = [2, 0, 0], sizes = [1, 32, 32], strides = [1, 1, 1]} : vector<3x32x32xbf16> to vector<1x32x32xbf16>
    %695 = vector.shape_cast %694 : vector<1x32x32xbf16> to vector<32x32xbf16>
    %cst_185 = arith.constant dense<0.000000e+00> : vector<2x32xf32>
    %696 = tpu.matmul %687, %695, %cst_185 {dimension_numbers = #tpu.dot_dimension_numbers<[1], [0], [0], [1], [0, 0, 1, 1], [], []>} : vector<2x32xbf16>, vector<32x32xbf16>, vector<2x32xf32> -> vector<2x32xf32>
    %697 = vector.extract_strided_slice %686 {offsets = [0, 0, 0], sizes = [1, 2, 32], strides = [1, 1, 1]} : vector<3x2x32xf32> to vector<1x2x32xf32>
    %698 = vector.shape_cast %697 : vector<1x2x32xf32> to vector<2x32xf32>
    %699 = arith.addf %698, %690 : vector<2x32xf32>
    %700 = arith.negf %699 : vector<2x32xf32>
    %701 = math.exp %700 : vector<2x32xf32>
    %cst_186 = arith.constant 1.000000e+00 : f32
    %702 = vector.broadcast %cst_186 : f32 to vector<2x32xf32>
    %703 = arith.addf %702, %701 : vector<2x32xf32>
    %704 = arith.divf %702, %703 : vector<2x32xf32>
    %705 = vector.extract_strided_slice %686 {offsets = [1, 0, 0], sizes = [1, 2, 32], strides = [1, 1, 1]} : vector<3x2x32xf32> to vector<1x2x32xf32>
    %706 = vector.shape_cast %705 : vector<1x2x32xf32> to vector<2x32xf32>
    %707 = arith.addf %706, %693 : vector<2x32xf32>
    %708 = arith.negf %707 : vector<2x32xf32>
    %709 = math.exp %708 : vector<2x32xf32>
    %cst_187 = arith.constant 1.000000e+00 : f32
    %710 = vector.broadcast %cst_187 : f32 to vector<2x32xf32>
    %711 = arith.addf %710, %709 : vector<2x32xf32>
    %712 = arith.divf %710, %711 : vector<2x32xf32>
    %713 = vector.extract_strided_slice %686 {offsets = [2, 0, 0], sizes = [1, 2, 32], strides = [1, 1, 1]} : vector<3x2x32xf32> to vector<1x2x32xf32>
    %714 = vector.shape_cast %713 : vector<1x2x32xf32> to vector<2x32xf32>
    %715 = vector.broadcast %3 : vector<1x32xf32> to vector<2x32xf32>
    %716 = arith.addf %696, %715 : vector<2x32xf32>
    %717 = arith.mulf %704, %716 : vector<2x32xf32>
    %718 = arith.addf %714, %717 : vector<2x32xf32>
    %719 = math.tanh %718 : vector<2x32xf32>
    %cst_188 = arith.constant 1.000000e+00 : f32
    %720 = vector.broadcast %cst_188 : f32 to vector<2x32xf32>
    %721 = arith.subf %720, %712 : vector<2x32xf32>
    %722 = arith.mulf %721, %719 : vector<2x32xf32>
    %723 = arith.mulf %712, %633 : vector<2x32xf32>
    %724 = arith.addf %722, %723 : vector<2x32xf32>
    %725 = arith.index_cast %c7_i32_169 : i32 to index
    %c0_189 = arith.constant 0 : index
    %c0_190 = arith.constant 0 : index
    %726 = vector.load %arg7[%725, %c0_189, %c0_190] : memref<8x2x32xf32, #tpu.memory_space<vmem>>, vector<1x2x32xf32>
    %727 = vector.shape_cast %726 : vector<1x2x32xf32> to vector<2x32xf32>
    %728 = vector.shape_cast %683 : vector<2x32xf32> to vector<1x2x32xf32>
    tpu.vector_store %arg7[%725, %c0_189, %c0_190], %728 {strides = array<i32>} : memref<8x2x32xf32, #tpu.memory_space<vmem>>, vector<1x2x32xf32>,
    %729 = arith.index_cast %642 : i32 to index
    %c0_191 = arith.constant 0 : index
    %c0_192 = arith.constant 0 : index
    %730 = vector.load %arg8[%729, %c0_191, %c0_192] : memref<8x2x32xf32, #tpu.memory_space<vmem>>, vector<1x2x32xf32>
    %731 = vector.shape_cast %730 : vector<1x2x32xf32> to vector<2x32xf32>
    %732 = vector.shape_cast %724 : vector<2x32xf32> to vector<1x2x32xf32>
    tpu.vector_store %arg8[%729, %c0_191, %c0_192], %732 {strides = array<i32>} : memref<8x2x32xf32, #tpu.memory_space<vmem>>, vector<1x2x32xf32>,
    %c8_i32 = arith.constant 8 : i32
    return
  }
  func.func @transform_0(%arg0: i32) -> (i32, i32, i32, i32) {
    %c0_i32 = arith.constant 0 : i32
    %c0_i32_0 = arith.constant 0 : i32
    %c0_i32_1 = arith.constant 0 : i32
    %c0_i32_2 = arith.constant 0 : i32
    %c0_i32_3 = arith.constant 0 : i32
    return %c0_i32, %c0_i32_0, %c0_i32_1, %c0_i32_2 : i32, i32, i32, i32
  }
  func.func @transform_1(%arg0: i32) -> (i32, i32, i32, i32) {
    %c0_i32 = arith.constant 0 : i32
    %c0_i32_0 = arith.constant 0 : i32
    %c0_i32_1 = arith.constant 0 : i32
    %c0_i32_2 = arith.constant 0 : i32
    %c0_i32_3 = arith.constant 0 : i32
    return %c0_i32, %c0_i32_0, %c0_i32_1, %c0_i32_2 : i32, i32, i32, i32
  }
  func.func @transform_2(%arg0: i32) -> (i32, i32, i32) {
    %c0_i32 = arith.constant 0 : i32
    %c0_i32_0 = arith.constant 0 : i32
    %c0_i32_1 = arith.constant 0 : i32
    %c0_i32_2 = arith.constant 0 : i32
    return %c0_i32, %c0_i32_0, %c0_i32_1 : i32, i32, i32
  }
  func.func @transform_3(%arg0: i32) -> (i32, i32, i32) {
    %c0_i32 = arith.constant 0 : i32
    %c0_i32_0 = arith.constant 0 : i32
    %c0_i32_1 = arith.constant 0 : i32
    %c0_i32_2 = arith.constant 0 : i32
    return %c0_i32, %c0_i32_0, %c0_i32_1 : i32, i32, i32
  }
  func.func @transform_4(%arg0: i32) -> (i32, i32) {
    %c0_i32 = arith.constant 0 : i32
    %c0_i32_0 = arith.constant 0 : i32
    %c0_i32_1 = arith.constant 0 : i32
    return %c0_i32, %c0_i32_0 : i32, i32
  }
  func.func @transform_5(%arg0: i32) -> (i32, i32) {
    %c0_i32 = arith.constant 0 : i32
    %c0_i32_0 = arith.constant 0 : i32
    %c0_i32_1 = arith.constant 0 : i32
    return %c0_i32, %c0_i32_0 : i32, i32
  }
  func.func @transform_6(%arg0: i32) -> (i32, i32, i32) {
    %c0_i32 = arith.constant 0 : i32
    %c0_i32_0 = arith.constant 0 : i32
    %c0_i32_1 = arith.constant 0 : i32
    %c0_i32_2 = arith.constant 0 : i32
    return %c0_i32, %c0_i32_0, %c0_i32_1 : i32, i32, i32
  }
  func.func @transform_7(%arg0: i32) -> (i32, i32, i32) {
    %c0_i32 = arith.constant 0 : i32
    %c0_i32_0 = arith.constant 0 : i32
    %c0_i32_1 = arith.constant 0 : i32
    %c0_i32_2 = arith.constant 0 : i32
    return %c0_i32, %c0_i32_0, %c0_i32_1 : i32, i32, i32
  }
}

</mosaic_0001>

<bundles_post_ra>
// kernel: encoder_rnn_forward.3
= control target key start
LH: loop header
LB: loop body
LE: loop exit
PB: predicated region body
PF: predicated region fallthrough
CT: control target
= control target key end

     0   :  { %v3414_v0 = vmov 0.0   ;;  %vm3415_vm0 = vmmov 0   ;;  %v3416_v7 = vmov 0   ;;  %vm429_vm1 = vcmask 254976   ;;  %s4235_s2 = inlined_call_operand.vmem [shape: bf16[3,32,32], index: 2, kind: input, shape index: {}]   ;;  %s4236_s3 = inlined_call_operand.vmem [shape: bf16[3,32,32], index: 3, kind: input, shape index: {}]   ;;  %s4237_s0 = inlined_call_operand.vmem [shape: f32[8,3,2,32], index: 0, kind: input, shape index: {}]   ;;  %s4238_s1 = inlined_call_operand.vmem [shape: f32[8,3,2,32], index: 1, kind: input, shape index: {}]   ;;  %s4239_s4 = inlined_call_operand.vmem [shape: f32[1,32], index: 4, kind: input, shape index: {}]   ;;  %s4240_s5 = inlined_call_operand.vmem [shape: f32[1,32], index: 5, kind: input, shape index: {}]   ;;  %s4241_s6 = inlined_call_operand.vmem [shape: f32[8,2,32], index: 6, kind: output, shape index: {0}]   ;;  %s4242_s7 = inlined_call_operand.vmem [shape: f32[8,2,32], index: 7, kind: output, shape index: {1}]  }
   0x1   :  { %2841 = vmatprep.subr.bf16.mxu0 %v3414_v0  ;;  %2849 = vmatprep.subr.bf16.mxu1 %v3414_v0  ;;  %v3462_v1 = vld [vmem:[%s4235_s2 + $0x8] sm:$0xff]   ;;  %v3467_v2 = vld [vmem:[%s4235_s2 + $0x18] sm:$0xff]   ;;  %v3477_v3 = vld [vmem:[%s4235_s2] sm:$0xff]   ;;  %vm67_vm2 = vcmask 261120  }
   0x2   :  { %2845 = vmatprep.mubr.msk.bf16.mxu0 %vm3415_vm0, %v3414_v0  ;;  %2853 = vmatprep.mubr.msk.bf16.mxu1 %vm3415_vm0, %v3414_v0  ;;  %v3484_v4 = vld [vmem:[%s4235_s2 + $0x10] sm:$0xff]   ;;  %v3491_v5 = vld [vmem:[%s4235_s2 + $0x28] sm:$0xff]   ;;  %v3505_v8 = vld [vmem:[%s4235_s2 + $0x20] sm:$0xff]  }
   0x3   :  { %2842 = vmatpush3.bf16.msra.mxu0 %v3462_v1  ;;  %2850 = vmatpush3.bf16.msra.mxu1 %v3467_v2  ;;  %v3497_v6 = vld [vmem:[%s4236_s3 + $0x8] sm:$0xff]   ;;  %v3511_v9 = vld [vmem:[%s4236_s3] sm:$0xff]   ;;  %v3523_v10 = vld [vmem:[%s4236_s3 + $0x18] sm:$0xff]  }
   0x4   :  { %2843 = vmatprep.subr.bf16.mxu0 %v3414_v0  ;;  %2851 = vmatprep.subr.bf16.mxu1 %v3414_v0  ;;  %v3531_v11 = vld [vmem:[%s4236_s3 + $0x28] sm:$0xff]   ;;  %v3537_v12 = vld [vmem:[%s4236_s3 + $0x10] sm:$0xff]   ;;  %v3546_v13 = vld [vmem:[%s4236_s3 + $0x20] sm:$0xff]  }
   0x5   :  { %v52_v14 = vld [vmem:[%s4237_s0] sm:$0x3]  ;;  %v53_v21 = vld [vmem:[%s4237_s0 + $0x2] sm:$0x3]  ;;  %v2562_v27 = vld [vmem:[%s4238_s1 + $0x2a] sm:$0x3] }
   0x6   :  { %v2563_v38 = vld [vmem:[%s4238_s1 + $0x2c] sm:$0x3]  ;;  %v3582_v55 = vld [vmem:[%s4239_s4] ss:$0 sm:$0xff]  ;;  %v54_v59 = vld [vmem:[%s4237_s0 + $0x4] sm:$0x3] }
   0x7   :  { %2844 = vmatpush3.bf16.msra.mxu0 %v3477_v3  ;;  %2852 = vmatpush3.bf16.msra.mxu1 %v3484_v4  ;;  %v3591_v63 = vld [vmem:[%s4240_s5] ss:$0 sm:$0xff] }
   0x8   :  { %2857 = vmatprep.subr.bf16.mxu0 %v3414_v0  ;;  %2865 = vmatprep.subr.bf16.mxu1 %v3414_v0 }
   0xa   :  { %2846 = vmatmul.mubr.bf16.vlgmr.msra.gmra.mxu0 %v3416_v7  ;;  %2854 = vmatmul.mubr.bf16.vlgmr.msra.gmra.mxu1 %v3416_v7 }
   0xb   :  { %2858 = vmatpush3.bf16.msra.mxu0 %v3491_v5  ;;  %2866 = vmatpush3.bf16.msra.mxu1 %v3497_v6 }
   0xc   :  { %2859 = vmatprep.subr.bf16.mxu0 %v3414_v0  ;;  %2867 = vmatprep.subr.bf16.mxu1 %v3414_v0 }
   0xd   :  { %2869 = vmatprep.mubr.msk.bf16.mxu1 %vm3415_vm0, %v3414_v0  ;;  %2861 = vmatprep.mubr.msk.bf16.mxu0 %vm3415_vm0, %v3414_v0 }
   0xf   :  { %2860 = vmatpush3.bf16.msra.mxu0 %v3505_v8  ;;  %2868 = vmatpush3.bf16.msra.mxu1 %v3511_v9 }
  0x10   :  { %2873 = vmatprep.subr.bf16.mxu0 %v3414_v0  ;;  %2881 = vmatprep.subr.bf16.mxu1 %v3414_v0 }
  0x12   :  { %2862 = vmatmul.mubr.bf16.vlgmr.msra.gmra.mxu0 %v3416_v7  ;;  %2870 = vmatmul.mubr.bf16.vlgmr.msra.gmra.mxu1 %v3416_v7 }
  0x13   :  { %2874 = vmatpush3.bf16.msra.mxu0 %v3523_v10  ;;  %2877 = vmatprep.mubr.msk.bf16.mxu0 %vm3415_vm0, %v3414_v0 }
  0x14   :  { %2875 = vmatprep.subr.bf16.mxu0 %v3414_v0  ;;  %2882 = vmatpush3.bf16.msra.mxu1 %v3531_v11 }
  0x15   :  { %2885 = vmatprep.mubr.msk.bf16.mxu1 %vm3415_vm0, %v3414_v0  ;;  %2883 = vmatprep.subr.bf16.mxu1 %v3414_v0 }
  0x17   :  { %2876 = vmatpush3.bf16.msra.mxu0 %v3537_v12 }
  0x18   :  { %2889 = vmatprep.subr.bf16.mxu0 %v3414_v0  ;;  %2884 = vmatpush3.bf16.msra.mxu1 %v3546_v13 }
  0x19   :  { %2897 = vmatprep.subr.bf16.mxu1 %v3414_v0 }
  0x1a   :  { %2878 = vmatmul.mubr.bf16.vlgmr.msra.gmra.mxu0 %v3416_v7 }
  0x1b   :  { %2890 = vmatpush3.bf16.msra.mxu0 %v3462_v1  ;;  %2893 = vmatprep.mubr.msk.bf16.mxu0 %vm3415_vm0, %v3414_v0 }
  0x1c   :  { %2886 = vmatmul.mubr.bf16.vlgmr.msra.gmra.mxu1 %v3416_v7  ;;  %2891 = vmatprep.subr.bf16.mxu0 %v3414_v0 }
  0x1d   :  { %2898 = vmatpush3.bf16.msra.mxu1 %v3467_v2  ;;  %2901 = vmatprep.mubr.msk.bf16.mxu1 %vm3415_vm0, %v3414_v0 }
  0x1e   :  { %2899 = vmatprep.subr.bf16.mxu1 %v3414_v0 }
  0x1f   :  { %2892 = vmatpush3.bf16.msra.mxu0 %v3477_v3 }
  0x20   :  { %2905 = vmatprep.subr.bf16.mxu0 %v3414_v0 }
  0x21   :  { %2900 = vmatpush3.bf16.msra.mxu1 %v3484_v4 }
  0x22   :  { %2913 = vmatprep.subr.bf16.mxu1 %v3414_v0 }
  0xca   :  { %v105_v15 = vpop.f32.mrf.mxu0  ;;  %v157_v17 = vpop.f32.mrf.mxu1 }
  0xcb   :  { %v163_v16 = vadd.f32 %v105_v15, %v52_v14  ;;  %v170_v25 = vadd.f32 %v157_v17, %v53_v21 }
  0xcc   :  { %v2847_v18 = vpop.f32.mrf.mxu0  ;;  %v2855_v20 = vpop.f32.mrf.mxu1 }
  0xcd   :  { %v2557_v19 = vmul.f32 -1.442695, %v163_v16  ;;  %v2558_v32 = vmul.f32 -1.442695, %v170_v25  ;;  %v2564_v16 = vld [vmem:[%s4238_s1 + $0x2e] sm:$0x3] }
  0xce   :  { %v108_v22 = vpop.f32.mrf.mxu0  ;;  %v160_v23 = vpop.f32.mrf.mxu1 }
  0xcf   :  { %3240 = vpow2.f32 %v2557_v19 }
  0xd0   :  { %v2848_v24 = vpop.f32.mrf.mxu0  ;;  %v2856_v26 = vpop.f32.mrf.mxu1 }
  0xd2   :  { %v229_v28 = vpop.f32.mrf.mxu0  ;;  %v292_v29 = vpop.f32.mrf.mxu1 }
  0xd3   :  { %v350_v30 = vadd.f32 %v2562_v27, %v292_v29  ;;  %v230_v57 = vadd.f32 %v3582_v55, %v229_v28 }
  0xd4   :  { %v2863_v31 = vpop.f32.mrf.mxu0  ;;  %v2871_v33 = vpop.f32.mrf.mxu1 }
  0xd5   :  { %v2569_v34 = vmul.f32 -1.442695, %v350_v30  ;;  %v2575_v33 = vld [vmem:[%s4237_s0 + $0x6] sm:$0x3] }
  0xd6   :  { %v232_v35 = vpop.f32.mrf.mxu0  ;;  %v295_v36 = vpop.f32.mrf.mxu1 }
  0xd7   :  { %3242 = vpow2.f32 %v2569_v34 }
  0xd8   :  { %v2864_v37 = vpop.f32.mrf.mxu0  ;;  %3244 = vpow2.f32 %v2558_v32  ;;  %v2872_v39 = vpop.f32.mrf.mxu1 }
  0xda   :  { %v344_v40 = vpop.f32.mrf.mxu0 }
  0xdb   :  { %v357_v41 = vadd.f32 %v2563_v38, %v344_v40  ;;  %v2576_v40 = vld [vmem:[%s4237_s0 + $0x8] sm:$0x3] }
  0xdc   :  { %v3241_v42 = vpop.eup %3240  ;;  %v2879_v43 = vpop.f32.mrf.mxu0 }
  0xdd   :  { %v416_v44 = vpop.f32.mrf.mxu1  ;;  %v167_v45 = vadd.f32 1.0, %v3241_v42  ;;  %v2570_v46 = vmul.f32 -1.442695, %v357_v41 }
  0xde   :  { %v347_v47 = vpop.f32.mrf.mxu0  ;;  %v417_v14 = vadd.f32 %v3591_v63, %v416_v44 }
  0xdf   :  { %v2887_v48 = vpop.f32.mrf.mxu1  ;;  %3246 = vrcp.f32 %v167_v45 }
  0xe0   :  { %v2880_v49 = vpop.f32.mrf.mxu0  ;;  %3248 = vpow2.f32 %v2570_v46  ;;  %v2583_v46 = vld [vmem:[%s4238_s1 + $0x24] sm:$0x3] }
  0xe1   :  { %v419_v50 = vpop.f32.mrf.mxu1 }
  0xe3   :  { %v2888_v51 = vpop.f32.mrf.mxu1 }
  0xe4   :  { %v3243_v52 = vpop.eup %3242 }
  0xe5   :  { %v3245_v53 = vpop.eup %3244  ;;  %v354_v54 = vadd.f32 1.0, %v3243_v52 }
  0xe6   :  { %v174_v56 = vadd.f32 1.0, %v3245_v53 }
  0xe7   :  { %3250 = vrcp.f32 %v354_v54 }
  0xe8   :  { %3252 = vrcp.f32 %v174_v56 }
  0xec   :  { %v3247_v58 = vpop.eup %3246 }
  0xed   :  { %v235_v60 = vmul.f32 %v3247_v58, %v230_v57  ;;  %v3249_v61 = vpop.eup %3248  ;;  %v2584_v58 = vld [vmem:[%s4238_s1 + $0x26] sm:$0x3] }
  0xee   :  { %v361_v7 = vadd.f32 1.0, %v3249_v61 }
  0xef   :  { %v236_v62 = vadd.f32 %v235_v60, %v54_v59 }
  0xf1   :  { %3254 = vtanh.f32 %v236_v62 }
  0xf2   :  { %3256 = vrcp.f32 %v361_v7 }
  0xf4   :  { %v3251_v15 = vpop.eup %3250 }
  0xf5   :  { %v422_v17 = vmul.f32 %v3251_v15, %v417_v14  ;;  %v3253_v19 = vpop.eup %3252 }
  0xf6   :  { %v238_v20 = vsub.f32 1.0, %v3253_v19  ;;  %v240_v23 = vmul.f32 0.0, %v3253_v19 }
  0xf7   :  { %v423_v18 = vadd.f32 %v2564_v16, %v422_v17 }
  0xf9   :  { %3258 = vtanh.f32 %v423_v18 }
  0xfe   :  { %v3255_v21 = vpop.eup %3254 }
  0xff   :  { %v239_v22 = vmul.f32 %v3255_v21, %v238_v20  ;;  %v3257_v24 = vpop.eup %3256 }
 0x100   :  { %v425_v27 = vsub.f32 1.0, %v3257_v24  ;;  %v427_v30 = vmul.f32 0.0, %v3257_v24 }
 0x101   :  { %v3597_v25 = vadd.f32 %v240_v23, %v239_v22 }
 0x103   :  { %430 = vst.msk [vmem:[%s4241_s6] sm:$0x3] %vm429_vm1, %v3597_v25  ;;  %v437_v26 = vpack.c.bf16 %v3597_v25, %v3597_v25 }
 0x105   :  { %2894 = vmatmul.mubr.msk.bf16.vlgmr.msra.gmra.mxu0 %vm67_vm2, %v437_v26  ;;  %2902 = vmatmul.mubr.msk.bf16.vlgmr.msra.gmra.mxu1 %vm67_vm2, %v437_v26 }
 0x106   :  { %2906 = vmatpush3.bf16.msra.mxu0 %v3491_v5  ;;  %2914 = vmatpush3.bf16.msra.mxu1 %v3497_v6  ;;  %v3259_v28 = vpop.eup %3258 }
 0x107   :  { %2907 = vmatprep.subr.bf16.mxu0 %v3414_v0  ;;  %2915 = vmatprep.subr.bf16.mxu1 %v3414_v0  ;;  %v426_v29 = vmul.f32 %v3259_v28, %v425_v27 }
 0x108   :  { %2909 = vmatprep.mubr.msk.bf16.mxu0 %vm3415_vm0, %v3414_v0  ;;  %2917 = vmatprep.mubr.msk.bf16.mxu1 %vm3415_vm0, %v3414_v0 }
 0x109   :  { %v3618_v31 = vadd.f32 %v427_v30, %v426_v29  ;;  %v2577_v29 = vld [vmem:[%s4237_s0 + $0xa] sm:$0x3] }
 0x10a   :  { %2908 = vmatpush3.bf16.msra.mxu0 %v3505_v8  ;;  %2916 = vmatpush3.bf16.msra.mxu1 %v3511_v9 }
 0x10b   :  { %2921 = vmatprep.subr.bf16.mxu0 %v3414_v0  ;;  %2929 = vmatprep.subr.bf16.mxu1 %v3414_v0  ;;  %2574 = vst.msk [vmem:[%s4242_s7 + $0xe] sm:$0x3] %vm429_vm1, %v3618_v31  ;;  %v586_v32 = vpack.c.bf16 %v3618_v31, %v3618_v31 }
 0x10d   :  { %2910 = vmatmul.mubr.msk.bf16.vlgmr.msra.gmra.mxu0 %vm67_vm2, %v437_v26  ;;  %2918 = vmatmul.mubr.msk.bf16.vlgmr.msra.gmra.mxu1 %vm67_vm2, %v586_v32 }
 0x10e   :  { %2922 = vmatpush3.bf16.msra.mxu0 %v3523_v10  ;;  %2930 = vmatpush3.bf16.msra.mxu1 %v3531_v11 }
 0x10f   :  { %2923 = vmatprep.subr.bf16.mxu0 %v3414_v0  ;;  %2931 = vmatprep.subr.bf16.mxu1 %v3414_v0 }
 0x110   :  { %2925 = vmatprep.mubr.msk.bf16.mxu0 %vm3415_vm0, %v3414_v0  ;;  %2933 = vmatprep.mubr.msk.bf16.mxu1 %vm3415_vm0, %v3414_v0 }
 0x112   :  { %2924 = vmatpush3.bf16.msra.mxu0 %v3537_v12  ;;  %2932 = vmatpush3.bf16.msra.mxu1 %v3546_v13 }
 0x113   :  { %2937 = vmatprep.subr.bf16.mxu0 %v3414_v0  ;;  %2945 = vmatprep.subr.bf16.mxu1 %v3414_v0 }
 0x115   :  { %2926 = vmatmul.mubr.msk.bf16.vlgmr.msra.gmra.mxu0 %vm67_vm2, %v586_v32  ;;  %2934 = vmatmul.mubr.msk.bf16.vlgmr.msra.gmra.mxu1 %vm67_vm2, %v586_v32 }
 0x116   :  { %2938 = vmatpush3.bf16.msra.mxu0 %v3462_v1  ;;  %2946 = vmatpush3.bf16.msra.mxu1 %v3467_v2 }
 0x117   :  { %2939 = vmatprep.subr.bf16.mxu0 %v3414_v0  ;;  %2947 = vmatprep.subr.bf16.mxu1 %v3414_v0 }
 0x118   :  { %2941 = vmatprep.mubr.msk.bf16.mxu0 %vm3415_vm0, %v3414_v0  ;;  %2949 = vmatprep.mubr.msk.bf16.mxu1 %vm3415_vm0, %v3414_v0 }
 0x11a   :  { %2940 = vmatpush3.bf16.msra.mxu0 %v3477_v3  ;;  %2948 = vmatpush3.bf16.msra.mxu1 %v3484_v4 }
 0x11b   :  { %2953 = vmatprep.subr.bf16.mxu0 %v3414_v0  ;;  %2961 = vmatprep.subr.bf16.mxu1 %v3414_v0 }
 0x1c5   :  { %v475_v34 = vpop.f32.mrf.mxu0  ;;  %v515_v35 = vpop.f32.mrf.mxu1 }
 0x1c6   :  { %v521_v36 = vadd.f32 %v2575_v33, %v475_v34  ;;  %v528_v45 = vadd.f32 %v2576_v40, %v515_v35 }
 0x1c7   :  { %v2895_v37 = vpop.f32.mrf.mxu0  ;;  %v2903_v38 = vpop.f32.mrf.mxu1 }
 0x1c8   :  { %v2580_v39 = vmul.f32 -1.442695, %v521_v36  ;;  %v2581_v51 = vmul.f32 -1.442695, %v528_v45  ;;  %v2585_v37 = vld [vmem:[%s4238_s1 + $0x28] sm:$0x3] }
 0x1c9   :  { %v478_v41 = vpop.f32.mrf.mxu0  ;;  %v518_v42 = vpop.f32.mrf.mxu1 }
 0x1ca   :  { %3260 = vpow2.f32 %v2580_v39 }
 0x1cb   :  { %v2896_v43 = vpop.f32.mrf.mxu0  ;;  %v2904_v44 = vpop.f32.mrf.mxu1 }
 0x1cd   :  { %v569_v47 = vpop.f32.mrf.mxu0  ;;  %v624_v48 = vpop.f32.mrf.mxu1 }
 0x1ce   :  { %v670_v49 = vadd.f32 %v2583_v46, %v624_v48  ;;  %v570_v27 = vadd.f32 %v3582_v55, %v569_v47 }
 0x1cf   :  { %v2911_v50 = vpop.f32.mrf.mxu0  ;;  %v2919_v52 = vpop.f32.mrf.mxu1 }
 0x1d0   :  { %v2588_v53 = vmul.f32 -1.442695, %v670_v49 }
 0x1d1   :  { %v572_v54 = vpop.f32.mrf.mxu0  ;;  %v627_v56 = vpop.f32.mrf.mxu1 }
 0x1d2   :  { %3262 = vpow2.f32 %v2588_v53 }
 0x1d3   :  { %v2912_v57 = vpop.f32.mrf.mxu0  ;;  %3264 = vpow2.f32 %v2581_v51  ;;  %v2920_v59 = vpop.f32.mrf.mxu1 }
 0x1d5   :  { %v664_v60 = vpop.f32.mrf.mxu0  ;;  %v718_v62 = vpop.f32.mrf.mxu1 }
 0x1d6   :  { %v677_v61 = vadd.f32 %v2584_v58, %v664_v60  ;;  %v719_v35 = vadd.f32 %v3591_v63, %v718_v62  ;;  %v2594_v60 = vld [vmem:[%s4237_s0 + $0xe] sm:$0x3] }
 0x1d7   :  { %v3261_v7 = vpop.eup %3260  ;;  %v2927_v14 = vpop.f32.mrf.mxu0 }
 0x1d8   :  { %v525_v15 = vadd.f32 1.0, %v3261_v7  ;;  %v2935_v16 = vpop.f32.mrf.mxu1  ;;  %v2589_v17 = vmul.f32 -1.442695, %v677_v61 }
 0x1d9   :  { %v667_v18 = vpop.f32.mrf.mxu0  ;;  %v2601_v16 = vld [vmem:[%s4238_s1 + $0x1e] sm:$0x3] }
 0x1da   :  { %3266 = vrcp.f32 %v525_v15  ;;  %v721_v19 = vpop.f32.mrf.mxu1 }
 0x1db   :  { %v2928_v20 = vpop.f32.mrf.mxu0  ;;  %3268 = vpow2.f32 %v2589_v17 }
 0x1dc   :  { %v2936_v21 = vpop.f32.mrf.mxu1 }
 0x1df   :  { %v3263_v22 = vpop.eup %3262 }
 0x1e0   :  { %v3265_v23 = vpop.eup %3264  ;;  %v674_v24 = vadd.f32 1.0, %v3263_v22 }
 0x1e1   :  { %v532_v26 = vadd.f32 1.0, %v3265_v23 }
 0x1e2   :  { %3270 = vrcp.f32 %v674_v24 }
 0x1e3   :  { %3272 = vrcp.f32 %v532_v26 }
 0x1e7   :  { %v3267_v28 = vpop.eup %3266 }
 0x1e8   :  { %v575_v30 = vmul.f32 %v3267_v28, %v570_v27  ;;  %v3269_v32 = vpop.eup %3268  ;;  %v2602_v28 = vld [vmem:[%s4238_s1 + $0x20] sm:$0x3] }
 0x1e9   :  { %v681_v34 = vadd.f32 1.0, %v3269_v32 }
 0x1ea   :  { %v576_v33 = vadd.f32 %v2577_v29, %v575_v30 }
 0x1ec   :  { %3274 = vtanh.f32 %v576_v33 }
 0x1ed   :  { %3276 = vrcp.f32 %v681_v34 }
 0x1ef   :  { %v3271_v36 = vpop.eup %3270 }
 0x1f0   :  { %v724_v38 = vmul.f32 %v3271_v36, %v719_v35  ;;  %v3273_v40 = vpop.eup %3272 }
 0x1f1   :  { %v578_v41 = vsub.f32 1.0, %v3273_v40  ;;  %v580_v44 = vmul.f32 %v3273_v40, %v3597_v25 }
 0x1f2   :  { %v725_v39 = vadd.f32 %v2585_v37, %v724_v38 }
 0x1f4   :  { %3278 = vtanh.f32 %v725_v39 }
 0x1f9   :  { %v3275_v42 = vpop.eup %3274 }
 0x1fa   :  { %v579_v43 = vmul.f32 %v3275_v42, %v578_v41  ;;  %v3277_v46 = vpop.eup %3276 }
 0x1fb   :  { %v727_v48 = vsub.f32 1.0, %v3277_v46  ;;  %v729_v50 = vmul.f32 %v3277_v46, %v3618_v31  ;;  %v2593_v31 = vld [vmem:[%s4237_s0 + $0xc] sm:$0x3] }
 0x1fc   :  { %v3678_v45 = vadd.f32 %v580_v44, %v579_v43 }
 0x1fe   :  { %2591 = vst.msk [vmem:[%s4241_s6 + $0x2] sm:$0x3] %vm429_vm1, %v3678_v45  ;;  %v739_v47 = vpack.c.bf16 %v3678_v45, %v3678_v45 }
 0x200   :  { %2942 = vmatmul.mubr.msk.bf16.vlgmr.msra.gmra.mxu0 %vm67_vm2, %v739_v47  ;;  %2950 = vmatmul.mubr.msk.bf16.vlgmr.msra.gmra.mxu1 %vm67_vm2, %v739_v47 }
 0x201   :  { %2954 = vmatpush3.bf16.msra.mxu0 %v3491_v5  ;;  %2962 = vmatpush3.bf16.msra.mxu1 %v3497_v6  ;;  %v3279_v25 = vpop.eup %3278 }
 0x202   :  { %2955 = vmatprep.subr.bf16.mxu0 %v3414_v0  ;;  %2963 = vmatprep.subr.bf16.mxu1 %v3414_v0  ;;  %v728_v49 = vmul.f32 %v3279_v25, %v727_v48 }
 0x203   :  { %2957 = vmatprep.mubr.msk.bf16.mxu0 %vm3415_vm0, %v3414_v0  ;;  %2965 = vmatprep.mubr.msk.bf16.mxu1 %vm3415_vm0, %v3414_v0 }
 0x204   :  { %v3700_v51 = vadd.f32 %v729_v50, %v728_v49  ;;  %v2595_v49 = vld [vmem:[%s4237_s0 + $0x10] sm:$0x3] }
 0x205   :  { %2956 = vmatpush3.bf16.msra.mxu0 %v3505_v8  ;;  %2964 = vmatpush3.bf16.msra.mxu1 %v3511_v9 }
 0x206   :  { %2969 = vmatprep.subr.bf16.mxu0 %v3414_v0  ;;  %2977 = vmatprep.subr.bf16.mxu1 %v3414_v0  ;;  %2592 = vst.msk [vmem:[%s4242_s7 + $0xc] sm:$0x3] %vm429_vm1, %v3700_v51  ;;  %v888_v52 = vpack.c.bf16 %v3700_v51, %v3700_v51 }
 0x208   :  { %2958 = vmatmul.mubr.msk.bf16.vlgmr.msra.gmra.mxu0 %vm67_vm2, %v739_v47  ;;  %2966 = vmatmul.mubr.msk.bf16.vlgmr.msra.gmra.mxu1 %vm67_vm2, %v888_v52 }
 0x209   :  { %2970 = vmatpush3.bf16.msra.mxu0 %v3523_v10  ;;  %2978 = vmatpush3.bf16.msra.mxu1 %v3531_v11 }
 0x20a   :  { %2971 = vmatprep.subr.bf16.mxu0 %v3414_v0  ;;  %2979 = vmatprep.subr.bf16.mxu1 %v3414_v0 }
 0x20b   :  { %2973 = vmatprep.mubr.msk.bf16.mxu0 %vm3415_vm0, %v3414_v0  ;;  %2981 = vmatprep.mubr.msk.bf16.mxu1 %vm3415_vm0, %v3414_v0 }
 0x20d   :  { %2972 = vmatpush3.bf16.msra.mxu0 %v3537_v12  ;;  %2980 = vmatpush3.bf16.msra.mxu1 %v3546_v13 }
 0x20e   :  { %2985 = vmatprep.subr.bf16.mxu0 %v3414_v0  ;;  %2993 = vmatprep.subr.bf16.mxu1 %v3414_v0 }
 0x210   :  { %2974 = vmatmul.mubr.msk.bf16.vlgmr.msra.gmra.mxu0 %vm67_vm2, %v888_v52  ;;  %2982 = vmatmul.mubr.msk.bf16.vlgmr.msra.gmra.mxu1 %vm67_vm2, %v888_v52 }
 0x211   :  { %2986 = vmatpush3.bf16.msra.mxu0 %v3462_v1  ;;  %2994 = vmatpush3.bf16.msra.mxu1 %v3467_v2 }
 0x212   :  { %2987 = vmatprep.subr.bf16.mxu0 %v3414_v0  ;;  %2995 = vmatprep.subr.bf16.mxu1 %v3414_v0 }
 0x213   :  { %2989 = vmatprep.mubr.msk.bf16.mxu0 %vm3415_vm0, %v3414_v0  ;;  %2997 = vmatprep.mubr.msk.bf16.mxu1 %vm3415_vm0, %v3414_v0 }
 0x215   :  { %2988 = vmatpush3.bf16.msra.mxu0 %v3477_v3  ;;  %2996 = vmatpush3.bf16.msra.mxu1 %v3484_v4 }
 0x216   :  { %3001 = vmatprep.subr.bf16.mxu0 %v3414_v0  ;;  %3009 = vmatprep.subr.bf16.mxu1 %v3414_v0 }
 0x2c0   :  { %v777_v53 = vpop.f32.mrf.mxu0  ;;  %v817_v54 = vpop.f32.mrf.mxu1 }
 0x2c1   :  { %v823_v56 = vadd.f32 %v2593_v31, %v777_v53  ;;  %v830_v15 = vadd.f32 %v2594_v60, %v817_v54 }
 0x2c2   :  { %v2943_v57 = vpop.f32.mrf.mxu0  ;;  %v2951_v58 = vpop.f32.mrf.mxu1 }
 0x2c3   :  { %v2598_v59 = vmul.f32 -1.442695, %v823_v56  ;;  %v2599_v21 = vmul.f32 -1.442695, %v830_v15  ;;  %v2603_v57 = vld [vmem:[%s4238_s1 + $0x22] sm:$0x3] }
 0x2c4   :  { %v780_v61 = vpop.f32.mrf.mxu0  ;;  %v820_v62 = vpop.f32.mrf.mxu1 }
 0x2c5   :  { %3280 = vpow2.f32 %v2598_v59 }
 0x2c6   :  { %v2944_v7 = vpop.f32.mrf.mxu0  ;;  %v2952_v14 = vpop.f32.mrf.mxu1 }
 0x2c8   :  { %v871_v17 = vpop.f32.mrf.mxu0  ;;  %v926_v18 = vpop.f32.mrf.mxu1 }
 0x2c9   :  { %v972_v19 = vadd.f32 %v2601_v16, %v926_v18  ;;  %v872_v48 = vadd.f32 %v3582_v55, %v871_v17 }
 0x2ca   :  { %v2959_v20 = vpop.f32.mrf.mxu0  ;;  %v2967_v22 = vpop.f32.mrf.mxu1 }
 0x2cb   :  { %v2606_v23 = vmul.f32 -1.442695, %v972_v19 }
 0x2cc   :  { %v874_v24 = vpop.f32.mrf.mxu0  ;;  %v929_v26 = vpop.f32.mrf.mxu1 }
 0x2cd   :  { %3282 = vpow2.f32 %v2606_v23 }
 0x2ce   :  { %v2960_v27 = vpop.f32.mrf.mxu0  ;;  %3284 = vpow2.f32 %v2599_v21  ;;  %v2968_v29 = vpop.f32.mrf.mxu1 }
 0x2d0   :  { %v966_v30 = vpop.f32.mrf.mxu0  ;;  %v1020_v33 = vpop.f32.mrf.mxu1 }
 0x2d1   :  { %v979_v32 = vadd.f32 %v2602_v28, %v966_v30  ;;  %v1021_v54 = vadd.f32 %v3591_v63, %v1020_v33  ;;  %v2619_v33 = vld [vmem:[%s4238_s1 + $0x18] sm:$0x3] }
 0x2d2   :  { %v3281_v34 = vpop.eup %3280  ;;  %v2975_v35 = vpop.f32.mrf.mxu0 }
 0x2d3   :  { %v827_v36 = vadd.f32 1.0, %v3281_v34  ;;  %v2983_v37 = vpop.f32.mrf.mxu1  ;;  %v2607_v38 = vmul.f32 -1.442695, %v979_v32 }
 0x2d4   :  { %v969_v39 = vpop.f32.mrf.mxu0 }
 0x2d5   :  { %3286 = vrcp.f32 %v827_v36  ;;  %v1023_v40 = vpop.f32.mrf.mxu1 }
 0x2d6   :  { %v2976_v41 = vpop.f32.mrf.mxu0  ;;  %3288 = vpow2.f32 %v2607_v38 }
 0x2d7   :  { %v2984_v42 = vpop.f32.mrf.mxu1 }
 0x2da   :  { %v3283_v43 = vpop.eup %3282 }
 0x2db   :  { %v3285_v44 = vpop.eup %3284  ;;  %v976_v46 = vadd.f32 1.0, %v3283_v43 }
 0x2dc   :  { %v834_v47 = vadd.f32 1.0, %v3285_v44  ;;  %v2620_v44 = vld [vmem:[%s4238_s1 + $0x1a] sm:$0x3] }
 0x2dd   :  { %3290 = vrcp.f32 %v976_v46 }
 0x2de   :  { %3292 = vrcp.f32 %v834_v47 }
 0x2e2   :  { %v3287_v25 = vpop.eup %3286 }
 0x2e3   :  { %v877_v50 = vmul.f32 %v3287_v25, %v872_v48  ;;  %v3289_v52 = vpop.eup %3288 }
 0x2e4   :  { %v983_v53 = vadd.f32 1.0, %v3289_v52 }
 0x2e5   :  { %v878_v31 = vadd.f32 %v2595_v49, %v877_v50 }
 0x2e7   :  { %3294 = vtanh.f32 %v878_v31 }
 0x2e8   :  { %3296 = vrcp.f32 %v983_v53 }
 0x2ea   :  { %v3291_v56 = vpop.eup %3290 }
 0x2eb   :  { %v1026_v58 = vmul.f32 %v3291_v56, %v1021_v54  ;;  %v3293_v60 = vpop.eup %3292 }
 0x2ec   :  { %v880_v61 = vsub.f32 1.0, %v3293_v60  ;;  %v882_v14 = vmul.f32 %v3293_v60, %v3678_v45 }
 0x2ed   :  { %v1027_v59 = vadd.f32 %v2603_v57, %v1026_v58 }
 0x2ef   :  { %3298 = vtanh.f32 %v1027_v59 }
 0x2f4   :  { %v3295_v62 = vpop.eup %3294 }
 0x2f5   :  { %v881_v7 = vmul.f32 %v3295_v62, %v880_v61  ;;  %v3297_v16 = vpop.eup %3296 }
 0x2f6   :  { %v1029_v18 = vsub.f32 1.0, %v3297_v16  ;;  %v1031_v20 = vmul.f32 %v3297_v16, %v3700_v51  ;;  %v2613_v16 = vld [vmem:[%s4237_s0 + $0x16] sm:$0x3] }
 0x2f7   :  { %v3760_v15 = vadd.f32 %v882_v14, %v881_v7 }
 0x2f9   :  { %2609 = vst.msk [vmem:[%s4241_s6 + $0x4] sm:$0x3] %vm429_vm1, %v3760_v15  ;;  %v1041_v17 = vpack.c.bf16 %v3760_v15, %v3760_v15 }
 0x2fb   :  { %2990 = vmatmul.mubr.msk.bf16.vlgmr.msra.gmra.mxu0 %vm67_vm2, %v1041_v17  ;;  %2998 = vmatmul.mubr.msk.bf16.vlgmr.msra.gmra.mxu1 %vm67_vm2, %v1041_v17 }
 0x2fc   :  { %3002 = vmatpush3.bf16.msra.mxu0 %v3491_v5  ;;  %3010 = vmatpush3.bf16.msra.mxu1 %v3497_v6  ;;  %v3299_v45 = vpop.eup %3298 }
 0x2fd   :  { %3003 = vmatprep.subr.bf16.mxu0 %v3414_v0  ;;  %3011 = vmatprep.subr.bf16.mxu1 %v3414_v0  ;;  %v1030_v19 = vmul.f32 %v3299_v45, %v1029_v18 }
 0x2fe   :  { %3005 = vmatprep.mubr.msk.bf16.mxu0 %vm3415_vm0, %v3414_v0  ;;  %3013 = vmatprep.mubr.msk.bf16.mxu1 %vm3415_vm0, %v3414_v0 }
 0x2ff   :  { %v3782_v21 = vadd.f32 %v1031_v20, %v1030_v19 }
 0x300   :  { %3004 = vmatpush3.bf16.msra.mxu0 %v3505_v8  ;;  %3012 = vmatpush3.bf16.msra.mxu1 %v3511_v9 }
 0x301   :  { %3017 = vmatprep.subr.bf16.mxu0 %v3414_v0  ;;  %3025 = vmatprep.subr.bf16.mxu1 %v3414_v0  ;;  %2610 = vst.msk [vmem:[%s4242_s7 + $0xa] sm:$0x3] %vm429_vm1, %v3782_v21  ;;  %v1190_v22 = vpack.c.bf16 %v3782_v21, %v3782_v21 }
 0x303   :  { %3006 = vmatmul.mubr.msk.bf16.vlgmr.msra.gmra.mxu0 %vm67_vm2, %v1041_v17  ;;  %3014 = vmatmul.mubr.msk.bf16.vlgmr.msra.gmra.mxu1 %vm67_vm2, %v1190_v22 }
 0x304   :  { %3018 = vmatpush3.bf16.msra.mxu0 %v3523_v10  ;;  %3026 = vmatpush3.bf16.msra.mxu1 %v3531_v11 }
 0x305   :  { %3019 = vmatprep.subr.bf16.mxu0 %v3414_v0  ;;  %3027 = vmatprep.subr.bf16.mxu1 %v3414_v0 }
 0x306   :  { %3021 = vmatprep.mubr.msk.bf16.mxu0 %vm3415_vm0, %v3414_v0  ;;  %3029 = vmatprep.mubr.msk.bf16.mxu1 %vm3415_vm0, %v3414_v0 }
 0x308   :  { %3020 = vmatpush3.bf16.msra.mxu0 %v3537_v12  ;;  %3028 = vmatpush3.bf16.msra.mxu1 %v3546_v13 }
 0x309   :  { %3033 = vmatprep.subr.bf16.mxu0 %v3414_v0  ;;  %3041 = vmatprep.subr.bf16.mxu1 %v3414_v0 }
 0x30b   :  { %3022 = vmatmul.mubr.msk.bf16.vlgmr.msra.gmra.mxu0 %vm67_vm2, %v1190_v22  ;;  %3030 = vmatmul.mubr.msk.bf16.vlgmr.msra.gmra.mxu1 %vm67_vm2, %v1190_v22 }
 0x30c   :  { %3034 = vmatpush3.bf16.msra.mxu0 %v3462_v1  ;;  %3042 = vmatpush3.bf16.msra.mxu1 %v3467_v2  ;;  %v2611_v1 = vld [vmem:[%s4237_s0 + $0x12] sm:$0x3] }
 0x30d   :  { %3035 = vmatprep.subr.bf16.mxu0 %v3414_v0  ;;  %3043 = vmatprep.subr.bf16.mxu1 %v3414_v0 }
 0x30e   :  { %3037 = vmatprep.mubr.msk.bf16.mxu0 %vm3415_vm0, %v3414_v0  ;;  %3045 = vmatprep.mubr.msk.bf16.mxu1 %vm3415_vm0, %v3414_v0 }
 0x310   :  { %3036 = vmatpush3.bf16.msra.mxu0 %v3477_v3  ;;  %3044 = vmatpush3.bf16.msra.mxu1 %v3484_v4  ;;  %v2612_v3 = vld [vmem:[%s4237_s0 + $0x14] sm:$0x3] }
 0x311   :  { %3049 = vmatprep.subr.bf16.mxu0 %v3414_v0  ;;  %3057 = vmatprep.subr.bf16.mxu1 %v3414_v0 }
 0x3bb   :  { %v1079_v2 = vpop.f32.mrf.mxu0  ;;  %v1119_v51 = vpop.f32.mrf.mxu1 }
 0x3bc   :  { %v1125_v23 = vadd.f32 %v2611_v1, %v1079_v2  ;;  %v1132_v32 = vadd.f32 %v2612_v3, %v1119_v51  ;;  %v2621_v1 = vld [vmem:[%s4238_s1 + $0x1c] sm:$0x3] }
 0x3bd   :  { %v2991_v24 = vpop.f32.mrf.mxu0  ;;  %v2999_v26 = vpop.f32.mrf.mxu1 }
 0x3be   :  { %v2616_v27 = vmul.f32 -1.442695, %v1125_v23  ;;  %v2617_v38 = vmul.f32 -1.442695, %v1132_v32 }
 0x3bf   :  { %v1082_v28 = vpop.f32.mrf.mxu0  ;;  %v1122_v4 = vpop.f32.mrf.mxu1 }
 0x3c0   :  { %3300 = vpow2.f32 %v2616_v27 }
 0x3c1   :  { %v2992_v29 = vpop.f32.mrf.mxu0  ;;  %v3000_v30 = vpop.f32.mrf.mxu1 }
 0x3c3   :  { %v1173_v34 = vpop.f32.mrf.mxu0  ;;  %v1228_v35 = vpop.f32.mrf.mxu1 }
 0x3c4   :  { %v1274_v36 = vadd.f32 %v2619_v33, %v1228_v35  ;;  %v1174_v7 = vadd.f32 %v3582_v55, %v1173_v34 }
 0x3c5   :  { %v3007_v37 = vpop.f32.mrf.mxu0  ;;  %v3015_v39 = vpop.f32.mrf.mxu1 }
 0x3c6   :  { %v2624_v40 = vmul.f32 -1.442695, %v1274_v36 }
 0x3c7   :  { %v1176_v41 = vpop.f32.mrf.mxu0  ;;  %v1231_v42 = vpop.f32.mrf.mxu1 }
 0x3c8   :  { %3302 = vpow2.f32 %v2624_v40 }
 0x3c9   :  { %v3008_v43 = vpop.f32.mrf.mxu0  ;;  %3304 = vpow2.f32 %v2617_v38  ;;  %v3016_v46 = vpop.f32.mrf.mxu1  ;;  %v2630_v38 = vld [vmem:[%s4237_s0 + $0x1a] sm:$0x3] }
 0x3cb   :  { %v1268_v47 = vpop.f32.mrf.mxu0  ;;  %v1322_v25 = vpop.f32.mrf.mxu1 }
 0x3cc   :  { %v1281_v48 = vadd.f32 %v2620_v44, %v1268_v47  ;;  %v1323_v20 = vadd.f32 %v3591_v63, %v1322_v25  ;;  %v2637_v44 = vld [vmem:[%s4238_s1 + $0x12] sm:$0x3] }
 0x3cd   :  { %v3301_v49 = vpop.eup %3300  ;;  %v3023_v50 = vpop.f32.mrf.mxu0 }
 0x3ce   :  { %v1129_v52 = vadd.f32 1.0, %v3301_v49  ;;  %v3031_v31 = vpop.f32.mrf.mxu1  ;;  %v2625_v53 = vmul.f32 -1.442695, %v1281_v48 }
 0x3cf   :  { %v1271_v54 = vpop.f32.mrf.mxu0 }
 0x3d0   :  { %3306 = vrcp.f32 %v1129_v52  ;;  %v1325_v56 = vpop.f32.mrf.mxu1 }
 0x3d1   :  { %v3024_v57 = vpop.f32.mrf.mxu0  ;;  %3308 = vpow2.f32 %v2625_v53  ;;  %v2638_v56 = vld [vmem:[%s4238_s1 + $0x14] sm:$0x3] }
 0x3d2   :  { %v3032_v58 = vpop.f32.mrf.mxu1 }
 0x3d5   :  { %v3303_v59 = vpop.eup %3302 }
 0x3d6   :  { %v3305_v60 = vpop.eup %3304  ;;  %v1278_v61 = vadd.f32 1.0, %v3303_v59 }
 0x3d7   :  { %v1136_v62 = vadd.f32 1.0, %v3305_v60 }
 0x3d8   :  { %3310 = vrcp.f32 %v1278_v61 }
 0x3d9   :  { %3312 = vrcp.f32 %v1136_v62 }
 0x3dd   :  { %v3307_v14 = vpop.eup %3306 }
 0x3de   :  { %v1179_v17 = vmul.f32 %v3307_v14, %v1174_v7  ;;  %v3309_v18 = vpop.eup %3308 }
 0x3df   :  { %v1285_v19 = vadd.f32 1.0, %v3309_v18 }
 0x3e0   :  { %v1180_v45 = vadd.f32 %v2613_v16, %v1179_v17 }
 0x3e2   :  { %3314 = vtanh.f32 %v1180_v45 }
 0x3e3   :  { %3316 = vrcp.f32 %v1285_v19 }
 0x3e5   :  { %v3311_v22 = vpop.eup %3310 }
 0x3e6   :  { %v1328_v2 = vmul.f32 %v3311_v22, %v1323_v20  ;;  %v3313_v23 = vpop.eup %3312 }
 0x3e7   :  { %v1182_v24 = vsub.f32 1.0, %v3313_v23  ;;  %v1184_v3 = vmul.f32 %v3313_v23, %v3760_v15 }
 0x3e8   :  { %v1329_v51 = vadd.f32 %v2621_v1, %v1328_v2 }
 0x3ea   :  { %3318 = vtanh.f32 %v1329_v51 }
 0x3ef   :  { %v3315_v26 = vpop.eup %3314 }
 0x3f0   :  { %v1183_v27 = vmul.f32 %v3315_v26, %v1182_v24  ;;  %v3317_v4 = vpop.eup %3316  ;;  %v2631_v24 = vld [vmem:[%s4237_s0 + $0x1c] sm:$0x3] }
 0x3f1   :  { %v1331_v30 = vsub.f32 1.0, %v3317_v4  ;;  %v1333_v33 = vmul.f32 %v3317_v4, %v3782_v21 }
 0x3f2   :  { %v3842_v28 = vadd.f32 %v1184_v3, %v1183_v27 }
 0x3f4   :  { %2627 = vst.msk [vmem:[%s4241_s6 + $0x6] sm:$0x3] %vm429_vm1, %v3842_v28  ;;  %v1343_v29 = vpack.c.bf16 %v3842_v28, %v3842_v28 }
 0x3f6   :  { %3038 = vmatmul.mubr.msk.bf16.vlgmr.msra.gmra.mxu0 %vm67_vm2, %v1343_v29  ;;  %3046 = vmatmul.mubr.msk.bf16.vlgmr.msra.gmra.mxu1 %vm67_vm2, %v1343_v29 }
 0x3f7   :  { %3050 = vmatpush3.bf16.msra.mxu0 %v3491_v5  ;;  %3058 = vmatpush3.bf16.msra.mxu1 %v3497_v6  ;;  %v3319_v15 = vpop.eup %3318 }
 0x3f8   :  { %3051 = vmatprep.subr.bf16.mxu0 %v3414_v0  ;;  %3059 = vmatprep.subr.bf16.mxu1 %v3414_v0  ;;  %v1332_v32 = vmul.f32 %v3319_v15, %v1331_v30  ;;  %v2639_v15 = vld [vmem:[%s4238_s1 + $0x16] sm:$0x3] }
 0x3f9   :  { %3053 = vmatprep.mubr.msk.bf16.mxu0 %vm3415_vm0, %v3414_v0  ;;  %3061 = vmatprep.mubr.msk.bf16.mxu1 %vm3415_vm0, %v3414_v0 }
 0x3fa   :  { %v3864_v5 = vadd.f32 %v1333_v33, %v1332_v32 }
 0x3fb   :  { %3052 = vmatpush3.bf16.msra.mxu0 %v3505_v8  ;;  %3060 = vmatpush3.bf16.msra.mxu1 %v3511_v9  ;;  %v3894_v8 = vld [vmem:[%s4235_s2 + $0x8] sm:$0xff]   ;;  %v3900_v9 = vld [vmem:[%s4235_s2 + $0x18] sm:$0xff]  }
 0x3fc   :  { %3065 = vmatprep.subr.bf16.mxu0 %v3414_v0  ;;  %3073 = vmatprep.subr.bf16.mxu1 %v3414_v0  ;;  %2628 = vst.msk [vmem:[%s4242_s7 + $0x8] sm:$0x3] %vm429_vm1, %v3864_v5  ;;  %v1492_v6 = vpack.c.bf16 %v3864_v5, %v3864_v5 }
 0x3fe   :  { %3054 = vmatmul.mubr.msk.bf16.vlgmr.msra.gmra.mxu0 %vm67_vm2, %v1343_v29  ;;  %3062 = vmatmul.mubr.msk.bf16.vlgmr.msra.gmra.mxu1 %vm67_vm2, %v1492_v6 }
 0x3ff   :  { %3066 = vmatpush3.bf16.msra.mxu0 %v3523_v10  ;;  %3074 = vmatpush3.bf16.msra.mxu1 %v3531_v11  ;;  %v3912_v10 = vld [vmem:[%s4235_s2] sm:$0xff]   ;;  %v3918_v11 = vld [vmem:[%s4235_s2 + $0x10] sm:$0xff]  }
 0x400   :  { %3067 = vmatprep.subr.bf16.mxu0 %v3414_v0  ;;  %3075 = vmatprep.subr.bf16.mxu1 %v3414_v0 }
 0x401   :  { %3069 = vmatprep.mubr.msk.bf16.mxu0 %vm3415_vm0, %v3414_v0  ;;  %3077 = vmatprep.mubr.msk.bf16.mxu1 %vm3415_vm0, %v3414_v0 }
 0x403   :  { %3068 = vmatpush3.bf16.msra.mxu0 %v3537_v12  ;;  %3076 = vmatpush3.bf16.msra.mxu1 %v3546_v13  ;;  %v2629_v12 = vld [vmem:[%s4237_s0 + $0x18] sm:$0x3] }
 0x404   :  { %3081 = vmatprep.subr.bf16.mxu0 %v3414_v0  ;;  %3089 = vmatprep.subr.bf16.mxu1 %v3414_v0 }
 0x406   :  { %3070 = vmatmul.mubr.msk.bf16.vlgmr.msra.gmra.mxu0 %vm67_vm2, %v1492_v6  ;;  %3078 = vmatmul.mubr.msk.bf16.vlgmr.msra.gmra.mxu1 %vm67_vm2, %v1492_v6 }
 0x407   :  { %3082 = vmatpush3.bf16.msra.mxu0 %v3894_v8  ;;  %3090 = vmatpush3.bf16.msra.mxu1 %v3900_v9 }
 0x408   :  { %3083 = vmatprep.subr.bf16.mxu0 %v3414_v0  ;;  %3091 = vmatprep.subr.bf16.mxu1 %v3414_v0 }
 0x409   :  { %3085 = vmatprep.mubr.msk.bf16.mxu0 %vm3415_vm0, %v3414_v0  ;;  %3093 = vmatprep.mubr.msk.bf16.mxu1 %vm3415_vm0, %v3414_v0 }
 0x40b   :  { %3084 = vmatpush3.bf16.msra.mxu0 %v3912_v10  ;;  %3092 = vmatpush3.bf16.msra.mxu1 %v3918_v11 }
 0x40c   :  { %3097 = vmatprep.subr.bf16.mxu0 %v3414_v0  ;;  %3105 = vmatprep.subr.bf16.mxu1 %v3414_v0 }
 0x4b6   :  { %v1381_v13 = vpop.f32.mrf.mxu0  ;;  %v1421_v21 = vpop.f32.mrf.mxu1 }
 0x4b7   :  { %v1427_v34 = vadd.f32 %v2629_v12, %v1381_v13  ;;  %v1434_v43 = vadd.f32 %v2630_v38, %v1421_v21 }
 0x4b8   :  { %v3039_v35 = vpop.f32.mrf.mxu0  ;;  %v3047_v36 = vpop.f32.mrf.mxu1 }
 0x4b9   :  { %v2634_v37 = vmul.f32 -1.442695, %v1427_v34  ;;  %v2635_v49 = vmul.f32 -1.442695, %v1434_v43 }
 0x4ba   :  { %v1384_v39 = vpop.f32.mrf.mxu0  ;;  %v1424_v40 = vpop.f32.mrf.mxu1 }
 0x4bb   :  { %3320 = vpow2.f32 %v2634_v37  ;;  %v3964_v37 = vld [vmem:[%s4236_s3 + $0x8] sm:$0xff]  }
 0x4bc   :  { %v3040_v41 = vpop.f32.mrf.mxu0  ;;  %v3048_v42 = vpop.f32.mrf.mxu1 }
 0x4bd   :  { %v3977_v41 = vld [vmem:[%s4235_s2 + $0x20] sm:$0xff]  }
 0x4be   :  { %v1475_v46 = vpop.f32.mrf.mxu0  ;;  %v1530_v47 = vpop.f32.mrf.mxu1  ;;  %v3983_v42 = vld [vmem:[%s4236_s3] sm:$0xff]  }
 0x4bf   :  { %v1576_v48 = vadd.f32 %v2637_v44, %v1530_v47  ;;  %v1476_v51 = vadd.f32 %v3582_v55, %v1475_v46  ;;  %v4002_v44 = vld [vmem:[%s4236_s3 + $0x18] sm:$0xff]   ;;  %v4008_v46 = vld [vmem:[%s4236_s3 + $0x28] sm:$0xff]   ;;  %v4020_v47 = vld [vmem:[%s4236_s3 + $0x10] sm:$0xff]  }
 0x4c0   :  { %v3055_v25 = vpop.f32.mrf.mxu0  ;;  %v3063_v50 = vpop.f32.mrf.mxu1 }
 0x4c1   :  { %v2642_v52 = vmul.f32 -1.442695, %v1576_v48  ;;  %v4026_v48 = vld [vmem:[%s4236_s3 + $0x20] sm:$0xff]   ;;  %v2647_v25 = vld [vmem:[%s4237_s0 + $0x1e] sm:$0x3] }
 0x4c2   :  { %v1478_v31 = vpop.f32.mrf.mxu0  ;;  %v1533_v53 = vpop.f32.mrf.mxu1 }
 0x4c3   :  { %3322 = vpow2.f32 %v2642_v52 }
 0x4c4   :  { %v3056_v54 = vpop.f32.mrf.mxu0  ;;  %3324 = vpow2.f32 %v2635_v49  ;;  %v3064_v57 = vpop.f32.mrf.mxu1 }
 0x4c6   :  { %v1570_v58 = vpop.f32.mrf.mxu0  ;;  %v1624_v60 = vpop.f32.mrf.mxu1 }
 0x4c7   :  { %v1583_v59 = vadd.f32 %v2638_v56, %v1570_v58  ;;  %v1625_v29 = vadd.f32 %v3591_v63, %v1624_v60  ;;  %v2648_v56 = vld [vmem:[%s4237_s0 + $0x20] sm:$0x3] }
 0x4c8   :  { %v3321_v61 = vpop.eup %3320  ;;  %v3071_v62 = vpop.f32.mrf.mxu0 }
 0x4c9   :  { %v1431_v7 = vadd.f32 1.0, %v3321_v61  ;;  %v3079_v14 = vpop.f32.mrf.mxu1  ;;  %v2643_v16 = vmul.f32 -1.442695, %v1583_v59  ;;  %v2655_v62 = vld [vmem:[%s4238_s1 + $0xc] sm:$0x3] }
 0x4ca   :  { %v1573_v17 = vpop.f32.mrf.mxu0 }
 0x4cb   :  { %3326 = vrcp.f32 %v1431_v7  ;;  %v1627_v18 = vpop.f32.mrf.mxu1 }
 0x4cc   :  { %v3072_v45 = vpop.f32.mrf.mxu0  ;;  %3328 = vpow2.f32 %v2643_v16 }
 0x4cd   :  { %v3080_v19 = vpop.f32.mrf.mxu1 }
 0x4d0   :  { %v3323_v20 = vpop.eup %3322 }
 0x4d1   :  { %v3325_v22 = vpop.eup %3324  ;;  %v1580_v1 = vadd.f32 1.0, %v3323_v20 }
 0x4d2   :  { %v1438_v2 = vadd.f32 1.0, %v3325_v22 }
 0x4d3   :  { %3330 = vrcp.f32 %v1580_v1 }
 0x4d4   :  { %3332 = vrcp.f32 %v1438_v2  ;;  %v2656_v2 = vld [vmem:[%s4238_s1 + $0xe] sm:$0x3] }
 0x4d8   :  { %v3327_v23 = vpop.eup %3326 }
 0x4d9   :  { %v1481_v26 = vmul.f32 %v3327_v23, %v1476_v51  ;;  %v3329_v27 = vpop.eup %3328 }
 0x4da   :  { %v1587_v4 = vadd.f32 1.0, %v3329_v27 }
 0x4db   :  { %v1482_v3 = vadd.f32 %v2631_v24, %v1481_v26 }
 0x4dd   :  { %3334 = vtanh.f32 %v1482_v3 }
 0x4de   :  { %3336 = vrcp.f32 %v1587_v4 }
 0x4e0   :  { %v3331_v30 = vpop.eup %3330 }
 0x4e1   :  { %v1630_v55 = vmul.f32 %v3331_v30, %v1625_v29  ;;  %v3333_v33 = vpop.eup %3332 }
 0x4e2   :  { %v1484_v6 = vsub.f32 1.0, %v3333_v33  ;;  %v1486_v21 = vmul.f32 %v3333_v33, %v3842_v28  ;;  %v3958_v28 = vld [vmem:[%s4235_s2 + $0x28] sm:$0xff]  }
 0x4e3   :  { %v1631_v32 = vadd.f32 %v2639_v15, %v1630_v55 }
 0x4e5   :  { %3338 = vtanh.f32 %v1631_v32 }
 0x4ea   :  { %v3335_v12 = vpop.eup %3334 }
 0x4eb   :  { %v1485_v13 = vmul.f32 %v3335_v12, %v1484_v6  ;;  %v3337_v35 = vpop.eup %3336 }
 0x4ec   :  { %v1633_v36 = vsub.f32 1.0, %v3337_v35  ;;  %v1635_v40 = vmul.f32 %v3337_v35, %v3864_v5  ;;  %v4060_v35 = vld [vmem:[%s4239_s4] ss:$0 sm:$0xff] }
 0x4ed   :  { %v3944_v34 = vadd.f32 %v1486_v21, %v1485_v13 }
 0x4ef   :  { %2645 = vst.msk [vmem:[%s4241_s6 + $0x8] sm:$0x3] %vm429_vm1, %v3944_v34  ;;  %v1645_v63 = vpack.c.bf16 %v3944_v34, %v3944_v34 }
 0x4f1   :  { %3086 = vmatmul.mubr.msk.bf16.vlgmr.msra.gmra.mxu0 %vm67_vm2, %v1645_v63  ;;  %3094 = vmatmul.mubr.msk.bf16.vlgmr.msra.gmra.mxu1 %vm67_vm2, %v1645_v63 }
 0x4f2   :  { %3098 = vmatpush3.bf16.msra.mxu0 %v3958_v28  ;;  %3106 = vmatpush3.bf16.msra.mxu1 %v3964_v37  ;;  %v3339_v38 = vpop.eup %3338 }
 0x4f3   :  { %3099 = vmatprep.subr.bf16.mxu0 %v3414_v0  ;;  %3107 = vmatprep.subr.bf16.mxu1 %v3414_v0  ;;  %v1634_v39 = vmul.f32 %v3339_v38, %v1633_v36  ;;  %v2649_v38 = vld [vmem:[%s4237_s0 + $0x22] sm:$0x3] }
 0x4f4   :  { %3101 = vmatprep.mubr.msk.bf16.mxu0 %vm3415_vm0, %v3414_v0  ;;  %3109 = vmatprep.mubr.msk.bf16.mxu1 %vm3415_vm0, %v3414_v0 }
 0x4f5   :  { %v3986_v43 = vadd.f32 %v1635_v40, %v1634_v39 }
 0x4f6   :  { %3100 = vmatpush3.bf16.msra.mxu0 %v3977_v41  ;;  %3108 = vmatpush3.bf16.msra.mxu1 %v3983_v42 }
 0x4f7   :  { %3113 = vmatprep.subr.bf16.mxu0 %v3414_v0  ;;  %3121 = vmatprep.subr.bf16.mxu1 %v3414_v0  ;;  %2646 = vst.msk [vmem:[%s4242_s7 + $0x6] sm:$0x3] %vm429_vm1, %v3986_v43  ;;  %v1794_v5 = vpack.c.bf16 %v3986_v43, %v3986_v43 }
 0x4f9   :  { %3102 = vmatmul.mubr.msk.bf16.vlgmr.msra.gmra.mxu0 %vm67_vm2, %v1645_v63  ;;  %3110 = vmatmul.mubr.msk.bf16.vlgmr.msra.gmra.mxu1 %vm67_vm2, %v1794_v5 }
 0x4fa   :  { %3114 = vmatpush3.bf16.msra.mxu0 %v4002_v44  ;;  %3122 = vmatpush3.bf16.msra.mxu1 %v4008_v46 }
 0x4fb   :  { %3115 = vmatprep.subr.bf16.mxu0 %v3414_v0  ;;  %3123 = vmatprep.subr.bf16.mxu1 %v3414_v0 }
 0x4fc   :  { %3117 = vmatprep.mubr.msk.bf16.mxu0 %vm3415_vm0, %v3414_v0  ;;  %3125 = vmatprep.mubr.msk.bf16.mxu1 %vm3415_vm0, %v3414_v0 }
 0x4fe   :  { %3116 = vmatpush3.bf16.msra.mxu0 %v4020_v47  ;;  %3124 = vmatpush3.bf16.msra.mxu1 %v4026_v48 }
 0x4ff   :  { %3129 = vmatprep.subr.bf16.mxu0 %v3414_v0  ;;  %3137 = vmatprep.subr.bf16.mxu1 %v3414_v0 }
 0x501   :  { %3118 = vmatmul.mubr.msk.bf16.vlgmr.msra.gmra.mxu0 %vm67_vm2, %v1794_v5  ;;  %3126 = vmatmul.mubr.msk.bf16.vlgmr.msra.gmra.mxu1 %vm67_vm2, %v1794_v5 }
 0x502   :  { %3130 = vmatpush3.bf16.msra.mxu0 %v3894_v8  ;;  %3138 = vmatpush3.bf16.msra.mxu1 %v3900_v9 }
 0x503   :  { %3131 = vmatprep.subr.bf16.mxu0 %v3414_v0  ;;  %3139 = vmatprep.subr.bf16.mxu1 %v3414_v0 }
 0x504   :  { %3133 = vmatprep.mubr.msk.bf16.mxu0 %vm3415_vm0, %v3414_v0  ;;  %3141 = vmatprep.mubr.msk.bf16.mxu1 %vm3415_vm0, %v3414_v0 }
 0x506   :  { %3132 = vmatpush3.bf16.msra.mxu0 %v3912_v10  ;;  %3140 = vmatpush3.bf16.msra.mxu1 %v3918_v11 }
 0x507   :  { %3145 = vmatprep.subr.bf16.mxu0 %v3414_v0  ;;  %3153 = vmatprep.subr.bf16.mxu1 %v3414_v0 }
 0x5b1   :  { %v1683_v49 = vpop.f32.mrf.mxu0  ;;  %v1723_v50 = vpop.f32.mrf.mxu1 }
 0x5b2   :  { %v1729_v52 = vadd.f32 %v2647_v25, %v1683_v49  ;;  %v1736_v61 = vadd.f32 %v2648_v56, %v1723_v50  ;;  %v4069_v49 = vld [vmem:[%s4240_s5] ss:$0 sm:$0xff] }
 0x5b3   :  { %v3087_v31 = vpop.f32.mrf.mxu0  ;;  %v3095_v53 = vpop.f32.mrf.mxu1 }
 0x5b4   :  { %v2652_v54 = vmul.f32 -1.442695, %v1729_v52  ;;  %v2653_v18 = vmul.f32 -1.442695, %v1736_v61  ;;  %v2657_v31 = vld [vmem:[%s4238_s1 + $0x10] sm:$0x3] }
 0x5b5   :  { %v1686_v57 = vpop.f32.mrf.mxu0  ;;  %v1726_v58 = vpop.f32.mrf.mxu1 }
 0x5b6   :  { %3340 = vpow2.f32 %v2652_v54 }
 0x5b7   :  { %v3088_v59 = vpop.f32.mrf.mxu0  ;;  %v3096_v60 = vpop.f32.mrf.mxu1 }
 0x5b9   :  { %v1777_v7 = vpop.f32.mrf.mxu0  ;;  %v1832_v14 = vpop.f32.mrf.mxu1 }
 0x5ba   :  { %v1878_v16 = vadd.f32 %v2655_v62, %v1832_v14  ;;  %v1778_v63 = vadd.f32 %v4060_v35, %v1777_v7 }
 0x5bb   :  { %v3103_v17 = vpop.f32.mrf.mxu0  ;;  %v3111_v45 = vpop.f32.mrf.mxu1 }
 0x5bc   :  { %v2660_v19 = vmul.f32 -1.442695, %v1878_v16 }
 0x5bd   :  { %v1780_v20 = vpop.f32.mrf.mxu0  ;;  %v1835_v22 = vpop.f32.mrf.mxu1 }
 0x5be   :  { %3342 = vpow2.f32 %v2660_v19 }
 0x5bf   :  { %v3104_v1 = vpop.f32.mrf.mxu0  ;;  %3344 = vpow2.f32 %v2653_v18  ;;  %v3112_v51 = vpop.f32.mrf.mxu1 }
 0x5c1   :  { %v1872_v23 = vpop.f32.mrf.mxu0  ;;  %v1926_v26 = vpop.f32.mrf.mxu1 }
 0x5c2   :  { %v1885_v24 = vadd.f32 %v2656_v2, %v1872_v23  ;;  %v1927_v50 = vadd.f32 %v4069_v49, %v1926_v26  ;;  %v2673_v26 = vld [vmem:[%s4238_s1 + $0x6] sm:$0x3] }
 0x5c3   :  { %v3341_v27 = vpop.eup %3340  ;;  %v3119_v3 = vpop.f32.mrf.mxu0 }
 0x5c4   :  { %v1733_v4 = vadd.f32 1.0, %v3341_v27  ;;  %v3127_v29 = vpop.f32.mrf.mxu1  ;;  %v2661_v30 = vmul.f32 -1.442695, %v1885_v24 }
 0x5c5   :  { %v1875_v15 = vpop.f32.mrf.mxu0 }
 0x5c6   :  { %3346 = vrcp.f32 %v1733_v4  ;;  %v1929_v55 = vpop.f32.mrf.mxu1 }
 0x5c7   :  { %v3120_v32 = vpop.f32.mrf.mxu0  ;;  %3348 = vpow2.f32 %v2661_v30 }
 0x5c8   :  { %v3128_v33 = vpop.f32.mrf.mxu1 }
 0x5cb   :  { %v3343_v6 = vpop.eup %3342 }
 0x5cc   :  { %v3345_v12 = vpop.eup %3344  ;;  %v1882_v13 = vadd.f32 1.0, %v3343_v6 }
 0x5cd   :  { %v1740_v21 = vadd.f32 1.0, %v3345_v12  ;;  %v2674_v12 = vld [vmem:[%s4238_s1 + $0x8] sm:$0x3] }
 0x5ce   :  { %3350 = vrcp.f32 %v1882_v13 }
 0x5cf   :  { %3352 = vrcp.f32 %v1740_v21 }
 0x5d3   :  { %v3347_v36 = vpop.eup %3346 }
 0x5d4   :  { %v1783_v39 = vmul.f32 %v3347_v36, %v1778_v63  ;;  %v3349_v40 = vpop.eup %3348 }
 0x5d5   :  { %v1889_v25 = vadd.f32 1.0, %v3349_v40 }
 0x5d6   :  { %v1784_v5 = vadd.f32 %v2649_v38, %v1783_v39 }
 0x5d8   :  { %3354 = vtanh.f32 %v1784_v5 }
 0x5d9   :  { %3356 = vrcp.f32 %v1889_v25 }
 0x5db   :  { %v3351_v52 = vpop.eup %3350 }
 0x5dc   :  { %v1932_v53 = vmul.f32 %v3351_v52, %v1927_v50  ;;  %v3353_v56 = vpop.eup %3352 }
 0x5dd   :  { %v1786_v57 = vsub.f32 1.0, %v3353_v56  ;;  %v1788_v60 = vmul.f32 %v3353_v56, %v3944_v34 }
 0x5de   :  { %v1933_v54 = vadd.f32 %v2657_v31, %v1932_v53 }
 0x5e0   :  { %3358 = vtanh.f32 %v1933_v54 }
 0x5e5   :  { %v3355_v58 = vpop.eup %3354 }
 0x5e6   :  { %v1787_v59 = vmul.f32 %v3355_v58, %v1786_v57  ;;  %v3357_v62 = vpop.eup %3356 }
 0x5e7   :  { %v1935_v14 = vsub.f32 1.0, %v3357_v62  ;;  %v1937_v17 = vmul.f32 %v3357_v62, %v3986_v43  ;;  %v2667_v62 = vld [vmem:[%s4237_s0 + $0x28] sm:$0x3] }
 0x5e8   :  { %v4076_v61 = vadd.f32 %v1788_v60, %v1787_v59 }
 0x5ea   :  { %2663 = vst.msk [vmem:[%s4241_s6 + $0xa] sm:$0x3] %vm429_vm1, %v4076_v61  ;;  %v1947_v7 = vpack.c.bf16 %v4076_v61, %v4076_v61 }
 0x5ec   :  { %3134 = vmatmul.mubr.msk.bf16.vlgmr.msra.gmra.mxu0 %vm67_vm2, %v1947_v7  ;;  %3142 = vmatmul.mubr.msk.bf16.vlgmr.msra.gmra.mxu1 %vm67_vm2, %v1947_v7 }
 0x5ed   :  { %3146 = vmatpush3.bf16.msra.mxu0 %v3958_v28  ;;  %3154 = vmatpush3.bf16.msra.mxu1 %v3964_v37  ;;  %v3359_v34 = vpop.eup %3358 }
 0x5ee   :  { %3147 = vmatprep.subr.bf16.mxu0 %v3414_v0  ;;  %3155 = vmatprep.subr.bf16.mxu1 %v3414_v0  ;;  %v1936_v16 = vmul.f32 %v3359_v34, %v1935_v14 }
 0x5ef   :  { %3149 = vmatprep.mubr.msk.bf16.mxu0 %vm3415_vm0, %v3414_v0  ;;  %3157 = vmatprep.mubr.msk.bf16.mxu1 %vm3415_vm0, %v3414_v0 }
 0x5f0   :  { %v4098_v18 = vadd.f32 %v1937_v17, %v1936_v16 }
 0x5f1   :  { %3148 = vmatpush3.bf16.msra.mxu0 %v3977_v41  ;;  %3156 = vmatpush3.bf16.msra.mxu1 %v3983_v42 }
 0x5f2   :  { %3161 = vmatprep.subr.bf16.mxu0 %v3414_v0  ;;  %3169 = vmatprep.subr.bf16.mxu1 %v3414_v0  ;;  %2664 = vst.msk [vmem:[%s4242_s7 + $0x4] sm:$0x3] %vm429_vm1, %v4098_v18  ;;  %v2096_v45 = vpack.c.bf16 %v4098_v18, %v4098_v18 }
 0x5f4   :  { %3150 = vmatmul.mubr.msk.bf16.vlgmr.msra.gmra.mxu0 %vm67_vm2, %v1947_v7  ;;  %3158 = vmatmul.mubr.msk.bf16.vlgmr.msra.gmra.mxu1 %vm67_vm2, %v2096_v45 }
 0x5f5   :  { %3162 = vmatpush3.bf16.msra.mxu0 %v4002_v44  ;;  %3170 = vmatpush3.bf16.msra.mxu1 %v4008_v46 }
 0x5f6   :  { %3163 = vmatprep.subr.bf16.mxu0 %v3414_v0  ;;  %3171 = vmatprep.subr.bf16.mxu1 %v3414_v0 }
 0x5f7   :  { %3165 = vmatprep.mubr.msk.bf16.mxu0 %vm3415_vm0, %v3414_v0  ;;  %3173 = vmatprep.mubr.msk.bf16.mxu1 %vm3415_vm0, %v3414_v0 }
 0x5f9   :  { %3164 = vmatpush3.bf16.msra.mxu0 %v4020_v47  ;;  %3172 = vmatpush3.bf16.msra.mxu1 %v4026_v48 }
 0x5fa   :  { %3177 = vmatprep.subr.bf16.mxu0 %v3414_v0  ;;  %3185 = vmatprep.subr.bf16.mxu1 %v3414_v0 }
 0x5fc   :  { %3166 = vmatmul.mubr.msk.bf16.vlgmr.msra.gmra.mxu0 %vm67_vm2, %v2096_v45  ;;  %3174 = vmatmul.mubr.msk.bf16.vlgmr.msra.gmra.mxu1 %vm67_vm2, %v2096_v45 }
 0x5fd   :  { %3178 = vmatpush3.bf16.msra.mxu0 %v3894_v8  ;;  %3186 = vmatpush3.bf16.msra.mxu1 %v3900_v9  ;;  %v2665_v8 = vld [vmem:[%s4237_s0 + $0x24] sm:$0x3] }
 0x5fe   :  { %3179 = vmatprep.subr.bf16.mxu0 %v3414_v0  ;;  %3187 = vmatprep.subr.bf16.mxu1 %v3414_v0 }
 0x5ff   :  { %3181 = vmatprep.mubr.msk.bf16.mxu0 %vm3415_vm0, %v3414_v0  ;;  %3189 = vmatprep.mubr.msk.bf16.mxu1 %vm3415_vm0, %v3414_v0 }
 0x601   :  { %3180 = vmatpush3.bf16.msra.mxu0 %v3912_v10  ;;  %3188 = vmatpush3.bf16.msra.mxu1 %v3918_v11  ;;  %v2666_v10 = vld [vmem:[%s4237_s0 + $0x26] sm:$0x3] }
 0x602   :  { %3193 = vmatprep.subr.bf16.mxu0 %v3414_v0  ;;  %3201 = vmatprep.subr.bf16.mxu1 %v3414_v0 }
 0x6ac   :  { %v1985_v9 = vpop.f32.mrf.mxu0  ;;  %v2025_v43 = vpop.f32.mrf.mxu1 }
 0x6ad   :  { %v2031_v19 = vadd.f32 %v2665_v8, %v1985_v9  ;;  %v2038_v24 = vadd.f32 %v2666_v10, %v2025_v43  ;;  %v2675_v8 = vld [vmem:[%s4238_s1 + $0xa] sm:$0x3] }
 0x6ae   :  { %v3135_v20 = vpop.f32.mrf.mxu0  ;;  %v3143_v22 = vpop.f32.mrf.mxu1 }
 0x6af   :  { %v2670_v1 = vmul.f32 -1.442695, %v2031_v19  ;;  %v2671_v30 = vmul.f32 -1.442695, %v2038_v24 }
 0x6b0   :  { %v1988_v2 = vpop.f32.mrf.mxu0  ;;  %v2028_v11 = vpop.f32.mrf.mxu1 }
 0x6b1   :  { %3360 = vpow2.f32 %v2670_v1 }
 0x6b2   :  { %v3136_v51 = vpop.f32.mrf.mxu0  ;;  %v3144_v23 = vpop.f32.mrf.mxu1 }
 0x6b4   :  { %v2079_v27 = vpop.f32.mrf.mxu0  ;;  %v2134_v3 = vpop.f32.mrf.mxu1 }
 0x6b5   :  { %v2180_v4 = vadd.f32 %v2673_v26, %v2134_v3  ;;  %v2080_v59 = vadd.f32 %v4060_v35, %v2079_v27 }
 0x6b6   :  { %v3151_v29 = vpop.f32.mrf.mxu0  ;;  %v3159_v15 = vpop.f32.mrf.mxu1 }
 0x6b7   :  { %v2678_v55 = vmul.f32 -1.442695, %v2180_v4  ;;  %v2394_v15 = vld [vmem:[%s4238_s1] sm:$0x3] }
 0x6b8   :  { %v2082_v32 = vpop.f32.mrf.mxu0  ;;  %v2137_v33 = vpop.f32.mrf.mxu1 }
 0x6b9   :  { %3362 = vpow2.f32 %v2678_v55 }
 0x6ba   :  { %v3152_v6 = vpop.f32.mrf.mxu0  ;;  %3364 = vpow2.f32 %v2671_v30  ;;  %v3160_v13 = vpop.f32.mrf.mxu1 }
 0x6bc   :  { %v2174_v21 = vpop.f32.mrf.mxu0  ;;  %v2228_v36 = vpop.f32.mrf.mxu1 }
 0x6bd   :  { %v2187_v63 = vadd.f32 %v2674_v12, %v2174_v21  ;;  %v2229_v17 = vadd.f32 %v4069_v49, %v2228_v36 }
 0x6be   :  { %v3361_v38 = vpop.eup %3360  ;;  %v3167_v39 = vpop.f32.mrf.mxu0 }
 0x6bf   :  { %v2035_v40 = vadd.f32 1.0, %v3361_v38  ;;  %v3175_v5 = vpop.f32.mrf.mxu1  ;;  %v2679_v25 = vmul.f32 -1.442695, %v2187_v63  ;;  %v2395_v39 = vld [vmem:[%s4238_s1 + $0x2] sm:$0x3] }
 0x6c0   :  { %v2177_v50 = vpop.f32.mrf.mxu0 }
 0x6c1   :  { %3366 = vrcp.f32 %v2035_v40  ;;  %v2231_v52 = vpop.f32.mrf.mxu1 }
 0x6c2   :  { %v3168_v31 = vpop.f32.mrf.mxu0  ;;  %3368 = vpow2.f32 %v2679_v25 }
 0x6c3   :  { %v3176_v53 = vpop.f32.mrf.mxu1 }
 0x6c6   :  { %v3363_v54 = vpop.eup %3362 }
 0x6c7   :  { %v3365_v56 = vpop.eup %3364  ;;  %v2184_v57 = vadd.f32 1.0, %v3363_v54 }
 0x6c8   :  { %v2042_v58 = vadd.f32 1.0, %v3365_v56 }
 0x6c9   :  { %3370 = vrcp.f32 %v2184_v57 }
 0x6ca   :  { %3372 = vrcp.f32 %v2042_v58 }
 0x6ce   :  { %v3367_v60 = vpop.eup %3366 }
 0x6cf   :  { %v2085_v7 = vmul.f32 %v3367_v60, %v2080_v59  ;;  %v3369_v14 = vpop.eup %3368 }
 0x6d0   :  { %v2191_v16 = vadd.f32 1.0, %v3369_v14 }
 0x6d1   :  { %v2086_v34 = vadd.f32 %v2667_v62, %v2085_v7 }
 0x6d3   :  { %3374 = vtanh.f32 %v2086_v34 }
 0x6d4   :  { %3376 = vrcp.f32 %v2191_v16 }
 0x6d6   :  { %v3371_v45 = vpop.eup %3370 }
 0x6d7   :  { %v2234_v9 = vmul.f32 %v3371_v45, %v2229_v17  ;;  %v3373_v19 = vpop.eup %3372  ;;  %v2685_v45 = vld [vmem:[%s4237_s0 + $0x2e] sm:$0x3] }
 0x6d8   :  { %v2088_v20 = vsub.f32 1.0, %v3373_v19  ;;  %v2090_v10 = vmul.f32 %v3373_v19, %v4076_v61 }
 0x6d9   :  { %v2235_v43 = vadd.f32 %v2675_v8, %v2234_v9 }
 0x6db   :  { %3378 = vtanh.f32 %v2235_v43 }
 0x6e0   :  { %v3375_v22 = vpop.eup %3374 }
 0x6e1   :  { %v2089_v1 = vmul.f32 %v3375_v22, %v2088_v20  ;;  %v3377_v11 = vpop.eup %3376 }
 0x6e2   :  { %v2237_v23 = vsub.f32 1.0, %v3377_v11  ;;  %v2239_v26 = vmul.f32 %v3377_v11, %v4098_v18 }
 0x6e3   :  { %v4158_v2 = vadd.f32 %v2090_v10, %v2089_v1  ;;  %v2396_v1 = vld [vmem:[%s4238_s1 + $0x4] sm:$0x3] }
 0x6e5   :  { %2681 = vst.msk [vmem:[%s4241_s6 + $0xc] sm:$0x3] %vm429_vm1, %v4158_v2  ;;  %v2249_v51 = vpack.c.bf16 %v4158_v2, %v4158_v2 }
 0x6e7   :  { %3182 = vmatmul.mubr.msk.bf16.vlgmr.msra.gmra.mxu0 %vm67_vm2, %v2249_v51  ;;  %3190 = vmatmul.mubr.msk.bf16.vlgmr.msra.gmra.mxu1 %vm67_vm2, %v2249_v51 }
 0x6e8   :  { %3194 = vmatpush3.bf16.msra.mxu0 %v3958_v28  ;;  %3202 = vmatpush3.bf16.msra.mxu1 %v3964_v37  ;;  %v3379_v61 = vpop.eup %3378 }
 0x6e9   :  { %3195 = vmatprep.subr.bf16.mxu0 %v3414_v0  ;;  %3203 = vmatprep.subr.bf16.mxu1 %v3414_v0  ;;  %v2238_v24 = vmul.f32 %v3379_v61, %v2237_v23 }
 0x6ea   :  { %3197 = vmatprep.mubr.msk.bf16.mxu0 %vm3415_vm0, %v3414_v0  ;;  %3205 = vmatprep.mubr.msk.bf16.mxu1 %vm3415_vm0, %v3414_v0 }
 0x6eb   :  { %v4180_v28 = vadd.f32 %v2239_v26, %v2238_v24 }
 0x6ec   :  { %3196 = vmatpush3.bf16.msra.mxu0 %v3977_v41  ;;  %3204 = vmatpush3.bf16.msra.mxu1 %v3983_v42  ;;  %v2683_v41 = vld [vmem:[%s4237_s0 + $0x2a] sm:$0x3] }
 0x6ed   :  { %3209 = vmatprep.subr.bf16.mxu0 %v3414_v0  ;;  %3217 = vmatprep.subr.bf16.mxu1 %v3414_v0  ;;  %2682 = vst.msk [vmem:[%s4242_s7 + $0x2] sm:$0x3] %vm429_vm1, %v4180_v28  ;;  %v2397_v37 = vpack.c.bf16 %v4180_v28, %v4180_v28 }
 0x6ef   :  { %3198 = vmatmul.mubr.msk.bf16.vlgmr.msra.gmra.mxu0 %vm67_vm2, %v2249_v51  ;;  %3206 = vmatmul.mubr.msk.bf16.vlgmr.msra.gmra.mxu1 %vm67_vm2, %v2397_v37 }
 0x6f0   :  { %3210 = vmatpush3.bf16.msra.mxu0 %v4002_v44  ;;  %3218 = vmatpush3.bf16.msra.mxu1 %v4008_v46 }
 0x6f1   :  { %3211 = vmatprep.subr.bf16.mxu0 %v3414_v0  ;;  %3219 = vmatprep.subr.bf16.mxu1 %v3414_v0 }
 0x6f2   :  { %3213 = vmatprep.mubr.msk.bf16.mxu0 %vm3415_vm0, %v3414_v0  ;;  %3221 = vmatprep.mubr.msk.bf16.mxu1 %vm3415_vm0, %v3414_v0  ;;  %v2684_v0 = vld [vmem:[%s4237_s0 + $0x2c] sm:$0x3] }
 0x6f4   :  { %3212 = vmatpush3.bf16.msra.mxu0 %v4020_v47  ;;  %3220 = vmatpush3.bf16.msra.mxu1 %v4026_v48 }
 0x6f7   :  { %3214 = vmatmul.mubr.msk.bf16.vlgmr.msra.gmra.mxu0 %vm67_vm2, %v2397_v37  ;;  %3222 = vmatmul.mubr.msk.bf16.vlgmr.msra.gmra.mxu1 %vm67_vm2, %v2397_v37 }
 0x7a7   :  { %v2287_v42 = vpop.f32.mrf.mxu0  ;;  %v2327_v44 = vpop.f32.mrf.mxu1 }
 0x7a8   :  { %v2333_v46 = vadd.f32 %v2683_v41, %v2287_v42  ;;  %v2340_v30 = vadd.f32 %v2684_v0, %v2327_v44 }
 0x7a9   :  { %v3183_v18 = vpop.f32.mrf.mxu0  ;;  %v3191_v27 = vpop.f32.mrf.mxu1 }
 0x7aa   :  { %v2688_v3 = vmul.f32 -1.442695, %v2333_v46  ;;  %v2689_v12 = vmul.f32 -1.442695, %v2340_v30 }
 0x7ab   :  { %v2290_v47 = vpop.f32.mrf.mxu0  ;;  %v2330_v48 = vpop.f32.mrf.mxu1 }
 0x7ac   :  { %3380 = vpow2.f32 %v2688_v3 }
 0x7ad   :  { %v3184_v4 = vpop.f32.mrf.mxu0  ;;  %v3192_v29 = vpop.f32.mrf.mxu1 }
 0x7af   :  { %v2381_v55 = vpop.f32.mrf.mxu0  ;;  %v2435_v32 = vpop.f32.mrf.mxu1 }
 0x7b0   :  { %v2481_v33 = vadd.f32 %v2435_v32, %v2394_v15  ;;  %v2382_v16 = vadd.f32 %v4060_v35, %v2381_v55 }
 0x7b1   :  { %v3199_v6 = vpop.f32.mrf.mxu0  ;;  %v3207_v13 = vpop.f32.mrf.mxu1 }
 0x7b2   :  { %v2693_v21 = vmul.f32 -1.442695, %v2481_v33 }
 0x7b3   :  { %v2384_v63 = vpop.f32.mrf.mxu0  ;;  %v2438_v36 = vpop.f32.mrf.mxu1 }
 0x7b4   :  { %3382 = vpow2.f32 %v2693_v21 }
 0x7b5   :  { %v3200_v38 = vpop.f32.mrf.mxu0  ;;  %3384 = vpow2.f32 %v2689_v12  ;;  %v3208_v40 = vpop.f32.mrf.mxu1 }
 0x7b7   :  { %v2475_v5 = vpop.f32.mrf.mxu0  ;;  %v2529_v50 = vpop.f32.mrf.mxu1 }
 0x7b8   :  { %v2488_v25 = vadd.f32 %v2475_v5, %v2395_v39  ;;  %v2530_v20 = vadd.f32 %v4069_v49, %v2529_v50 }
 0x7b9   :  { %v3381_v52 = vpop.eup %3380  ;;  %v3215_v31 = vpop.f32.mrf.mxu0 }
 0x7ba   :  { %v2337_v53 = vadd.f32 1.0, %v3381_v52  ;;  %v3223_v54 = vpop.f32.mrf.mxu1  ;;  %v2694_v56 = vmul.f32 -1.442695, %v2488_v25 }
 0x7bb   :  { %v2478_v57 = vpop.f32.mrf.mxu0 }
 0x7bc   :  { %3386 = vrcp.f32 %v2337_v53  ;;  %v2532_v58 = vpop.f32.mrf.mxu1 }
 0x7bd   :  { %v3216_v59 = vpop.f32.mrf.mxu0  ;;  %3388 = vpow2.f32 %v2694_v56 }
 0x7be   :  { %v3224_v60 = vpop.f32.mrf.mxu1 }
 0x7c1   :  { %v3383_v62 = vpop.eup %3382 }
 0x7c2   :  { %v3385_v7 = vpop.eup %3384  ;;  %v2485_v14 = vadd.f32 1.0, %v3383_v62 }
 0x7c3   :  { %v2344_v34 = vadd.f32 1.0, %v3385_v7 }
 0x7c4   :  { %3390 = vrcp.f32 %v2485_v14 }
 0x7c5   :  { %3392 = vrcp.f32 %v2344_v34 }
 0x7c9   :  { %v3387_v17 = vpop.eup %3386 }
 0x7ca   :  { %v2387_v8 = vmul.f32 %v3387_v17, %v2382_v16  ;;  %v3389_v9 = vpop.eup %3388 }
 0x7cb   :  { %v2492_v19 = vadd.f32 1.0, %v3389_v9 }
 0x7cc   :  { %v2388_v43 = vadd.f32 %v2685_v45, %v2387_v8 }
 0x7ce   :  { %3394 = vtanh.f32 %v2388_v43 }
 0x7cf   :  { %3396 = vrcp.f32 %v2492_v19 }
 0x7d1   :  { %v3391_v22 = vpop.eup %3390 }
 0x7d2   :  { %v2535_v35 = vmul.f32 %v3391_v22, %v2530_v20  ;;  %v3393_v11 = vpop.eup %3392 }
 0x7d3   :  { %v2390_v51 = vsub.f32 1.0, %v3393_v11  ;;  %v2392_v61 = vmul.f32 %v3393_v11, %v4158_v2 }
 0x7d4   :  { %v2536_v10 = vadd.f32 %v2535_v35, %v2396_v1 }
 0x7d6   :  { %3398 = vtanh.f32 %v2536_v10 }
 0x7db   :  { %v3395_v23 = vpop.eup %3394 }
 0x7dc   :  { %v2391_v24 = vmul.f32 %v3395_v23, %v2390_v51  ;;  %v3397_v37 = vpop.eup %3396 }
 0x7dd   :  { %v2538_v49 = vsub.f32 1.0, %v3397_v37  ;;  %v2540_v42 = vmul.f32 %v3397_v37, %v4180_v28 }
 0x7de   :  { %v2393_v26 = vadd.f32 %v2392_v61, %v2391_v24 }
 0x7e0   :  { %2696 = vst.msk [vmem:[%s4241_s6 + $0xe] sm:$0x3] %vm429_vm1, %v2393_v26 }
 0x7e3   :  { %v3399_v41 = vpop.eup %3398 }
 0x7e4   :  { %v2539_v44 = vmul.f32 %v3399_v41, %v2538_v49 }
 0x7e6   :  { %v2541_v46 = vadd.f32 %v2540_v42, %v2539_v44 }
 0x7e8   :  { %2544 = vst.msk [vmem:[%s4242_s7] sm:$0x3] %vm429_vm1, %v2541_v46 }

</bundles_post_ra>
